<compile_context>
chip_gen: v5e
topology: v5e:2x2
jax: 0.10.0
libtpu: 0.0.40
codegen_flags: <defaults>
</compile_context>

<pallas_src>
import functools

import jax
import jax.numpy as jnp
from jax.experimental import pallas as pl
from jax.experimental.pallas import tpu as pltpu

HIDDEN1 = 512
HIDDEN2 = 256
D_OUT = 1
D_OUT_PAD = 128   # fc3 output padded to a full lane width for dense stores


def discriminator_kernel(x_ref, w1_ref, b1_ref, w2_ref, b2_ref, w3_ref, b3_ref,
                         o_ref):
    # ---- fc1 + leaky_relu(0.2) ----  (cast x tile to bf16 in-kernel; f32 acc)
    x_bf = x_ref[...].astype(jnp.bfloat16)
    h = jnp.dot(x_bf, w1_ref[...], preferred_element_type=jnp.float32)
    h = h + b1_ref[...]                       # (tb, 512) + (1, 512)
    h = jnp.where(h >= 0, h, 0.2 * h)         # f32 epilogue (safe on v5e too)

    # ---- fc2 + leaky_relu(0.2) ----
    h = jnp.dot(h.astype(jnp.bfloat16), w2_ref[...],
                preferred_element_type=jnp.float32)
    h = h + b2_ref[...]                       # (tb, 256) + (1, 256)
    h = jnp.where(h >= 0, h, 0.2 * h)

    # ---- fc3 (padded to 128 cols) + sigmoid ----
    y = jnp.dot(h.astype(jnp.bfloat16), w3_ref[...],
                preferred_element_type=jnp.float32)
    y = y + b3_ref[...]                       # (tb, 128) + (1, 128)
    # sigmoid via EUP exp + EUP approximate reciprocal (no VALU divide)
    t = jnp.exp(-y)
    o_ref[...] = pl.reciprocal(1.0 + t, approx=True)


def discriminator_forward(x, w1, b1, w2, b2, w3, b3, *, block_b=256):
    """x: (B, d_in) f32, d_in a multiple of 128.
    w1: (d_in, 512) bf16; b1: (1, 512) f32; w2: (512, 256) bf16;
    b2: (1, 256) f32; w3: (256, 128) bf16 (cols 1..127 zero);
    b3: (1, 128) f32 (cols 1..127 zero).  Returns (B, 1) f32 probabilities."""
    B, d_in = x.shape
    assert d_in % 128 == 0, "pad d_input_dim to a multiple of 128 at init"
    h1 = w1.shape[1]
    h2 = w2.shape[1]
    d_out_pad = w3.shape[1]

    # Keep >= 2 grid steps when the batch allows it (shards the "parallel"
    # batch axis across v7x's two TensorCores); stay a multiple of 128.
    while block_b > 128 and pl.cdiv(B, block_b) < 2:
        block_b //= 2

    n_blocks = pl.cdiv(B, block_b)
    Bp = n_blocks * block_b
    if Bp != B:
        # Ragged tail only; typical GAN batches divide block_b so no pad pass.
        x = jnp.pad(x, ((0, Bp - B), (0, 0)))

    flops = 2 * Bp * (d_in * h1 + h1 * h2 + h2 * d_out_pad)
    bytes_accessed = (
        Bp * d_in * 4                                   # x (f32)
        + (w1.size + w2.size + w3.size) * 2             # bf16 weights
        + (b1.size + b2.size + b3.size) * 4             # f32 biases
        + Bp * d_out_pad * 4                            # f32 output
    )

    out = pl.pallas_call(
        discriminator_kernel,
        out_shape=jax.ShapeDtypeStruct((Bp, d_out_pad), jnp.float32),
        grid_spec=pltpu.PrefetchScalarGridSpec(
            num_scalar_prefetch=0,
            grid=(n_blocks,),
            in_specs=[
                pl.BlockSpec((block_b, d_in), lambda i: (i, 0)),   # x tile
                pl.BlockSpec((d_in, h1), lambda i: (0, 0)),        # W1 (resident)
                pl.BlockSpec((1, h1), lambda i: (0, 0)),           # b1
                pl.BlockSpec((h1, h2), lambda i: (0, 0)),          # W2 (resident)
                pl.BlockSpec((1, h2), lambda i: (0, 0)),           # b2
                pl.BlockSpec((h2, d_out_pad), lambda i: (0, 0)),   # W3 (resident)
                pl.BlockSpec((1, d_out_pad), lambda i: (0, 0)),    # b3
            ],
            out_specs=pl.BlockSpec((block_b, d_out_pad), lambda i: (i, 0)),
        ),
        compiler_params=pltpu.CompilerParams(
            dimension_semantics=("parallel",),
        ),
        cost_estimate=pl.CostEstimate(
            flops=flops,
            transcendentals=Bp * d_out_pad,   # exp lanes in the sigmoid
            bytes_accessed=bytes_accessed,
        ),
    )(x, w1, b1, w2, b2, w3, b3)

    return out[:B, :D_OUT]


def init_discriminator_params(key, d_input_dim):
    """PyTorch nn.Linear default init: U[-1/sqrt(fan_in), 1/sqrt(fan_in)].
    Weights stored persistently as bf16 (in_features, out_features); biases as
    (1, out_features) f32. fc3 weight/bias are zero-padded to 128 output
    columns so the kernel's output store is lane-dense."""
    assert d_input_dim % 128 == 0, (
        "pad the flattened input features to a multiple of 128 "
        "(zero-pad x and the extra W1 rows once at init)")
    ks = jax.random.split(key, 6)

    bound1 = 1.0 / (d_input_dim ** 0.5)
    w1 = jax.random.uniform(ks[0], (d_input_dim, HIDDEN1), jnp.float32,
                            -bound1, bound1).astype(jnp.bfloat16)
    b1 = jax.random.uniform(ks[1], (HIDDEN1,), jnp.float32,
                            -bound1, bound1).reshape(1, HIDDEN1)

    bound2 = 1.0 / (HIDDEN1 ** 0.5)
    w2 = jax.random.uniform(ks[2], (HIDDEN1, HIDDEN2), jnp.float32,
                            -bound2, bound2).astype(jnp.bfloat16)
    b2 = jax.random.uniform(ks[3], (HIDDEN2,), jnp.float32,
                            -bound2, bound2).reshape(1, HIDDEN2)

    bound3 = 1.0 / (HIDDEN2 ** 0.5)
    w3_real = jax.random.uniform(ks[4], (HIDDEN2, D_OUT), jnp.float32,
                                 -bound3, bound3)
    b3_real = jax.random.uniform(ks[5], (D_OUT,), jnp.float32, -bound3, bound3)
    # Zero-pad fc3 to 128 output columns (free MXU work, dense output stores).
    w3 = jnp.zeros((HIDDEN2, D_OUT_PAD), jnp.float32).at[:, :D_OUT].set(
        w3_real).astype(jnp.bfloat16)
    b3 = jnp.zeros((1, D_OUT_PAD), jnp.float32).at[:, :D_OUT].set(
        b3_real.reshape(1, D_OUT))

    return w1, b1, w2, b2, w3, b3


def discriminator_ref(x, w1, b1, w2, b2, w3, b3):
    """Pure-JAX reference with the same bf16-input / f32-accumulate matmuls."""
    h = jnp.dot(x.astype(jnp.bfloat16), w1,
                preferred_element_type=jnp.float32) + b1
    h = jnp.where(h >= 0, h, 0.2 * h)
    h = jnp.dot(h.astype(jnp.bfloat16), w2,
                preferred_element_type=jnp.float32) + b2
    h = jnp.where(h >= 0, h, 0.2 * h)
    y = jnp.dot(h.astype(jnp.bfloat16), w3,
                preferred_element_type=jnp.float32) + b3
    return (1.0 / (1.0 + jnp.exp(-y)))[:, :D_OUT]


if __name__ == "__main__":
    key = jax.random.PRNGKey(0)
    B = 512            # 2 grid steps at block_b=256 -> both v7x TCs busy
    d_input_dim = 256  # multiple of 128 (e.g. MNIST 784 would be padded to 896)

    kx, kp = jax.random.split(key)
    x = jax.random.normal(kx, (B, d_input_dim), dtype=jnp.float32)
    params = init_discriminator_params(kp, d_input_dim)

    fwd = jax.jit(functools.partial(discriminator_forward, block_b=256))
    out = fwd(x, *params)
    out = jax.block_until_ready(out)

    # sanity-check against pure-JAX reference (same bf16 matmul inputs)
    ref = discriminator_ref(x, *params)
    assert out.shape == (B, 1)
    assert bool(jnp.all(jnp.isfinite(out)))
    assert jnp.allclose(out, ref, atol=2e-3, rtol=2e-3), "mismatch vs reference"

    print("KERNEL_OK")
</pallas_src>

<mosaic_0001>
module attributes {stable_mosaic.version = 11 : i64} {
  func.func @discriminator_kernel(%arg0: i32, %arg1: memref<256x256xf32, #tpu.memory_space<vmem>>, %arg2: memref<256x512xbf16, #tpu.memory_space<vmem>>, %arg3: memref<1x512xf32, #tpu.memory_space<vmem>>, %arg4: memref<512x256xbf16, #tpu.memory_space<vmem>>, %arg5: memref<1x256xf32, #tpu.memory_space<vmem>>, %arg6: memref<256x128xbf16, #tpu.memory_space<vmem>>, %arg7: memref<1x128xf32, #tpu.memory_space<vmem>>, %arg8: memref<256x128xf32, #tpu.memory_space<vmem>>) attributes {dimension_semantics = [#tpu.dimension_semantics<parallel>], iteration_bounds = array<i64: 2>, scalar_prefetch = 0 : i64, scratch_operands = 0 : i64, tpu.core_type = #tpu.core_type<tc>, window_params = [{transform_indices = @transform_0, window_bounds = array<i64: 256, 256>}, {pipeline_mode = #tpu.pipeline_mode<synchronous>, transform_indices = @transform_1, window_bounds = array<i64: 256, 512>}, {pipeline_mode = #tpu.pipeline_mode<synchronous>, transform_indices = @transform_2, window_bounds = array<i64: 1, 512>}, {pipeline_mode = #tpu.pipeline_mode<synchronous>, transform_indices = @transform_3, window_bounds = array<i64: 512, 256>}, {pipeline_mode = #tpu.pipeline_mode<synchronous>, transform_indices = @transform_4, window_bounds = array<i64: 1, 256>}, {pipeline_mode = #tpu.pipeline_mode<synchronous>, transform_indices = @transform_5, window_bounds = array<i64: 256, 128>}, {pipeline_mode = #tpu.pipeline_mode<synchronous>, transform_indices = @transform_6, window_bounds = array<i64: 1, 128>}, {transform_indices = @transform_7, window_bounds = array<i64: 256, 128>}]} {
    %c0 = arith.constant 0 : index
    %c0_0 = arith.constant 0 : index
    %0 = vector.load %arg1[%c0, %c0_0] : memref<256x256xf32, #tpu.memory_space<vmem>>, vector<256x256xf32>
    %1 = arith.truncf %0 : vector<256x256xf32> to vector<256x256xbf16>
    %c0_1 = arith.constant 0 : index
    %c0_2 = arith.constant 0 : index
    %2 = vector.load %arg2[%c0_1, %c0_2] : memref<256x512xbf16, #tpu.memory_space<vmem>>, vector<256x512xbf16>
    %cst = arith.constant dense<0.000000e+00> : vector<256x512xf32>
    %3 = tpu.matmul %1, %2, %cst {dimension_numbers = #tpu.dot_dimension_numbers<[1], [0], [0], [1], [0, 0, 1, 1], [], []>} : vector<256x256xbf16>, vector<256x512xbf16>, vector<256x512xf32> -> vector<256x512xf32>
    %c0_3 = arith.constant 0 : index
    %c0_4 = arith.constant 0 : index
    %4 = vector.load %arg3[%c0_3, %c0_4] : memref<1x512xf32, #tpu.memory_space<vmem>>, vector<1x512xf32>
    %5 = vector.broadcast %4 : vector<1x512xf32> to vector<256x512xf32>
    %6 = arith.addf %3, %5 : vector<256x512xf32>
    %cst_5 = arith.constant 0.000000e+00 : f32
    %7 = vector.broadcast %cst_5 : f32 to vector<256x512xf32>
    %8 = arith.cmpf oge, %6, %7 : vector<256x512xf32>
    %cst_6 = arith.constant 2.000000e-01 : f32
    %9 = vector.broadcast %cst_6 : f32 to vector<256x512xf32>
    %10 = arith.mulf %9, %6 : vector<256x512xf32>
    %11 = arith.select %8, %6, %10 : vector<256x512xi1>, vector<256x512xf32>
    %12 = arith.truncf %11 : vector<256x512xf32> to vector<256x512xbf16>
    %c0_7 = arith.constant 0 : index
    %c0_8 = arith.constant 0 : index
    %13 = vector.load %arg4[%c0_7, %c0_8] : memref<512x256xbf16, #tpu.memory_space<vmem>>, vector<512x256xbf16>
    %cst_9 = arith.constant dense<0.000000e+00> : vector<256x256xf32>
    %14 = tpu.matmul %12, %13, %cst_9 {dimension_numbers = #tpu.dot_dimension_numbers<[1], [0], [0], [1], [0, 0, 1, 1], [], []>} : vector<256x512xbf16>, vector<512x256xbf16>, vector<256x256xf32> -> vector<256x256xf32>
    %c0_10 = arith.constant 0 : index
    %c0_11 = arith.constant 0 : index
    %15 = vector.load %arg5[%c0_10, %c0_11] : memref<1x256xf32, #tpu.memory_space<vmem>>, vector<1x256xf32>
    %16 = vector.broadcast %15 : vector<1x256xf32> to vector<256x256xf32>
    %17 = arith.addf %14, %16 : vector<256x256xf32>
    %cst_12 = arith.constant 0.000000e+00 : f32
    %18 = vector.broadcast %cst_12 : f32 to vector<256x256xf32>
    %19 = arith.cmpf oge, %17, %18 : vector<256x256xf32>
    %cst_13 = arith.constant 2.000000e-01 : f32
    %20 = vector.broadcast %cst_13 : f32 to vector<256x256xf32>
    %21 = arith.mulf %20, %17 : vector<256x256xf32>
    %22 = arith.select %19, %17, %21 : vector<256x256xi1>, vector<256x256xf32>
    %23 = arith.truncf %22 : vector<256x256xf32> to vector<256x256xbf16>
    %c0_14 = arith.constant 0 : index
    %c0_15 = arith.constant 0 : index
    %24 = vector.load %arg6[%c0_14, %c0_15] : memref<256x128xbf16, #tpu.memory_space<vmem>>, vector<256x128xbf16>
    %cst_16 = arith.constant dense<0.000000e+00> : vector<256x128xf32>
    %25 = tpu.matmul %23, %24, %cst_16 {dimension_numbers = #tpu.dot_dimension_numbers<[1], [0], [0], [1], [0, 0, 1, 1], [], []>} : vector<256x256xbf16>, vector<256x128xbf16>, vector<256x128xf32> -> vector<256x128xf32>
    %c0_17 = arith.constant 0 : index
    %c0_18 = arith.constant 0 : index
    %26 = vector.load %arg7[%c0_17, %c0_18] : memref<1x128xf32, #tpu.memory_space<vmem>>, vector<1x128xf32>
    %27 = vector.broadcast %26 : vector<1x128xf32> to vector<256x128xf32>
    %28 = arith.addf %25, %27 : vector<256x128xf32>
    %cst_19 = arith.constant 0.000000e+00 : f32
    %29 = vector.broadcast %cst_19 : f32 to vector<256x128xf32>
    %30 = arith.subf %29, %28 : vector<256x128xf32>
    %31 = math.exp %30 : vector<256x128xf32>
    %cst_20 = arith.constant 1.000000e+00 : f32
    %32 = vector.broadcast %cst_20 : f32 to vector<256x128xf32>
    %33 = arith.addf %32, %31 : vector<256x128xf32>
    %34 = tpu.reciprocal %33 {approx = true} : vector<256x128xf32> -> vector<256x128xf32>
    %c0_21 = arith.constant 0 : index
    %c0_22 = arith.constant 0 : index
    %35 = vector.load %arg8[%c0_21, %c0_22] : memref<256x128xf32, #tpu.memory_space<vmem>>, vector<256x128xf32>
    tpu.vector_store %arg8[%c0_21, %c0_22], %34 {strides = array<i32>} : memref<256x128xf32, #tpu.memory_space<vmem>>, vector<256x128xf32>,
    return
  }
  func.func @transform_0(%arg0: i32) -> (i32, i32) {
    %c0_i32 = arith.constant 0 : i32
    %c0_i32_0 = arith.constant 0 : i32
    return %arg0, %c0_i32 : i32, i32
  }
  func.func @transform_1(%arg0: i32) -> (i32, i32) {
    %c0_i32 = arith.constant 0 : i32
    %c0_i32_0 = arith.constant 0 : i32
    %c0_i32_1 = arith.constant 0 : i32
    return %c0_i32, %c0_i32_0 : i32, i32
  }
  func.func @transform_2(%arg0: i32) -> (i32, i32) {
    %c0_i32 = arith.constant 0 : i32
    %c0_i32_0 = arith.constant 0 : i32
    %c0_i32_1 = arith.constant 0 : i32
    return %c0_i32, %c0_i32_0 : i32, i32
  }
  func.func @transform_3(%arg0: i32) -> (i32, i32) {
    %c0_i32 = arith.constant 0 : i32
    %c0_i32_0 = arith.constant 0 : i32
    %c0_i32_1 = arith.constant 0 : i32
    return %c0_i32, %c0_i32_0 : i32, i32
  }
  func.func @transform_4(%arg0: i32) -> (i32, i32) {
    %c0_i32 = arith.constant 0 : i32
    %c0_i32_0 = arith.constant 0 : i32
    %c0_i32_1 = arith.constant 0 : i32
    return %c0_i32, %c0_i32_0 : i32, i32
  }
  func.func @transform_5(%arg0: i32) -> (i32, i32) {
    %c0_i32 = arith.constant 0 : i32
    %c0_i32_0 = arith.constant 0 : i32
    %c0_i32_1 = arith.constant 0 : i32
    return %c0_i32, %c0_i32_0 : i32, i32
  }
  func.func @transform_6(%arg0: i32) -> (i32, i32) {
    %c0_i32 = arith.constant 0 : i32
    %c0_i32_0 = arith.constant 0 : i32
    %c0_i32_1 = arith.constant 0 : i32
    return %c0_i32, %c0_i32_0 : i32, i32
  }
  func.func @transform_7(%arg0: i32) -> (i32, i32) {
    %c0_i32 = arith.constant 0 : i32
    %c0_i32_0 = arith.constant 0 : i32
    return %arg0, %c0_i32 : i32, i32
  }
}

</mosaic_0001>

<bundles_post_ra>
// kernel: discriminator_forward.1
= control target key start
LH: loop header
LB: loop body
LE: loop exit
PB: predicated region body
PF: predicated region fallthrough
CT: control target
= control target key end

     0   :  { %12 = vsyncpa [#allocation3], 0  ;;  %s6785_s0 = inlined_call_operand.hbm [shape: f32[512,256], index: 0, kind: input, shape index: {}]   ;;  %s6786_s1 = inlined_call_operand.hbm [shape: bf16[256,512], index: 1, kind: input, shape index: {}]   ;;  %s6787_s2 = inlined_call_operand.hbm [shape: f32[1,512], index: 2, kind: input, shape index: {}]   ;;  %s6788_s3 = inlined_call_operand.hbm [shape: bf16[512,256], index: 3, kind: input, shape index: {}]   ;;  %s6789_s4 = inlined_call_operand.vmem [shape: f32[1,256], index: 4, kind: input, shape index: {}]   ;;  %s6790_s5 = inlined_call_operand.hbm [shape: bf16[256,128], index: 5, kind: input, shape index: {}]   ;;  %s6791_s6 = inlined_call_operand.vmem [shape: f32[1,128], index: 6, kind: input, shape index: {}]   ;;  %s6792_s7 = inlined_call_operand.vmem [shape: f32[512,128], index: 7, kind: output, shape index: {}]  }
   0x1   :  { %14 = vsyncpa [#allocation3 + $0x1], 0 }
   0x2   :  { %15 = vsyncpa [#allocation5], 0 }
   0x3   :  { %16 = vsyncpa [#allocation8], 0  ;;  %s5172_s24 = smov 0   ;;  %s5174_s25 = smov 0  }
   0x4   :  { %s5176_s26 = smov 0   ;;  %s5178_s27 = smov 0  }
   0x5 LB: > { %s6793_s28 = sadd.s32 4294967295, %s5120_s27   ;;  %p42_p0 = scmp.ne.s32.totalorder %s5112_s25, %s5108_s24  ;;  %s5120_s27 = sphi %s5178_s27, %s7054_s27   ;;  %s5116_s26 = sphi %s5176_s26, %s7053_s26   ;;  %s5112_s25 = sphi %s5174_s25, %s7052_s25   ;;  %s5108_s24 = sphi %s5172_s24, %s7051_s24  }
   0x6   : > { %p5194_p1 = scmp.eq.s32.totalorder %s6793_s28, 0  ;;  %p3953_p2 = scmp.ge.s32.totalorder %s5120_s27, 1 }
   0x7   : > { %p205_p3 = scmp.lt.s32.totalorder %s5120_s27, 3  ;;  %s216_s10 = sshll.u32 %s6786_s1, 4  ;;  %s217_s10 = int_to_ptr.hbm [resolvable:$true] %s216_s10 }
   0x8   : > { %p5202_p4 = por %p5194_p1, %p42_p0  ;;  %s5122_s12 = smov [#allocation4]  }
   0x9   : > { %p5209_p5 = pnand %p3953_p2, %p205_p3  ;;  %s218_s13 = sshll.u32 %s5122_s12, 4  ;;  %s219_s13 = int_to_ptr.vmem [resolvable:$true] %s218_s13 }
   0xa   : > { %s242_s17 = sshll.u32 %s6788_s3, 4  ;;  %s5123_s18 = smov 256   ;;  %s243_s17 = int_to_ptr.hbm [resolvable:$true] %s242_s17 }
   0xb   : > { %p4729_p6 = pneg %p5209_p5  ;;  %s5124_s19 = smov 16  }
   0xc   : > { %s5125_s20 = smov [#allocation7]   ;;  %s5126_s22 = smov 128  }
   0xd   : > { %p5217_p7 = pnand %p4729_p6, %p5194_p1  ;;  %s244_s21 = sshll.u32 %s5125_s20, 4  ;;  %s245_s21 = int_to_ptr.vmem [resolvable:$true] %s244_s21 }
   0xe   : > { %s5127_s23 = smov 8   ;;  %s231_s9 = sshll.u32 %s6787_s2, 4  ;;  %s232_s9 = int_to_ptr.hbm [resolvable:$true] %s231_s9 }
   0xf   : > { %4732 = dma.hbm_to_vmem [thread:$0]  (!%p5217_p7), %s217_s10, 8192, %s219_s13, [#allocation5], %s5123_s18, %s5123_s18, %s5124_s19  }
  0x10   : > { %4738 = dma.hbm_to_vmem [thread:$0]  (!%p5217_p7), %s243_s17, 8192, %s245_s21, [#allocation8], %s5126_s22, %s5126_s22, %s5127_s23  }
  0x11   : > { %s5128_s12 = smov [#allocation6]   ;;  %s259_s16 = sshll.u32 %s6790_s5, 4  ;;  %s260_s16 = int_to_ptr.hbm [resolvable:$true] %s259_s16 }
  0x12   : > { %s233_s10 = sshll.u32 %s5128_s12, 4  ;;  %s5129_s17 = smov [#allocation9]   ;;  %s234_s10 = int_to_ptr.vmem [resolvable:$true] %s233_s10 }
  0x13   : > { %4735 = dma.hbm_to_vmem [thread:$0]  (!%p5217_p7), %s232_s9, 64, %s234_s10, [#allocation5]  }
  0x14   : > { %s261_s20 = sshll.u32 %s5129_s17, 4  ;;  %s5130_s21 = smov 64   ;;  %s262_s20 = int_to_ptr.vmem [resolvable:$true] %s261_s20 }
  0x15   : > { %s5131_s22 = smov 4   ;;  %s5242_s23 = sadd.s32 1, %s5120_s27  }
  0x16   : > { %4741 = dma.hbm_to_vmem [thread:$0]  (!%p5217_p7), %s260_s16, 2048, %s262_s20, [#allocation8], %s5130_s21, %s5130_s21, %s5131_s22  }
  0x17   : > { %s26_s24 = ssub.s32 %s5120_s27, %s5242_s23  ;;  %s29_s8 = sadd.s32 1, %s5116_s26 }
  0x18   : > { %p27_p8 = scmp.eq.s32.totalorder %s26_s24, 0  ;;  %p36_p9 = scmp.ne.s32.totalorder %s5116_s26, %s5112_s25 }
  0x19   : > { %p37_p10 = scmp.eq.s32.totalorder %s5120_s27, 0  ;;  %s278_s12 = sand.u32 1, %s5116_s26  }
  0x1a   : > { %s5251_s9 = scalar_select %p27_p8, %s5116_s26, %s29_s8  }
  0x1b   : > { %p38_p11 = por %p37_p10, %p36_p9  ;;  %s4550_s10 = sshll.u32 %s5120_s27, 9 }
  0x1c   : > { %p4750_p12 = scmp.lt.s32.totalorder %s5120_s27, 2  ;;  %s3959_s13 = sshll.u32 %s278_s12, 9 }
  0x1d   : > { %s288_s14 = scalar_lea.hbm %s6785_s0, %s4550_s10  ;;  %s282_s20 = scalar_lea.vmem [#allocation2], %s3959_s13 }
  0x1e   : > { %s289_s16 = sshll.u32 %s288_s14, 4  ;;  %s291_s21 = sshll.u32 %s282_s20, 4  ;;  %s290_s16 = int_to_ptr.hbm [resolvable:$true] %s289_s16  ;;  %s292_s21 = int_to_ptr.vmem [resolvable:$true] %s291_s21 }
  0x1f   : > { %p5259_p13 = pnand %p4750_p12, %p38_p11  ;;  %s279_s24 = scalar_lea.sflag [#allocation3], %s278_s12 }
  0x20   : > { %s5048_s8 = sshra.s32 %s290_s16, 4  ;;  %s5055_s13 = scalar_lea.hbm %s6785_s0, 1024  ;;  %s5049_s8 = int_to_ptr.hbm [resolvable:$true] %s5048_s8 }
  0x21   : > { %s5050_s28 = scalar_lea.hbm %s5049_s8, 512  ;;  %p5052_p2 = pneg %p5259_p13 }
  0x22   : > { %p5051_p0 = scmp.ne.s32.totalorder %s5049_s8, %s5050_s28  ;;  %p5056_p7 = scmp.lt.s32.totalorder %s5049_s8, %s6785_s0 }
  0x23   : > { %p5057_p8 = scmp.lt.s32.totalorder %s5055_s13, %s5050_s28 }
  0x24   : > { %p5053_p3 = pnand %p5052_p2, %p5051_p0 }
  0x25   : > { %p5058_p9 = por %p5057_p8, %p5056_p7 }
  0x26   : > { %p5054_p6 = pneg %p5053_p3 }
  0x28   : > { %p5059_p10 = pnand %p5058_p9, %p5054_p6 }
  0x2a   : > { %5062 = shalt.err (!%p5059_p10)
}
  0x2b   : > { %4745 = dma.hbm_to_vmem [thread:$0]  (!%p5259_p13), %s290_s16, 8192, %s292_s21, %s279_s24, %s5123_s18, %s5123_s18, %s5124_s19  }
  0x2c   : > { %303 = sbr.rel (%p5209_p5) target bundleno = 1534 (0x5fe), region = 48 }
  0x31   : > { %s305_s12 = sand.u32 1, %s5112_s25  }
  0x32   : > { %s3964_s20 = sshll.u32 %s305_s12, 9  ;;  %s306_s10 = scalar_lea.sflag [#allocation3], %s305_s12 }
  0x33   : > { %s5279_s15 = scalar_lea.vmem [#allocation2], %s3964_s20 }
  0x34   : > { %5095 = dma.done.wait (%p5202_p4), %s306_s10, 8192  }
  0x35   : > { %5097 = vsyncadd (%p5202_p4), %s306_s10, 4294959104 }
  0x36   : > { %5099 = dma.done.wait (%p5194_p1), [#allocation5], 8256  }
  0x37   : > { %5101 = vsyncadd (%p5194_p1), [#allocation5], 4294959040 }
  0x38   : > { %5103 = dma.done.wait (%p5194_p1), [#allocation8], 10240  }
  0x39   : > { %5105 = vsyncadd (%p5194_p1), [#allocation8], 4294957056  ;;  %v4085_v0 = vld [vmem:[#allocation4 + $0xe0] sm:$0xf]  ;;  %v4581_v1 = vld [vmem:[#allocation4 + $0xec] sm:$0xf0] }
  0x3a   : > { %v4213_v2 = vld [vmem:[#allocation4 + $0x1e0] sm:$0xf]  ;;  %v4086_v3 = vor.u32 %v4581_v1, %v4085_v0  ;;  %v4613_v4 = vld [vmem:[#allocation4 + $0x1ec] sm:$0xf0]  ;;  %v4579_v48 = vld [vmem:[#allocation4 + $0xe4] sm:$0xf] }
  0x3b   : > { %v4069_v5 = vld [vmem:[#allocation4 + $0xc0] sm:$0xf]  ;;  %v4577_v6 = vld [vmem:[#allocation4 + $0xcc] sm:$0xf0]  ;;  %v4214_v7 = vor.u32 %v4613_v4, %v4213_v2  ;;  %v4087_v49 = vld [vmem:[#allocation4 + $0xf0] sm:$0xf0] }
  0x3c   : > { %v4197_v8 = vld [vmem:[#allocation4 + $0x1c0] sm:$0xf]  ;;  %v4609_v9 = vld [vmem:[#allocation4 + $0x1cc] sm:$0xf0]  ;;  %858 = vmatpush.bf16.msra.mxu0 %v4086_v3  ;;  %4695 = vmatpush.bf16.msra.mxu2 %v4086_v3  ;;  %v4070_v10 = vor.u32 %v4577_v6, %v4069_v5  ;;  %v4611_v50 = vld [vmem:[#allocation4 + $0x1e4] sm:$0xf]  ;;  %v4090_v60 = vor.u32 %v4579_v48, %v4087_v49 }
  0x3d   : > { %947 = vmatpush.bf16.msra.mxu1 %v4214_v7  ;;  %4703 = vmatpush.bf16.msra.mxu3 %v4214_v7  ;;  %v4198_v11 = vor.u32 %v4609_v9, %v4197_v8  ;;  %v4053_v12 = vld [vmem:[#allocation4 + $0xa0] sm:$0xf]  ;;  %v4573_v13 = vld [vmem:[#allocation4 + $0xac] sm:$0xf0]  ;;  %v4215_v51 = vld [vmem:[#allocation4 + $0x1f0] sm:$0xf0] }
  0x3e   : > { %v4181_v14 = vld [vmem:[#allocation4 + $0x1a0] sm:$0xf]  ;;  %v4605_v15 = vld [vmem:[#allocation4 + $0x1ac] sm:$0xf0]  ;;  %v4054_v16 = vor.u32 %v4573_v13, %v4053_v12  ;;  %v369_v55 = vld [vmem:[%s5279_s15 + $0x8] sm:$0xff]  ;;  %v4218_v61 = vor.u32 %v4611_v50, %v4215_v51  ;;  %s7045_s16 = sadd.s32 4294967295, %s5120_s27  }
  0x3f   : > { %v4182_v17 = vor.u32 %v4605_v15, %v4181_v14  ;;  %v4037_v18 = vld [vmem:[#allocation4 + $0x80] sm:$0xf]  ;;  %v4569_v19 = vld [vmem:[#allocation4 + $0x8c] sm:$0xf0]  ;;  %v371_v57 = vld [vmem:[%s5279_s15 + $0x18] sm:$0xff]  ;;  %s3969_s21 = sshll.u32 %s7045_s16, 5 }
  0x40   : > { %859 = vmatpush.bf16.msra.mxu0 %v4070_v10  ;;  %4696 = vmatpush.bf16.msra.mxu2 %v4070_v10  ;;  %v4165_v20 = vld [vmem:[#allocation4 + $0x180] sm:$0xf]  ;;  %v4601_v21 = vld [vmem:[#allocation4 + $0x18c] sm:$0xf0]  ;;  %v4038_v22 = vor.u32 %v4569_v19, %v4037_v18  ;;  %v401_v58 = vld [vmem:[%s5279_s15 + $0x108] sm:$0xff]  ;;  %v5305_v4 = vpack.c.bf16 %v371_v57, %v369_v55  ;;  %p363_p1 = scmp.lt.s32.totalorder %s3969_s21, 63 }
  0x41   : > { %948 = vmatpush.bf16.msra.mxu1 %v4198_v11  ;;  %4704 = vmatpush.bf16.msra.mxu3 %v4198_v11  ;;  %v4166_v23 = vor.u32 %v4601_v21, %v4165_v20  ;;  %v4021_v24 = vld [vmem:[#allocation4 + $0x60] sm:$0xf]  ;;  %v4565_v25 = vld [vmem:[#allocation4 + $0x6c] sm:$0xf0]  ;;  %v403_v59 = vld [vmem:[%s5279_s15 + $0x118] sm:$0xff] }
  0x42   : > { %v4149_v26 = vld [vmem:[#allocation4 + $0x160] sm:$0xf]  ;;  %v4597_v27 = vld [vmem:[#allocation4 + $0x16c] sm:$0xf0]  ;;  %v4022_v28 = vor.u32 %v4565_v25, %v4021_v24  ;;  %v4575_v62 = vld [vmem:[#allocation4 + $0xc4] sm:$0xf]  ;;  %v5307_v5 = vpack.c.bf16 %v403_v59, %v401_v58 }
  0x43   : > { %v4150_v29 = vor.u32 %v4597_v27, %v4149_v26  ;;  %v4005_v30 = vld [vmem:[#allocation4 + $0x40] sm:$0xf]  ;;  %v4561_v31 = vld [vmem:[#allocation4 + $0x4c] sm:$0xf0]  ;;  %v4071_v1 = vld [vmem:[#allocation4 + $0xd0] sm:$0xf0] }
  0x44   : > { %860 = vmatpush.bf16.msra.mxu0 %v4054_v16  ;;  %4697 = vmatpush.bf16.msra.mxu2 %v4054_v16  ;;  %v4133_v32 = vld [vmem:[#allocation4 + $0x140] sm:$0xf]  ;;  %v4593_v33 = vld [vmem:[#allocation4 + $0x14c] sm:$0xf0]  ;;  %v4006_v34 = vor.u32 %v4561_v31, %v4005_v30  ;;  %v4607_v2 = vld [vmem:[#allocation4 + $0x1c4] sm:$0xf]  ;;  %v4074_v6 = vor.u32 %v4575_v62, %v4071_v1 }
  0x45   : > { %949 = vmatpush.bf16.msra.mxu1 %v4182_v17  ;;  %4705 = vmatpush.bf16.msra.mxu3 %v4182_v17  ;;  %v4134_v35 = vor.u32 %v4593_v33, %v4133_v32  ;;  %v3989_v36 = vld [vmem:[#allocation4 + $0x20] sm:$0xf]  ;;  %v4557_v37 = vld [vmem:[#allocation4 + $0x2c] sm:$0xf0]  ;;  %v4199_v3 = vld [vmem:[#allocation4 + $0x1d0] sm:$0xf0] }
  0x46   : > { %v4117_v38 = vld [vmem:[#allocation4 + $0x120] sm:$0xf]  ;;  %v4589_v39 = vld [vmem:[#allocation4 + $0x12c] sm:$0xf0]  ;;  %v3990_v40 = vor.u32 %v4557_v37, %v3989_v36  ;;  %6854 = vst [vmem:[#allocation14_spill] sm:$0xff] %v5307_v5  ;;  %v4202_v7 = vor.u32 %v4607_v2, %v4199_v3  ;;  %v373_v18 = vld [vmem:[%s5279_s15 + $0x28] sm:$0xff] }
  0x47   : > { %v3973_v41 = vld [vmem:[#allocation4] sm:$0xf]  ;;  %v4118_v42 = vor.u32 %v4589_v39, %v4117_v38  ;;  %v4553_v43 = vld [vmem:[#allocation4 + $0xc] sm:$0xf0]  ;;  %v4571_v8 = vld [vmem:[#allocation4 + $0xa4] sm:$0xf] }
  0x48   : > { %861 = vmatpush.bf16.msra.mxu0 %v4038_v22  ;;  %4698 = vmatpush.bf16.msra.mxu2 %v4038_v22  ;;  %v4101_v44 = vld [vmem:[#allocation4 + $0x100] sm:$0xf]  ;;  %v4585_v45 = vld [vmem:[#allocation4 + $0x10c] sm:$0xf0]  ;;  %v3974_v52 = vor.u32 %v4553_v43, %v3973_v41  ;;  %v4055_v9 = vld [vmem:[#allocation4 + $0xb0] sm:$0xf0] }
  0x49   : > { %950 = vmatpush.bf16.msra.mxu1 %v4166_v23  ;;  %4706 = vmatpush.bf16.msra.mxu3 %v4166_v23  ;;  %v368_v46 = vld [vmem:[%s5279_s15] sm:$0xff]  ;;  %v370_v47 = vld [vmem:[%s5279_s15 + $0x10] sm:$0xff]  ;;  %v4102_v56 = vor.u32 %v4585_v45, %v4101_v44  ;;  %v4058_v12 = vor.u32 %v4571_v8, %v4055_v9  ;;  %v375_v19 = vld [vmem:[%s5279_s15 + $0x38] sm:$0xff]  ;;  %s7056_s21 = smov (!%p363_p1, %s3969_s21), 63 }
  0x4a   : > { %v400_v53 = vld [vmem:[%s5279_s15 + $0x100] sm:$0xff]  ;;  %v402_v54 = vld [vmem:[%s5279_s15 + $0x110] sm:$0xff]  ;;  %v5301_v63 = vpack.c.bf16 %v370_v47, %v368_v46  ;;  %v405_v20 = vld [vmem:[%s5279_s15 + $0x128] sm:$0xff]  ;;  %v5325_v24 = vpack.c.bf16 %v375_v19, %v373_v18  ;;  %s3970_s27 = sshll.u32 %s7056_s21, 3 }
  0x4b   : > { %v5303_v0 = vpack.c.bf16 %v402_v54, %v400_v53  ;;  %v4603_v10 = vld [vmem:[#allocation4 + $0x1a4] sm:$0xf]  ;;  %v4183_v11 = vld [vmem:[#allocation4 + $0x1b0] sm:$0xf0]  ;;  %v407_v21 = vld [vmem:[%s5279_s15 + $0x138] sm:$0xff]  ;;  %s6657_s8 = scalar_lea.vmem %s6792_s7, %s3970_s27 }
  0x4c   : > { %862 = vmatpush.bf16.msra.mxu0 %v4022_v28  ;;  %4699 = vmatpush.bf16.msra.mxu2 %v4022_v28  ;;  %v4186_v13 = vor.u32 %v4603_v10, %v4183_v11  ;;  %v372_v14 = vld [vmem:[%s5279_s15 + $0x20] sm:$0xff]  ;;  %v374_v15 = vld [vmem:[%s5279_s15 + $0x30] sm:$0xff]  ;;  %v5327_v25 = vpack.c.bf16 %v407_v21, %v405_v20  ;;  %v377_v36 = vld [vmem:[%s5279_s15 + $0x48] sm:$0xff] }
  0x4d   : > { %951 = vmatpush.bf16.msra.mxu1 %v4150_v29  ;;  %4707 = vmatpush.bf16.msra.mxu3 %v4150_v29  ;;  %6853 = vst [vmem:[#allocation13_spill] sm:$0xff] %v5303_v0  ;;  %v404_v16 = vld [vmem:[%s5279_s15 + $0x120] sm:$0xff]  ;;  %v406_v17 = vld [vmem:[%s5279_s15 + $0x130] sm:$0xff]  ;;  %v5321_v22 = vpack.c.bf16 %v374_v15, %v372_v14  ;;  %v379_v37 = vld [vmem:[%s5279_s15 + $0x58] sm:$0xff] }
  0x4e   : > { %v5323_v23 = vpack.c.bf16 %v406_v17, %v404_v16  ;;  %v4567_v26 = vld [vmem:[#allocation4 + $0x84] sm:$0xf]  ;;  %v4039_v27 = vld [vmem:[#allocation4 + $0x90] sm:$0xf0]  ;;  %v409_v38 = vld [vmem:[%s5279_s15 + $0x148] sm:$0xff] }
  0x4f   : > { %v4599_v28 = vld [vmem:[#allocation4 + $0x184] sm:$0xf]  ;;  %v4042_v29 = vor.u32 %v4567_v26, %v4039_v27  ;;  %v4167_v30 = vld [vmem:[#allocation4 + $0x190] sm:$0xf0]  ;;  %v411_v39 = vld [vmem:[%s5279_s15 + $0x158] sm:$0xff] }
  0x50   : > { %863 = vmatpush.bf16.msra.mxu0 %v4006_v34  ;;  %4700 = vmatpush.bf16.msra.mxu2 %v4006_v34  ;;  %v4170_v31 = vor.u32 %v4599_v28, %v4167_v30  ;;  %v376_v32 = vld [vmem:[%s5279_s15 + $0x40] sm:$0xff]  ;;  %v378_v33 = vld [vmem:[%s5279_s15 + $0x50] sm:$0xff]  ;;  %v5347_v43 = vpack.c.bf16 %v411_v39, %v409_v38  ;;  %v381_v54 = vld [vmem:[%s5279_s15 + $0x68] sm:$0xff] }
  0x51   : > { %952 = vmatpush.bf16.msra.mxu1 %v4134_v35  ;;  %4708 = vmatpush.bf16.msra.mxu3 %v4134_v35  ;;  %v408_v34 = vld [vmem:[%s5279_s15 + $0x140] sm:$0xff]  ;;  %v410_v35 = vld [vmem:[%s5279_s15 + $0x150] sm:$0xff]  ;;  %v383_v55 = vld [vmem:[%s5279_s15 + $0x78] sm:$0xff] }
  0x52   : > { %v5343_v41 = vpack.c.bf16 %v410_v35, %v408_v34  ;;  %6855 = vst [vmem:[#allocation15_spill] sm:$0xff] %v5347_v43  ;;  %v4563_v44 = vld [vmem:[#allocation4 + $0x64] sm:$0xf]  ;;  %v4023_v45 = vld [vmem:[#allocation4 + $0x70] sm:$0xf0]  ;;  %v415_v57 = vld [vmem:[%s5279_s15 + $0x178] sm:$0xff] }
  0x53   : > { %v4595_v46 = vld [vmem:[#allocation4 + $0x164] sm:$0xf]  ;;  %v4026_v47 = vor.u32 %v4563_v44, %v4023_v45  ;;  %v4151_v48 = vld [vmem:[#allocation4 + $0x170] sm:$0xf0]  ;;  %v417_v14 = vld [vmem:[%s5279_s15 + $0x188] sm:$0xff] }
  0x54   : > { %864 = vmatpush.bf16.msra.mxu0 %v3990_v40  ;;  %4701 = vmatpush.bf16.msra.mxu2 %v3990_v40  ;;  %v5341_v40 = vpack.c.bf16 %v378_v33, %v376_v32  ;;  %v4154_v49 = vor.u32 %v4595_v46, %v4151_v48  ;;  %v380_v50 = vld [vmem:[%s5279_s15 + $0x60] sm:$0xff]  ;;  %v382_v51 = vld [vmem:[%s5279_s15 + $0x70] sm:$0xff]  ;;  %v419_v15 = vld [vmem:[%s5279_s15 + $0x198] sm:$0xff] }
  0x55   : > { %953 = vmatpush.bf16.msra.mxu1 %v4118_v42  ;;  %4709 = vmatpush.bf16.msra.mxu3 %v4118_v42  ;;  %v5345_v42 = vpack.c.bf16 %v379_v37, %v377_v36  ;;  %v414_v53 = vld [vmem:[%s5279_s15 + $0x170] sm:$0xff]  ;;  %v5361_v58 = vpack.c.bf16 %v382_v51, %v380_v50  ;;  %v4559_v62 = vld [vmem:[#allocation4 + $0x44] sm:$0xf]  ;;  %v5387_v19 = vpack.c.bf16 %v419_v15, %v417_v14  ;;  %v4093_v20 = vld [vmem:[#allocation4 + $0xe8] sm:$0xf] }
  0x56   : > { %v4007_v1 = vld [vmem:[#allocation4 + $0x50] sm:$0xf0]  ;;  %v4591_v2 = vld [vmem:[#allocation4 + $0x144] sm:$0xf]  ;;  %v4582_v21 = vld [vmem:[#allocation4 + $0xf4] sm:$0xf0] }
  0x57   : > { %v4010_v3 = vor.u32 %v4559_v62, %v4007_v1  ;;  %v384_v8 = vld [vmem:[%s5279_s15 + $0x80] sm:$0xff]  ;;  %v386_v9 = vld [vmem:[%s5279_s15 + $0x90] sm:$0xff]  ;;  %6859 = vst [vmem:[#allocation19_spill] sm:$0xff] %v5387_v19  ;;  %v4221_v26 = vld [vmem:[#allocation4 + $0x1e8] sm:$0xf] }
  0x58   : > { %865 = vmatpush.bf16.msra.mxu0 %v3974_v52  ;;  %4702 = vmatpush.bf16.msra.mxu2 %v3974_v52  ;;  %v412_v52 = vld [vmem:[%s5279_s15 + $0x160] sm:$0xff]  ;;  %v418_v11 = vld [vmem:[%s5279_s15 + $0x190] sm:$0xff]  ;;  %v5381_v16 = vpack.c.bf16 %v386_v9, %v384_v8  ;;  %v4614_v30 = vld [vmem:[#allocation4 + $0x1f4] sm:$0xf0] }
  0x59   : > { %954 = vmatpush.bf16.msra.mxu1 %v4102_v56  ;;  %4710 = vmatpush.bf16.msra.mxu3 %v4102_v56  ;;  %v413_v56 = vld [vmem:[%s5279_s15 + $0x168] sm:$0xff]  ;;  %v5363_v59 = vpack.c.bf16 %v414_v53, %v412_v52  ;;  %v416_v10 = vld [vmem:[%s5279_s15 + $0x180] sm:$0xff]  ;;  %v3991_v28 = vld [vmem:[#allocation4 + $0x30] sm:$0xf0]  ;;  %v4222_v32 = vor.u32 %v4614_v30, %v4221_v26 }
  0x5a   : > { %v5383_v17 = vpack.c.bf16 %v418_v11, %v416_v10  ;;  %v4555_v27 = vld [vmem:[#allocation4 + $0x24] sm:$0xf]  ;;  %v4119_v34 = vld [vmem:[#allocation4 + $0x130] sm:$0xf0]  ;;  %v4077_v35 = vld [vmem:[#allocation4 + $0xc8] sm:$0xf] }
  0x5b   : > { %866 = vmatmul.bf16.vlgmr.msra.gmra.mxu0 %v5301_v63  ;;  %906 = vmatmul.bf16.vlgmr.msra.gmra.mxu2 %v5303_v0  ;;  %6856 = vst [vmem:[#allocation16_spill] sm:$0xff] %v5363_v59  ;;  %v4587_v33 = vld [vmem:[#allocation4 + $0x124] sm:$0xf]  ;;  %v4578_v37 = vld [vmem:[#allocation4 + $0xd4] sm:$0xf0]  ;;  %v390_v52 = vld [vmem:[%s5279_s15 + $0xb0] sm:$0xff] }
  0x5c   : > { %1036 = vmatpush.bf16.msrb.mxu2 %v4090_v60  ;;  %955 = vmatmul.bf16.vlgmr.msra.gmra.mxu1 %v5305_v4  ;;  %v5365_v60 = vpack.c.bf16 %v383_v55, %v381_v54  ;;  %6858 = vst [vmem:[#allocation18_spill] sm:$0xff] %v5383_v17  ;;  %v4122_v36 = vor.u32 %v4587_v33, %v4119_v34  ;;  %v4205_v38 = vld [vmem:[#allocation4 + $0x1c8] sm:$0xf]  ;;  %v4610_v39 = vld [vmem:[#allocation4 + $0x1d4] sm:$0xf0]  ;;  %v388_v50 = vld [vmem:[%s5279_s15 + $0xa0] sm:$0xff] }
  0x5d   : > { %1125 = vmatpush.bf16.msrb.mxu3 %v4218_v61  ;;  %v5367_v61 = vpack.c.bf16 %v415_v57, %v413_v56  ;;  %1303 = vmatpush.bf16.msrb.mxu1 %v4222_v32  ;;  %v4078_v44 = vor.u32 %v4578_v37, %v4077_v35  ;;  %v4206_v45 = vor.u32 %v4610_v39, %v4205_v38  ;;  %v4061_v46 = vld [vmem:[#allocation4 + $0xa8] sm:$0xf]  ;;  %v4570_v55 = vld [vmem:[#allocation4 + $0x94] sm:$0xf0]  ;;  %v420_v56 = vld [vmem:[%s5279_s15 + $0x1a0] sm:$0xff] }
  0x5e   : > { %995 = vmatmul.bf16.vlgmr.msra.gmra.mxu3 %v5307_v5  ;;  %v4189_v48 = vld [vmem:[#allocation4 + $0x1a8] sm:$0xf]  ;;  %v422_v57 = vld [vmem:[%s5279_s15 + $0x1b0] sm:$0xff]  ;;  %v391_v1 = vld [vmem:[%s5279_s15 + $0xb8] sm:$0xff]  ;;  %v5401_v9 = vpack.c.bf16 %v390_v52, %v388_v50 }
  0x5f   : > { %6857 = vst [vmem:[#allocation17_spill] sm:$0xff] %v5367_v61  ;;  %v4045_v54 = vld [vmem:[#allocation4 + $0x88] sm:$0xf]  ;;  %v4602_v8 = vld [vmem:[#allocation4 + $0x194] sm:$0xf0]  ;;  %v5403_v10 = vpack.c.bf16 %v422_v57, %v420_v56  ;;  %v394_v50 = vld [vmem:[%s5279_s15 + $0xd0] sm:$0xff] }
  0x60   : > { %1037 = vmatpush.bf16.msrb.mxu2 %v4074_v6  ;;  %v4135_v6 = vld [vmem:[#allocation4 + $0x150] sm:$0xf0]  ;;  %v389_v62 = vld [vmem:[%s5279_s15 + $0xa8] sm:$0xff]  ;;  %6860 = vst [vmem:[#allocation20_spill] sm:$0xff] %v5401_v9  ;;  %v4566_v15 = vld [vmem:[#allocation4 + $0x74] sm:$0xf0] }
  0x61   : > { %1126 = vmatpush.bf16.msrb.mxu3 %v4202_v7  ;;  %v4138_v7 = vor.u32 %v4591_v2, %v4135_v6  ;;  %1304 = vmatpush.bf16.msrb.mxu1 %v4206_v45  ;;  %v421_v2 = vld [vmem:[%s5279_s15 + $0x1a8] sm:$0xff]  ;;  %v4046_v6 = vor.u32 %v4570_v55, %v4045_v54  ;;  %6861 = vst [vmem:[#allocation21_spill] sm:$0xff] %v5403_v10  ;;  %v3975_v26 = vld [vmem:[#allocation4 + $0x10] sm:$0xf0]  ;;  %v4562_v35 = vld [vmem:[#allocation4 + $0x54] sm:$0xf0] }
  0x62   : > { %v5405_v11 = vpack.c.bf16 %v391_v1, %v389_v62  ;;  %v4029_v14 = vld [vmem:[#allocation4 + $0x68] sm:$0xf]  ;;  %v4103_v32 = vld [vmem:[#allocation4 + $0x110] sm:$0xf0]  ;;  %v4594_v37 = vld [vmem:[#allocation4 + $0x154] sm:$0xf0] }
  0x63   : > { %v4013_v33 = vld [vmem:[#allocation4 + $0x48] sm:$0xf]  ;;  %v426_v52 = vld [vmem:[%s5279_s15 + $0x1d0] sm:$0xff]  ;;  %v395_v54 = vld [vmem:[%s5279_s15 + $0xd8] sm:$0xff] }
  0x64   : > { %1038 = vmatpush.bf16.msrb.mxu2 %v4058_v12  ;;  %v385_v12 = vld [vmem:[%s5279_s15 + $0x88] sm:$0xff]  ;;  %6862 = vst [vmem:[#allocation22_spill] sm:$0xff] %v5405_v11  ;;  %v4014_v38 = vor.u32 %v4562_v35, %v4013_v33  ;;  %v427_v56 = vld [vmem:[%s5279_s15 + $0x1d8] sm:$0xff]  ;;  %v430_v33 = vld [vmem:[%s5279_s15 + $0x1f0] sm:$0xff] }
  0x65   : > { %1127 = vmatpush.bf16.msrb.mxu3 %v4186_v13  ;;  %v387_v13 = vld [vmem:[%s5279_s15 + $0x98] sm:$0xff]  ;;  %v3997_v39 = vld [vmem:[#allocation4 + $0x28] sm:$0xf] }
  0x66   : > { %v5385_v18 = vpack.c.bf16 %v387_v13, %v385_v12  ;;  %v425_v55 = vld [vmem:[%s5279_s15 + $0x1c8] sm:$0xff]  ;;  %v4554_v1 = vld [vmem:[#allocation4 + $0x14] sm:$0xf0] }
  0x67   : > { %v3981_v62 = vld [vmem:[#allocation4 + $0x8] sm:$0xf]  ;;  %v399_v35 = vld [vmem:[%s5279_s15 + $0xf8] sm:$0xff] }
  0x68   : > { %1039 = vmatpush.bf16.msrb.mxu2 %v4042_v29  ;;  %v4094_v29 = vor.u32 %v4582_v21, %v4093_v20  ;;  %v4157_v20 = vld [vmem:[#allocation4 + $0x168] sm:$0xf]  ;;  %v4551_v21 = vld [vmem:[#allocation4 + $0x4] sm:$0xf] }
  0x69   : > { %1128 = vmatpush.bf16.msrb.mxu3 %v4170_v31  ;;  %v3994_v31 = vor.u32 %v4555_v27, %v3991_v28  ;;  %v4030_v27 = vor.u32 %v4566_v15, %v4029_v14  ;;  %v4598_v28 = vld [vmem:[#allocation4 + $0x174] sm:$0xf0]  ;;  %v5427_v14 = vpack.c.bf16 %v427_v56, %v425_v55  ;;  %v4608_v55 = vld [vmem:[#allocation4 + $0x1cc] sm:$0xf]  ;;  %v4207_v56 = vld [vmem:[#allocation4 + $0x1d8] sm:$0xf0] }
  0x6a   : > { %1214 = vmatpush.bf16.msrb.mxu0 %v4094_v29  ;;  %v3978_v29 = vor.u32 %v4551_v21, %v3975_v26  ;;  %v4158_v30 = vor.u32 %v4598_v28, %v4157_v20  ;;  %v4580_v20 = vld [vmem:[#allocation4 + $0xec] sm:$0xf]  ;;  %v4095_v21 = vld [vmem:[#allocation4 + $0xf8] sm:$0xf0] }
  0x6b   : > { %871 = vmatmul.bf16.gmra.mxu0 %v5321_v22  ;;  %911 = vmatmul.bf16.gmra.mxu2 %v5323_v23  ;;  %6867 = vst [vmem:[#allocation27_spill] sm:$0xff] %v5427_v14  ;;  %v4612_v26 = vld [vmem:[#allocation4 + $0x1ec] sm:$0xf]  ;;  %v4223_v28 = vld [vmem:[#allocation4 + $0x1f8] sm:$0xf0] }
  0x6c   : > { %960 = vmatmul.bf16.gmra.mxu1 %v5325_v24  ;;  %1040 = vmatpush.bf16.msrb.mxu2 %v4026_v47  ;;  %v4574_v47 = vld [vmem:[#allocation4 + $0xb4] sm:$0xf0] }
  0x6d   : > { %1129 = vmatpush.bf16.msrb.mxu3 %v4154_v49  ;;  %v4606_v49 = vld [vmem:[#allocation4 + $0x1b4] sm:$0xf0]  ;;  %v4062_v51 = vor.u32 %v4574_v47, %v4061_v46  ;;  %v4125_v47 = vld [vmem:[#allocation4 + $0x128] sm:$0xf] }
  0x6e   : > { %1000 = vmatmul.bf16.gmra.mxu3 %v5327_v25  ;;  %1215 = vmatpush.bf16.msrb.mxu0 %v4078_v44  ;;  %v4190_v53 = vor.u32 %v4606_v49, %v4189_v48  ;;  %v4558_v44 = vld [vmem:[#allocation4 + $0x34] sm:$0xf0]  ;;  %v392_v49 = vld [vmem:[%s5279_s15 + $0xc0] sm:$0xff] }
  0x6f   : > { %v3998_v46 = vor.u32 %v4558_v44, %v3997_v39  ;;  %v4590_v48 = vld [vmem:[#allocation4 + $0x134] sm:$0xf0] }
  0x70   : > { %1041 = vmatpush.bf16.msrb.mxu2 %v4010_v3  ;;  %v423_v3 = vld [vmem:[%s5279_s15 + $0x1b8] sm:$0xff]  ;;  %1305 = vmatpush.bf16.msrb.mxu1 %v4190_v53  ;;  %v393_v53 = vld [vmem:[%s5279_s15 + $0xc8] sm:$0xff]  ;;  %v4126_v57 = vor.u32 %v4590_v48, %v4125_v47 }
  0x71   : > { %1130 = vmatpush.bf16.msrb.mxu3 %v4138_v7  ;;  %v4173_v7 = vld [vmem:[#allocation4 + $0x188] sm:$0xf]  ;;  %v5407_v12 = vpack.c.bf16 %v423_v3, %v421_v2  ;;  %v5421_v3 = vpack.c.bf16 %v394_v50, %v392_v49 }
  0x72   : > { %1216 = vmatpush.bf16.msrb.mxu0 %v4062_v51  ;;  %v4174_v13 = vor.u32 %v4602_v8, %v4173_v7  ;;  %v424_v51 = vld [vmem:[%s5279_s15 + $0x1c0] sm:$0xff]  ;;  %v4109_v2 = vld [vmem:[#allocation4 + $0x108] sm:$0xf]  ;;  %v3982_v7 = vor.u32 %v4554_v1, %v3981_v62  ;;  %v4586_v8 = vld [vmem:[#allocation4 + $0x114] sm:$0xf0] }
  0x73   : > { %6863 = vst [vmem:[#allocation23_spill] sm:$0xff] %v5407_v12  ;;  %v4110_v15 = vor.u32 %v4586_v8, %v4109_v2  ;;  %v4210_v2 = vor.u32 %v4608_v55, %v4207_v56 }
  0x74   : > { %1042 = vmatpush.bf16.msrb.mxu2 %v3994_v31  ;;  %1306 = vmatpush.bf16.msrb.mxu1 %v4174_v13  ;;  %v4583_v31 = vld [vmem:[#allocation4 + $0x104] sm:$0xf]  ;;  %6864 = vst [vmem:[#allocation24_spill] sm:$0xff] %v5421_v3  ;;  %v5425_v13 = vpack.c.bf16 %v395_v54, %v393_v53  ;;  %v4079_v54 = vld [vmem:[#allocation4 + $0xd8] sm:$0xf0] }
  0x75   : > { %1131 = vmatpush.bf16.msrb.mxu3 %v4122_v36  ;;  %v4106_v34 = vor.u32 %v4583_v31, %v4103_v32  ;;  %v4141_v36 = vld [vmem:[#allocation4 + $0x148] sm:$0xf]  ;;  %v398_v31 = vld [vmem:[%s5279_s15 + $0xf0] sm:$0xff]  ;;  %v428_v32 = vld [vmem:[%s5279_s15 + $0x1e0] sm:$0xff] }
  0x76   : > { %1217 = vmatpush.bf16.msrb.mxu0 %v4046_v6  ;;  %v4142_v45 = vor.u32 %v4594_v37, %v4141_v36  ;;  %v5423_v6 = vpack.c.bf16 %v426_v52, %v424_v51  ;;  %6866 = vst [vmem:[#allocation26_spill] sm:$0xff] %v5425_v13  ;;  %v429_v36 = vld [vmem:[%s5279_s15 + $0x1e8] sm:$0xff]  ;;  %v431_v37 = vld [vmem:[%s5279_s15 + $0x1f8] sm:$0xff]  ;;  %v5443_v39 = vpack.c.bf16 %v430_v33, %v428_v32 }
  0x77   : > { %v4576_v52 = vld [vmem:[#allocation4 + $0xcc] sm:$0xf] }
  0x78   : > { %1043 = vmatpush.bf16.msrb.mxu2 %v3978_v29  ;;  %1307 = vmatpush.bf16.msrb.mxu1 %v4158_v30  ;;  %6865 = vst [vmem:[#allocation25_spill] sm:$0xff] %v5423_v6  ;;  %v4226_v29 = vor.u32 %v4612_v26, %v4223_v28  ;;  %v396_v30 = vld [vmem:[%s5279_s15 + $0xe0] sm:$0xff]  ;;  %v4082_v1 = vor.u32 %v4576_v52, %v4079_v54 }
  0x79   : > { %1132 = vmatpush.bf16.msrb.mxu3 %v4106_v34  ;;  %v397_v34 = vld [vmem:[%s5279_s15 + $0xe8] sm:$0xff] }
  0x7a   : > { %1218 = vmatpush.bf16.msrb.mxu0 %v4030_v27  ;;  %v4098_v27 = vor.u32 %v4580_v20, %v4095_v21  ;;  %v5445_v44 = vpack.c.bf16 %v399_v35, %v397_v34 }
  0x7b   : > { %876 = vmatmul.bf16.gmra.mxu0 %v5341_v40  ;;  %916 = vmatmul.bf16.gmra.mxu2 %v5343_v41 }
  0x7c   : > { %965 = vmatmul.bf16.gmra.mxu1 %v5345_v42  ;;  %1392 = vmatpush.bf16.msra.mxu2 %v4098_v27  ;;  %6869 = vst [vmem:[#allocation29_spill] sm:$0xff] %v5445_v44 }
  0x7d   : > { %1308 = vmatpush.bf16.msrb.mxu1 %v4142_v45  ;;  %1481 = vmatpush.bf16.msra.mxu3 %v4226_v29  ;;  %v5447_v45 = vpack.c.bf16 %v431_v37, %v429_v36 }
  0x7e   : > { %1005 = vmatmul.bf16.gmra.mxu3 %v5347_v43  ;;  %1219 = vmatpush.bf16.msrb.mxu0 %v4014_v38  ;;  %v5441_v38 = vpack.c.bf16 %v398_v31, %v396_v30 }
  0x7f   : > { %6870 = vst [vmem:[#allocation30_spill] sm:$0xff] %v5447_v45 }
  0x80   : > { %6868 = vst [vmem:[#allocation28_spill] sm:$0xff] %v5441_v38  ;;  %1393 = vmatpush.bf16.msra.mxu2 %v4082_v1 }
  0x81   : > { %1309 = vmatpush.bf16.msrb.mxu1 %v4126_v57  ;;  %1482 = vmatpush.bf16.msra.mxu3 %v4210_v2 }
  0x82   : > { %1220 = vmatpush.bf16.msrb.mxu0 %v3998_v46  ;;  %v5453_v46 = vld [vmem:[#allocation6] sm:$0xf] }
  0x83   : > { %v5456_v47 = vperm.slane %v5453_v46, 0 }
  0x85   : > { %1310 = vmatpush.bf16.msrb.mxu1 %v4110_v15 }
  0x86   : > { %1221 = vmatpush.bf16.msrb.mxu0 %v3982_v7 }
  0x8b   : > { %881 = vmatmul.bf16.gmra.mxu0 %v5361_v58  ;;  %921 = vmatmul.bf16.gmra.mxu2 %v5363_v59 }
  0x8c   : > { %970 = vmatmul.bf16.gmra.mxu1 %v5365_v60 }
  0x8e   : > { %1010 = vmatmul.bf16.gmra.mxu3 %v5367_v61 }
  0x9b   : > { %886 = vmatmul.bf16.gmra.mxu0 %v5381_v16  ;;  %926 = vmatmul.bf16.gmra.mxu2 %v5383_v17 }
  0x9c   : > { %975 = vmatmul.bf16.gmra.mxu1 %v5385_v18 }
  0x9e   : > { %1015 = vmatmul.bf16.gmra.mxu3 %v5387_v19 }
  0xab   : > { %891 = vmatmul.bf16.gmra.mxu0 %v5401_v9  ;;  %931 = vmatmul.bf16.gmra.mxu2 %v5403_v10 }
  0xac   : > { %980 = vmatmul.bf16.gmra.mxu1 %v5405_v11 }
  0xae   : > { %1020 = vmatmul.bf16.gmra.mxu3 %v5407_v12 }
  0xbb   : > { %896 = vmatmul.bf16.gmra.mxu0 %v5421_v3  ;;  %936 = vmatmul.bf16.gmra.mxu2 %v5423_v6 }
  0xbc   : > { %985 = vmatmul.bf16.gmra.mxu1 %v5425_v13 }
  0xbe   : > { %1025 = vmatmul.bf16.gmra.mxu3 %v5427_v14 }
  0xcb   : > { %901 = vmatmul.bf16.gmra.mxu0 %v5441_v38  ;;  %941 = vmatmul.bf16.gmra.mxu2 %v5443_v39 }
  0xcc   : > { %990 = vmatmul.bf16.gmra.mxu1 %v5445_v44 }
  0xce   : > { %1030 = vmatmul.bf16.gmra.mxu3 %v5447_v45 }
  0xd8   : > { %v867_v48 = vpop.f32.mrf.mxu0 }
  0xd9   : > { %v868_v49 = vadd.f32 %v867_v48, %v5456_v47  ;;  %v956_v50 = vpop.f32.mrf.mxu1 }
  0xdb   : > { %v957_v51 = vadd.f32 %v956_v50, %v868_v49  ;;  %1044 = vmatmul.bf16.vlgmr.msrb.gmra.mxu2 %v5301_v63  ;;  %1222 = vmatmul.bf16.vlgmr.msrb.gmra.mxu0 %v5301_v63 }
  0xdc   : > { %1311 = vmatmul.bf16.vlgmr.msrb.gmra.mxu1 %v5305_v4 }
  0xdd   : > { %v1698_v8 = vmul.f32 0.2, %v957_v51  ;;  %vm1570_vm0 = vcmp.ge.f32.partialorder %v957_v51, 0.0 }
  0xde   : > { %1133 = vmatmul.bf16.vlgmr.msrb.gmra.mxu3 %v5305_v4  ;;  %v907_v53 = vpop.f32.mrf.mxu2 }
  0xdf   : > { %v908_v57 = vadd.f32 %v907_v53, %v5456_v47  ;;  %v1826_v27 = vsel %vm1570_vm0, %v957_v51, %v1698_v8 }
  0xe0   : > { %v869_v7 = vpop.f32.mrf.mxu0 }
  0xe1   : > { %v996_v62 = vpop.f32.mrf.mxu3  ;;  %v870_v20 = vadd.f32 %v869_v7, %v5456_v47  ;;  %v958_v21 = vpop.f32.mrf.mxu1 }
  0xe2   : > { %v997_v15 = vadd.f32 %v996_v62, %v908_v57 }
  0xe3   : > { %v959_v26 = vadd.f32 %v958_v21, %v870_v20 }
  0xe4   : > { %v1762_v35 = vmul.f32 0.2, %v997_v15  ;;  %vm1634_vm2 = vcmp.ge.f32.partialorder %v997_v15, 0.0 }
  0xe5   : > { %vm1574_vm1 = vcmp.ge.f32.partialorder %v959_v26, 0.0  ;;  %v1702_v28 = vmul.f32 0.2, %v959_v26 }
  0xe6   : > { %v909_v29 = vpop.f32.mrf.mxu2  ;;  %v1890_v51 = vsel %vm1634_vm2, %v997_v15, %v1762_v35 }
  0xe7   : > { %v1830_v30 = vsel %vm1574_vm1, %v959_v26, %v1702_v28  ;;  %v910_v31 = vadd.f32 %v909_v29, %v5456_v47 }
  0xe8   : > { %v5466_v33 = vpack.c.bf16 %v1830_v30, %v1826_v27  ;;  %v872_v34 = vpop.f32.mrf.mxu0 }
  0xe9   : > { %v998_v32 = vpop.f32.mrf.mxu3  ;;  %v873_v37 = vadd.f32 %v872_v34, %v5456_v47  ;;  %v961_v48 = vpop.f32.mrf.mxu1 }
  0xea   : > { %6871 = vst [vmem:[#allocation31_spill] sm:$0xff] %v5466_v33  ;;  %v999_v36 = vadd.f32 %v998_v32, %v910_v31  ;;  %v4572_v32 = vld [vmem:[#allocation4 + $0xac] sm:$0xf] }
  0xeb   : > { %v5469_v50 = vadd.f32 %v961_v48, %v873_v37  ;;  %1049 = vmatmul.bf16.gmra.mxu2 %v5321_v22  ;;  %1227 = vmatmul.bf16.gmra.mxu0 %v5321_v22  ;;  %v4063_v37 = vld [vmem:[#allocation4 + $0xb8] sm:$0xf0]  ;;  %v4604_v48 = vld [vmem:[#allocation4 + $0x1ac] sm:$0xf] }
  0xec   : > { %vm1638_vm3 = vcmp.ge.f32.partialorder %v999_v36, 0.0  ;;  %v1766_v49 = vmul.f32 0.2, %v999_v36  ;;  %1316 = vmatmul.bf16.gmra.mxu1 %v5325_v24 }
  0xed   : > { %vm1578_vm2 = vcmp.ge.f32.partialorder %v5469_v50, 0.0 }
  0xee   : > { %1138 = vmatmul.bf16.gmra.mxu3 %v5325_v24  ;;  %v1894_v52 = vsel %vm1638_vm3, %v999_v36, %v1766_v49  ;;  %v912_v53 = vpop.f32.mrf.mxu2  ;;  %v4191_v49 = vld [vmem:[#allocation4 + $0x1b8] sm:$0xf0] }
  0xef   : > { %v5475_v54 = vpack.c.bf16 %v1894_v52, %v1890_v51  ;;  %v913_v55 = vadd.f32 %v912_v53, %v5456_v47 }
  0xf0   : > { %v874_v57 = vpop.f32.mrf.mxu0 }
  0xf1   : > { %6872 = vst [vmem:[#allocation32_spill] sm:$0xff] %v5475_v54  ;;  %v1001_v56 = vpop.f32.mrf.mxu3  ;;  %v875_v1 = vadd.f32 %v874_v57, %v5456_v47  ;;  %v963_v2 = vpop.f32.mrf.mxu1 }
  0xf2   : > { %v1002_v62 = vadd.f32 %v1001_v56, %v913_v55  ;;  %v4066_v55 = vor.u32 %v4572_v32, %v4063_v37  ;;  %v4194_v56 = vor.u32 %v4604_v48, %v4191_v49 }
  0xf3   : > { %v5479_v7 = vadd.f32 %v963_v2, %v875_v1 }
  0xf4   : > { %v1770_v15 = vmul.f32 0.2, %v1002_v62  ;;  %vm1642_vm4 = vcmp.ge.f32.partialorder %v1002_v62, 0.0  ;;  %1394 = vmatpush.bf16.msra.mxu2 %v4066_v55  ;;  %1483 = vmatpush.bf16.msra.mxu3 %v4194_v56 }
  0xf5   : > { %vm1582_vm3 = vcmp.ge.f32.partialorder %v5479_v7, 0.0 }
  0xf6   : > { %v914_v8 = vpop.f32.mrf.mxu2  ;;  %v1898_v34 = vsel %vm1642_vm4, %v1002_v62, %v1770_v15 }
  0xf7   : > { %v915_v20 = vadd.f32 %v914_v8, %v5456_v47 }
  0xf8   : > { %v877_v26 = vpop.f32.mrf.mxu0 }
  0xf9   : > { %v1003_v21 = vpop.f32.mrf.mxu3  ;;  %v878_v28 = vadd.f32 %v877_v26, %v5456_v47  ;;  %v966_v29 = vpop.f32.mrf.mxu1 }
  0xfa   : > { %v1004_v27 = vadd.f32 %v1003_v21, %v915_v20 }
  0xfb   : > { %v5483_v31 = vadd.f32 %v966_v29, %v878_v28  ;;  %1054 = vmatmul.bf16.gmra.mxu2 %v5341_v40  ;;  %1232 = vmatmul.bf16.gmra.mxu0 %v5341_v40 }
  0xfc   : > { %vm1646_vm5 = vcmp.ge.f32.partialorder %v1004_v27, 0.0  ;;  %v1774_v30 = vmul.f32 0.2, %v1004_v27  ;;  %1321 = vmatmul.bf16.gmra.mxu1 %v5345_v42 }
  0xfe   : > { %1143 = vmatmul.bf16.gmra.mxu3 %v5345_v42  ;;  %v1902_v35 = vsel %vm1646_vm5, %v1004_v27, %v1774_v30  ;;  %v917_v36 = vpop.f32.mrf.mxu2 }
  0xff   : > { %v5489_v51 = vpack.c.bf16 %v1902_v35, %v1898_v34  ;;  %v918_v52 = vadd.f32 %v917_v36, %v5456_v47 }
 0x100   : > { %v879_v57 = vpop.f32.mrf.mxu0 }
 0x101   : > { %6873 = vst [vmem:[#allocation33_spill] sm:$0xff] %v5489_v51  ;;  %v1006_v53 = vpop.f32.mrf.mxu3  ;;  %v880_v2 = vadd.f32 %v879_v57, %v5456_v47  ;;  %v968_v8 = vpop.f32.mrf.mxu1 }
 0x102   : > { %v1007_v1 = vadd.f32 %v1006_v53, %v918_v52 }
 0x103   : > { %v5493_v62 = vadd.f32 %v968_v8, %v880_v2 }
 0x104   : > { %v1778_v27 = vmul.f32 0.2, %v1007_v1  ;;  %vm1650_vm6 = vcmp.ge.f32.partialorder %v1007_v1, 0.0 }
 0x106   : > { %v919_v20 = vpop.f32.mrf.mxu2  ;;  %v1906_v35 = vsel %vm1650_vm6, %v1007_v1, %v1778_v27 }
 0x107   : > { %v920_v21 = vadd.f32 %v919_v20, %v5456_v47 }
 0x108   : > { %v882_v15 = vpop.f32.mrf.mxu0 }
 0x109   : > { %v1008_v26 = vpop.f32.mrf.mxu3  ;;  %v883_v29 = vadd.f32 %v882_v15, %v5456_v47  ;;  %v971_v30 = vpop.f32.mrf.mxu1 }
 0x10a   : > { %v1009_v28 = vadd.f32 %v1008_v26, %v920_v21 }
 0x10b   : > { %v5497_v34 = vadd.f32 %v971_v30, %v883_v29  ;;  %1059 = vmatmul.bf16.gmra.mxu2 %v5361_v58  ;;  %1237 = vmatmul.bf16.gmra.mxu0 %v5361_v58 }
 0x10c   : > { %vm1654_vm7 = vcmp.ge.f32.partialorder %v1009_v28, 0.0  ;;  %v1782_v32 = vmul.f32 0.2, %v1009_v28  ;;  %1326 = vmatmul.bf16.gmra.mxu1 %v5365_v60 }
 0x10e   : > { %1148 = vmatmul.bf16.gmra.mxu3 %v5365_v60  ;;  %v1910_v36 = vsel %vm1654_vm7, %v1009_v28, %v1782_v32  ;;  %v922_v37 = vpop.f32.mrf.mxu2  ;;  %v4568_v32 = vld [vmem:[#allocation4 + $0x8c] sm:$0xf] }
 0x10f   : > { %v5503_v48 = vpack.c.bf16 %v1910_v36, %v1906_v35  ;;  %v923_v49 = vadd.f32 %v922_v37, %v5456_v47 }
 0x110   : > { %v884_v53 = vpop.f32.mrf.mxu0 }
 0x111   : > { %6874 = vst [vmem:[#allocation34_spill] sm:$0xff] %v5503_v48  ;;  %v1011_v52 = vpop.f32.mrf.mxu3  ;;  %v885_v56 = vadd.f32 %v884_v53, %v5456_v47  ;;  %v973_v57 = vpop.f32.mrf.mxu1  ;;  %v4175_v53 = vld [vmem:[#allocation4 + $0x198] sm:$0xf0] }
 0x112   : > { %v1012_v55 = vadd.f32 %v1011_v52, %v923_v49  ;;  %v4047_v49 = vld [vmem:[#allocation4 + $0x98] sm:$0xf0]  ;;  %v4600_v52 = vld [vmem:[#allocation4 + $0x18c] sm:$0xf] }
 0x113   : > { %v5507_v2 = vadd.f32 %v973_v57, %v885_v56 }
 0x114   : > { %v1786_v1 = vmul.f32 0.2, %v1012_v55  ;;  %vm1658_vm8 = vcmp.ge.f32.partialorder %v1012_v55, 0.0 }
 0x116   : > { %v924_v8 = vpop.f32.mrf.mxu2  ;;  %v1914_v35 = vsel %vm1658_vm8, %v1012_v55, %v1786_v1  ;;  %vm1586_vm8 = vcmp.ge.f32.partialorder %v5483_v31, 0.0 }
 0x117   : > { %v925_v20 = vadd.f32 %v924_v8, %v5456_v47 }
 0x118   : > { %v887_v26 = vpop.f32.mrf.mxu0 }
 0x119   : > { %v1013_v21 = vpop.f32.mrf.mxu3  ;;  %v888_v27 = vadd.f32 %v887_v26, %v5456_v47  ;;  %v976_v28 = vpop.f32.mrf.mxu1 }
 0x11a   : > { %v1014_v15 = vadd.f32 %v1013_v21, %v925_v20  ;;  %v4050_v20 = vor.u32 %v4568_v32, %v4047_v49  ;;  %v4178_v21 = vor.u32 %v4600_v52, %v4175_v53 }
 0x11b   : > { %v5511_v30 = vadd.f32 %v976_v28, %v888_v27  ;;  %1064 = vmatmul.bf16.gmra.mxu2 %v5381_v16  ;;  %1242 = vmatmul.bf16.gmra.mxu0 %v5381_v16 }
 0x11c   : > { %vm1662_vm9 = vcmp.ge.f32.partialorder %v1014_v15, 0.0  ;;  %v1790_v29 = vmul.f32 0.2, %v1014_v15  ;;  %1331 = vmatmul.bf16.gmra.mxu1 %v5385_v18  ;;  %1395 = vmatpush.bf16.msra.mxu2 %v4050_v20 }
 0x11d   : > { %1484 = vmatpush.bf16.msra.mxu3 %v4178_v21 }
 0x11e   : > { %1153 = vmatmul.bf16.gmra.mxu3 %v5385_v18  ;;  %v1918_v36 = vsel %vm1662_vm9, %v1014_v15, %v1790_v29  ;;  %v927_v37 = vpop.f32.mrf.mxu2  ;;  %vm1590_vm9 = vcmp.ge.f32.partialorder %v5493_v62, 0.0 }
 0x11f   : > { %v5517_v56 = vpack.c.bf16 %v1918_v36, %v1914_v35  ;;  %v928_v57 = vadd.f32 %v927_v37, %v5456_v47 }
 0x120   : > { %v889_v26 = vpop.f32.mrf.mxu0 }
 0x121   : > { %6875 = vst [vmem:[#allocation35_spill] sm:$0xff] %v5517_v56  ;;  %v1016_v8 = vpop.f32.mrf.mxu3  ;;  %v890_v28 = vadd.f32 %v889_v26, %v5456_v47  ;;  %v978_v48 = vpop.f32.mrf.mxu1 }
 0x122   : > { %v1017_v27 = vadd.f32 %v1016_v8, %v928_v57 }
 0x123   : > { %v5521_v55 = vadd.f32 %v978_v48, %v890_v28 }
 0x124   : > { %v1794_v36 = vmul.f32 0.2, %v1017_v27  ;;  %vm1666_vm10 = vcmp.ge.f32.partialorder %v1017_v27, 0.0 }
 0x126   : > { %v929_v1 = vpop.f32.mrf.mxu2  ;;  %v1922_v48 = vsel %vm1666_vm10, %v1017_v27, %v1794_v36 }
 0x127   : > { %v930_v15 = vadd.f32 %v929_v1, %v5456_v47 }
 0x128   : > { %v892_v35 = vpop.f32.mrf.mxu0 }
 0x129   : > { %v1018_v29 = vpop.f32.mrf.mxu3  ;;  %v893_v37 = vadd.f32 %v892_v35, %v5456_v47  ;;  %v981_v32 = vpop.f32.mrf.mxu1 }
 0x12a   : > { %v1019_v56 = vadd.f32 %v1018_v29, %v930_v15 }
 0x12b   : > { %v5525_v52 = vadd.f32 %v981_v32, %v893_v37  ;;  %1069 = vmatmul.bf16.gmra.mxu2 %v5401_v9  ;;  %1247 = vmatmul.bf16.gmra.mxu0 %v5401_v9 }
 0x12c   : > { %vm1670_vm11 = vcmp.ge.f32.partialorder %v1019_v56, 0.0  ;;  %v1798_v49 = vmul.f32 0.2, %v1019_v56  ;;  %1336 = vmatmul.bf16.gmra.mxu1 %v5405_v11 }
 0x12e   : > { %1158 = vmatmul.bf16.gmra.mxu3 %v5405_v11  ;;  %v1926_v53 = vsel %vm1670_vm11, %v1019_v56, %v1798_v49  ;;  %v932_v57 = vpop.f32.mrf.mxu2 }
 0x12f   : > { %v5531_v8 = vpack.c.bf16 %v1926_v53, %v1922_v48  ;;  %v933_v20 = vadd.f32 %v932_v57, %v5456_v47 }
 0x130   : > { %v894_v26 = vpop.f32.mrf.mxu0 }
 0x131   : > { %6876 = vst [vmem:[#allocation36_spill] sm:$0xff] %v5531_v8  ;;  %v1021_v21 = vpop.f32.mrf.mxu3  ;;  %v895_v1 = vadd.f32 %v894_v26, %v5456_v47  ;;  %v983_v15 = vpop.f32.mrf.mxu1 }
 0x132   : > { %v1022_v28 = vadd.f32 %v1021_v21, %v933_v20 }
 0x133   : > { %v5535_v29 = vadd.f32 %v983_v15, %v895_v1  ;;  %v4564_v15 = vld [vmem:[#allocation4 + $0x6c] sm:$0xf] }
 0x134   : > { %v1802_v27 = vmul.f32 0.2, %v1022_v28  ;;  %vm1674_vm12 = vcmp.ge.f32.partialorder %v1022_v28, 0.0 }
 0x136   : > { %v934_v35 = vpop.f32.mrf.mxu2  ;;  %v1930_v57 = vsel %vm1674_vm12, %v1022_v28, %v1802_v27  ;;  %vm1594_vm12 = vcmp.ge.f32.partialorder %v5497_v34, 0.0 }
 0x137   : > { %v935_v37 = vadd.f32 %v934_v35, %v5456_v47  ;;  %v4031_v35 = vld [vmem:[#allocation4 + $0x78] sm:$0xf0] }
 0x138   : > { %v897_v51 = vpop.f32.mrf.mxu0 }
 0x139   : > { %v1023_v32 = vpop.f32.mrf.mxu3  ;;  %v898_v36 = vadd.f32 %v897_v51, %v5456_v47  ;;  %v986_v49 = vpop.f32.mrf.mxu1 }
 0x13a   : > { %v1024_v56 = vadd.f32 %v1023_v32, %v935_v37  ;;  %v4596_v37 = vld [vmem:[#allocation4 + $0x16c] sm:$0xf] }
 0x13b   : > { %v5539_v53 = vadd.f32 %v986_v49, %v898_v36  ;;  %1074 = vmatmul.bf16.gmra.mxu2 %v5421_v3  ;;  %1252 = vmatmul.bf16.gmra.mxu0 %v5421_v3  ;;  %v4034_v36 = vor.u32 %v4564_v15, %v4031_v35  ;;  %v4159_v49 = vld [vmem:[#allocation4 + $0x178] sm:$0xf0] }
 0x13c   : > { %vm1678_vm13 = vcmp.ge.f32.partialorder %v1024_v56, 0.0  ;;  %v1806_v48 = vmul.f32 0.2, %v1024_v56  ;;  %1341 = vmatmul.bf16.gmra.mxu1 %v5425_v13  ;;  %v4162_v11 = vor.u32 %v4596_v37, %v4159_v49 }
 0x13d   : > { %1396 = vmatpush.bf16.msra.mxu2 %v4034_v36 }
 0x13e   : > { %1163 = vmatmul.bf16.gmra.mxu3 %v5425_v13  ;;  %v1934_v20 = vsel %vm1678_vm13, %v1024_v56, %v1806_v48  ;;  %v937_v21 = vpop.f32.mrf.mxu2  ;;  %vm1598_vm13 = vcmp.ge.f32.partialorder %v5507_v2, 0.0 }
 0x13f   : > { %v5545_v26 = vpack.c.bf16 %v1934_v20, %v1930_v57  ;;  %v938_v51 = vadd.f32 %v937_v21, %v5456_v47  ;;  %1485 = vmatpush.bf16.msra.mxu3 %v4162_v11 }
 0x140   : > { %v899_v32 = vpop.f32.mrf.mxu0 }
 0x141   : > { %6877 = vst [vmem:[#allocation37_spill] sm:$0xff] %v5545_v26  ;;  %v1026_v1 = vpop.f32.mrf.mxu3  ;;  %v900_v54 = vadd.f32 %v899_v32, %v5456_v47  ;;  %v988_v3 = vpop.f32.mrf.mxu1 }
 0x142   : > { %v1027_v8 = vadd.f32 %v1026_v1, %v938_v51 }
 0x143   : > { %v5549_v28 = vadd.f32 %v988_v3, %v900_v54 }
 0x144   : > { %v1810_v20 = vmul.f32 0.2, %v1027_v8  ;;  %vm1682_vm14 = vcmp.ge.f32.partialorder %v1027_v8, 0.0 }
 0x146   : > { %v939_v27 = vpop.f32.mrf.mxu2  ;;  %v1938_v11 = vsel %vm1682_vm14, %v1027_v8, %v1810_v20  ;;  %v4349_v20 = vld [vmem:[#allocation7 + $0xf0] sm:$0xf] }
 0x147   : > { %v940_v56 = vadd.f32 %v939_v27, %v5456_v47 }
 0x148   : > { %v902_v57 = vpop.f32.mrf.mxu0 }
 0x149   : > { %v1028_v48 = vpop.f32.mrf.mxu3  ;;  %v903_v26 = vadd.f32 %v902_v57, %v5456_v47  ;;  %v991_v15 = vpop.f32.mrf.mxu1  ;;  %v4630_v57 = vld [vmem:[#allocation7 + $0x74] sm:$0xf0] }
 0x14a   : > { %v1029_v21 = vadd.f32 %v1028_v48, %v940_v56  ;;  %v4285_v48 = vld [vmem:[#allocation7 + $0x70] sm:$0xf] }
 0x14b   : > { %v5553_v1 = vadd.f32 %v991_v15, %v903_v26  ;;  %1079 = vmatmul.bf16.gmra.mxu2 %v5441_v38  ;;  %1257 = vmatmul.bf16.gmra.mxu0 %v5441_v38  ;;  %v5566_v15 = vperm.slane %v5453_v46, 2  ;;  %v4286_v8 = vor.u32 %v4630_v57, %v4285_v48  ;;  %v1706_v48 = vmul.f32 0.2, %v5469_v50 }
 0x14c   : > { %vm1686_vm15 = vcmp.ge.f32.partialorder %v1029_v21, 0.0  ;;  %v1814_v51 = vmul.f32 0.2, %v1029_v21  ;;  %1346 = vmatmul.bf16.gmra.mxu1 %v5445_v44  ;;  %v1710_v57 = vmul.f32 0.2, %v5479_v7 }
 0x14d   : > { %2408 = vmatpush.bf16.msra.mxu0 %v4286_v8  ;;  %v4560_v8 = vld [vmem:[#allocation4 + $0x4c] sm:$0xf] }
 0x14e   : > { %1168 = vmatmul.bf16.gmra.mxu3 %v5445_v44  ;;  %v1942_v3 = vsel %vm1686_vm15, %v1029_v21, %v1814_v51  ;;  %v942_v54 = vpop.f32.mrf.mxu2  ;;  %v4646_v51 = vld [vmem:[#allocation7 + $0xf4] sm:$0xf0] }
 0x14f   : > { %v5559_v35 = vpack.c.bf16 %v1942_v3, %v1938_v11  ;;  %v943_v37 = vadd.f32 %v942_v54, %v5456_v47  ;;  %v4350_v54 = vor.u32 %v4646_v51, %v4349_v20 }
 0x150   : > { %v904_v36 = vpop.f32.mrf.mxu0 }
 0x151   : > { %6878 = vst [vmem:[#allocation38_spill] sm:$0xff] %v5559_v35  ;;  %v1031_v32 = vpop.f32.mrf.mxu3  ;;  %v905_v26 = vadd.f32 %v904_v36, %v5456_v47  ;;  %v993_v27 = vpop.f32.mrf.mxu1  ;;  %2497 = vmatpush.bf16.msra.mxu1 %v4350_v54  ;;  %v4143_v54 = vld [vmem:[#allocation4 + $0x158] sm:$0xf0] }
 0x152   : > { %v1032_v49 = vadd.f32 %v1031_v32, %v943_v37 }
 0x153   : > { %v5563_v56 = vadd.f32 %v993_v27, %v905_v26 }
 0x154   : > { %v1818_v32 = vmul.f32 0.2, %v1032_v49  ;;  %vm1690_vm0 = vcmp.ge.f32.partialorder %v1032_v49, 0.0 }
 0x156   : > { %v944_v21 = vpop.f32.mrf.mxu2  ;;  %v1946_v20 = vsel %vm1690_vm0, %v1032_v49, %v1818_v32  ;;  %v1838_v32 = vsel %vm1582_vm3, %v5479_v7, %v1710_v57  ;;  %vm1602_vm0 = vcmp.ge.f32.partialorder %v5511_v30, 0.0 }
 0x157   : > { %v945_v11 = vadd.f32 %v944_v21, %v5456_v47  ;;  %v5573_v47 = vperm.slane %v5453_v46, 1 }
 0x158   : > { %v1223_v37 = vpop.f32.mrf.mxu0 }
 0x159   : > { %v1033_v3 = vpop.f32.mrf.mxu3  ;;  %v1224_v26 = vadd.f32 %v1223_v37, %v5566_v15  ;;  %v1312_v27 = vpop.f32.mrf.mxu1 }
 0x15a   : > { %v1034_v36 = vadd.f32 %v1033_v3, %v945_v11  ;;  %v4015_v11 = vld [vmem:[#allocation4 + $0x58] sm:$0xf0]  ;;  %v4592_v3 = vld [vmem:[#allocation4 + $0x14c] sm:$0xf] }
 0x15b   : > { %v1313_v44 = vadd.f32 %v1312_v27, %v1224_v26  ;;  %1084 = vmatmul.bf16.gmra.mxu2 %v5303_v0  ;;  %1262 = vmatmul.bf16.gmra.mxu0 %v5303_v0  ;;  %v4018_v27 = vor.u32 %v4560_v8, %v4015_v11 }
 0x15c   : > { %vm1694_vm1 = vcmp.ge.f32.partialorder %v1034_v36, 0.0  ;;  %v1822_v35 = vmul.f32 0.2, %v1034_v36  ;;  %1351 = vmatmul.bf16.gmra.mxu1 %v5307_v5 }
 0x15d   : > { %v1700_v38 = vmul.f32 0.2, %v1313_v44  ;;  %1397 = vmatpush.bf16.msra.mxu2 %v4018_v27  ;;  %vm1572_vm4 = vcmp.ge.f32.partialorder %v1313_v44, 0.0 }
 0x15e   : > { %1173 = vmatmul.bf16.gmra.mxu3 %v5307_v5  ;;  %v1950_v21 = vsel %vm1694_vm1, %v1034_v36, %v1822_v35  ;;  %v1045_v51 = vpop.f32.mrf.mxu2  ;;  %v4146_v5 = vor.u32 %v4592_v3, %v4143_v54  ;;  %v1834_v35 = vsel %vm1578_vm2, %v5469_v50, %v1706_v48  ;;  %vm1606_vm1 = vcmp.ge.f32.partialorder %v5521_v55, 0.0 }
 0x15f   : > { %v5580_v37 = vpack.c.bf16 %v1950_v21, %v1946_v20  ;;  %v1046_v46 = vadd.f32 %v1045_v51, %v5573_v47  ;;  %v5589_v20 = vpack.c.bf16 %v1838_v32, %v1834_v35  ;;  %v1828_v8 = vsel %vm1572_vm4, %v1313_v44, %v1700_v38 }
 0x160   : > { %v1225_v0 = vpop.f32.mrf.mxu0  ;;  %1486 = vmatpush.bf16.msra.mxu3 %v4146_v5  ;;  %v1714_v38 = vmul.f32 0.2, %v5483_v31  ;;  %v1718_v44 = vmul.f32 0.2, %v5493_v62  ;;  %vm1610_vm4 = vcmp.ge.f32.partialorder %v5525_v52, 0.0 }
 0x161   : > { %6879 = vst [vmem:[#allocation39_spill] sm:$0xff] %v5580_v37  ;;  %v1134_v26 = vpop.f32.mrf.mxu3  ;;  %v1226_v9 = vadd.f32 %v1225_v0, %v5566_v15  ;;  %v1314_v49 = vpop.f32.mrf.mxu1 }
 0x162   : > { %v1135_v13 = vadd.f32 %v1134_v26, %v1046_v46 }
 0x163   : > { %v1315_v36 = vadd.f32 %v1314_v49, %v1226_v9 }
 0x164   : > { %v1699_v46 = vmul.f32 0.2, %v1135_v13  ;;  %vm1571_vm6 = vcmp.ge.f32.partialorder %v1135_v13, 0.0 }
 0x165   : > { %vm1576_vm5 = vcmp.ge.f32.partialorder %v1315_v36, 0.0  ;;  %v1704_v21 = vmul.f32 0.2, %v1315_v36 }
 0x166   : > { %v1047_v51 = vpop.f32.mrf.mxu2  ;;  %v1827_v57 = vsel %vm1571_vm6, %v1135_v13, %v1699_v46  ;;  %v1846_v13 = vsel %vm1590_vm9, %v5493_v62, %v1718_v44  ;;  %v4277_v46 = vld [vmem:[#allocation7 + $0x60] sm:$0xf]  ;;  %vm1622_vm9 = vcmp.ge.f32.partialorder %v5549_v28, 0.0 }
 0x167   : > { %v1832_v11 = vsel %vm1576_vm5, %v1315_v36, %v1704_v21  ;;  %v1048_v0 = vadd.f32 %v1047_v51, %v5573_v47  ;;  %vm1614_vm5 = vcmp.ge.f32.partialorder %v5535_v29, 0.0 }
 0x168   : > { %v5592_v54 = vpack.c.bf16 %v1832_v11, %v1828_v8  ;;  %v1228_v5 = vpop.f32.mrf.mxu0 }
 0x169   : > { %v1136_v3 = vpop.f32.mrf.mxu3  ;;  %v1229_v50 = vadd.f32 %v1228_v5, %v5566_v15  ;;  %v1317_v48 = vpop.f32.mrf.mxu1 }
 0x16a   : > { %6880 = vst [vmem:[#allocation40_spill] sm:$0xff] %v5592_v54  ;;  %v1137_v26 = vadd.f32 %v1136_v3, %v1048_v0  ;;  %v1842_v0 = vsel %vm1586_vm8, %v5483_v31, %v1714_v38  ;;  %vm1618_vm8 = vcmp.ge.f32.partialorder %v5539_v53, 0.0 }
 0x16b   : > { %v5595_v7 = vadd.f32 %v1317_v48, %v1229_v50  ;;  %1089 = vmatmul.bf16.gmra.mxu2 %v5323_v23  ;;  %1267 = vmatmul.bf16.gmra.mxu0 %v5323_v23  ;;  %v5611_v3 = vpack.c.bf16 %v1846_v13, %v1842_v0  ;;  %v4341_v48 = vld [vmem:[#allocation7 + $0xe0] sm:$0xf]  ;;  %v1726_v0 = vmul.f32 0.2, %v5507_v2  ;;  %v4556_v13 = vld [vmem:[#allocation4 + $0x2c] sm:$0xf] }
 0x16c   : > { %vm1575_vm7 = vcmp.ge.f32.partialorder %v1137_v26, 0.0  ;;  %v1703_v9 = vmul.f32 0.2, %v1137_v26  ;;  %1356 = vmatmul.bf16.gmra.mxu1 %v5327_v25 }
 0x16e   : > { %1178 = vmatmul.bf16.gmra.mxu3 %v5327_v25  ;;  %v1831_v27 = vsel %vm1575_vm7, %v1137_v26, %v1703_v9  ;;  %v1050_v35 = vpop.f32.mrf.mxu2  ;;  %v4628_v26 = vld [vmem:[#allocation7 + $0x64] sm:$0xf0] }
 0x16f   : > { %v5605_v49 = vpack.c.bf16 %v1831_v27, %v1827_v57  ;;  %v1051_v32 = vadd.f32 %v1050_v35, %v5573_v47  ;;  %v4278_v50 = vor.u32 %v4628_v26, %v4277_v46  ;;  %v4644_v57 = vld [vmem:[#allocation7 + $0xe4] sm:$0xf0] }
 0x170   : > { %v1230_v8 = vpop.f32.mrf.mxu0 }
 0x171   : > { %6881 = vst [vmem:[#allocation41_spill] sm:$0xff] %v5605_v49  ;;  %v1139_v36 = vpop.f32.mrf.mxu3  ;;  %v1231_v51 = vadd.f32 %v1230_v8, %v5566_v15  ;;  %v1319_v11 = vpop.f32.mrf.mxu1  ;;  %2409 = vmatpush.bf16.msra.mxu0 %v4278_v50 }
 0x172   : > { %v1140_v21 = vadd.f32 %v1139_v36, %v1051_v32  ;;  %v4342_v32 = vor.u32 %v4644_v57, %v4341_v48  ;;  %v3999_v48 = vld [vmem:[#allocation4 + $0x38] sm:$0xf0] }
 0x173   : > { %v5613_v5 = vadd.f32 %v1319_v11, %v1231_v51  ;;  %v1722_v11 = vmul.f32 0.2, %v5497_v34  ;;  %v4127_v57 = vld [vmem:[#allocation4 + $0x138] sm:$0xf0] }
 0x174   : > { %v1707_v8 = vmul.f32 0.2, %v1140_v21  ;;  %2498 = vmatpush.bf16.msra.mxu1 %v4342_v32  ;;  %vm1579_vm10 = vcmp.ge.f32.partialorder %v1140_v21, 0.0 }
 0x176   : > { %v1052_v9 = vpop.f32.mrf.mxu2  ;;  %v1835_v46 = vsel %vm1579_vm10, %v1140_v21, %v1707_v8  ;;  %v1850_v21 = vsel %vm1594_vm12, %v5497_v34, %v1722_v11  ;;  %v1854_v8 = vsel %vm1598_vm13, %v5507_v2, %v1726_v0  ;;  %v1734_v2 = vmul.f32 0.2, %v5521_v55 }
 0x177   : > { %v1053_v27 = vadd.f32 %v1052_v9, %v5573_v47  ;;  %v4588_v9 = vld [vmem:[#allocation4 + $0x12c] sm:$0xf]  ;;  %vm1626_vm12 = vcmp.ge.f32.partialorder %v5553_v1, 0.0  ;;  %vm1630_vm13 = vcmp.ge.f32.partialorder %v5563_v56, 0.0 }
 0x178   : > { %v1233_v36 = vpop.f32.mrf.mxu0 }
 0x179   : > { %v1141_v35 = vpop.f32.mrf.mxu3  ;;  %v1234_v62 = vadd.f32 %v1233_v36, %v5566_v15  ;;  %v1322_v38 = vpop.f32.mrf.mxu1  ;;  %v4002_v36 = vor.u32 %v4556_v13, %v3999_v48 }
 0x17a   : > { %v1142_v31 = vadd.f32 %v1141_v35, %v1053_v27 }
 0x17b   : > { %v5617_v51 = vadd.f32 %v1322_v38, %v1234_v62  ;;  %1094 = vmatmul.bf16.gmra.mxu2 %v5343_v41  ;;  %1272 = vmatmul.bf16.gmra.mxu0 %v5343_v41  ;;  %v4130_v62 = vor.u32 %v4588_v9, %v4127_v57 }
 0x17c   : > { %vm1583_vm11 = vcmp.ge.f32.partialorder %v1142_v31, 0.0  ;;  %v1711_v44 = vmul.f32 0.2, %v1142_v31  ;;  %1361 = vmatmul.bf16.gmra.mxu1 %v5347_v43  ;;  %1398 = vmatpush.bf16.msra.mxu2 %v4002_v36 }
 0x17d   : > { %1487 = vmatpush.bf16.msra.mxu3 %v4130_v62 }
 0x17e   : > { %1183 = vmatmul.bf16.gmra.mxu3 %v5347_v43  ;;  %v1839_v26 = vsel %vm1583_vm11, %v1142_v31, %v1711_v44  ;;  %v1055_v50 = vpop.f32.mrf.mxu2  ;;  %v5637_v44 = vpack.c.bf16 %v1854_v8, %v1850_v21 }
 0x17f   : > { %v5626_v27 = vpack.c.bf16 %v1839_v26, %v1835_v46  ;;  %v1056_v35 = vadd.f32 %v1055_v50, %v5573_v47 }
 0x180   : > { %v1235_v38 = vpop.f32.mrf.mxu0 }
 0x181   : > { %v1144_v32 = vpop.f32.mrf.mxu3  ;;  %v1236_v37 = vadd.f32 %v1235_v38, %v5566_v15  ;;  %v1324_v43 = vpop.f32.mrf.mxu1 }
 0x182   : > { %v1145_v54 = vadd.f32 %v1144_v32, %v1056_v35 }
 0x183   : > { %v5635_v31 = vadd.f32 %v1324_v43, %v1236_v37  ;;  %v1730_v43 = vmul.f32 0.2, %v5511_v30 }
 0x184   : > { %v1715_v48 = vmul.f32 0.2, %v1145_v54  ;;  %vm1587_vm14 = vcmp.ge.f32.partialorder %v1145_v54, 0.0 }
 0x186   : > { %v1057_v46 = vpop.f32.mrf.mxu2  ;;  %v1843_v37 = vsel %vm1587_vm14, %v1145_v54, %v1715_v48  ;;  %v1862_v54 = vsel %vm1606_vm1, %v5521_v55, %v1734_v2 }
 0x187   : > { %v1058_v13 = vadd.f32 %v1057_v46, %v5573_v47 }
 0x188   : > { %v1238_v50 = vpop.f32.mrf.mxu0 }
 0x189   : > { %v1146_v26 = vpop.f32.mrf.mxu3  ;;  %v1239_v57 = vadd.f32 %v1238_v50, %v5566_v15  ;;  %v1327_v35 = vpop.f32.mrf.mxu1 }
 0x18a   : > { %v1147_v9 = vadd.f32 %v1146_v26, %v1058_v13  ;;  %v1858_v26 = vsel %vm1602_vm0, %v5511_v30, %v1730_v43 }
 0x18b   : > { %v5641_v34 = vadd.f32 %v1327_v35, %v1239_v57  ;;  %1099 = vmatmul.bf16.gmra.mxu2 %v5363_v59  ;;  %1277 = vmatmul.bf16.gmra.mxu0 %v5363_v59  ;;  %v5657_v50 = vpack.c.bf16 %v1862_v54, %v1858_v26  ;;  %v4626_v57 = vld [vmem:[#allocation7 + $0x54] sm:$0xf0]  ;;  %v1742_v26 = vmul.f32 0.2, %v5535_v29  ;;  %v4552_v54 = vld [vmem:[#allocation4 + $0xc] sm:$0xf] }
 0x18c   : > { %vm1591_vm15 = vcmp.ge.f32.partialorder %v1147_v9, 0.0  ;;  %v1719_v32 = vmul.f32 0.2, %v1147_v9  ;;  %1366 = vmatmul.bf16.gmra.mxu1 %v5367_v61 }
 0x18e   : > { %1188 = vmatmul.bf16.gmra.mxu3 %v5367_v61  ;;  %v1847_v11 = vsel %vm1591_vm15, %v1147_v9, %v1719_v32  ;;  %v1060_v0 = vpop.f32.mrf.mxu2  ;;  %v4269_v9 = vld [vmem:[#allocation7 + $0x50] sm:$0xf] }
 0x18f   : > { %v5651_v36 = vpack.c.bf16 %v1847_v11, %v1843_v37  ;;  %v1061_v62 = vadd.f32 %v1060_v0, %v5573_v47  ;;  %v4270_v35 = vor.u32 %v4626_v57, %v4269_v9  ;;  %v4333_v32 = vld [vmem:[#allocation7 + $0xd0] sm:$0xf]  ;;  %v4642_v11 = vld [vmem:[#allocation7 + $0xd4] sm:$0xf0] }
 0x190   : > { %v1240_v21 = vpop.f32.mrf.mxu0 }
 0x191   : > { %v1149_v38 = vpop.f32.mrf.mxu3  ;;  %v1241_v46 = vadd.f32 %v1240_v21, %v5566_v15  ;;  %v1329_v13 = vpop.f32.mrf.mxu1  ;;  %2410 = vmatpush.bf16.msra.mxu0 %v4270_v35 }
 0x192   : > { %v1150_v8 = vadd.f32 %v1149_v38, %v1061_v62  ;;  %v4334_v38 = vor.u32 %v4642_v11, %v4333_v32  ;;  %v3983_v32 = vld [vmem:[#allocation4 + $0x18] sm:$0xf0] }
 0x193   : > { %v5659_v48 = vadd.f32 %v1329_v13, %v1241_v46  ;;  %v1738_v13 = vmul.f32 0.2, %v5525_v52  ;;  %v4111_v11 = vld [vmem:[#allocation4 + $0x118] sm:$0xf0] }
 0x194   : > { %v1723_v61 = vmul.f32 0.2, %v1150_v8  ;;  %2499 = vmatpush.bf16.msra.mxu1 %v4334_v38  ;;  %vm1595_vm2 = vcmp.ge.f32.partialorder %v1150_v8, 0.0 }
 0x196   : > { %v1062_v37 = vpop.f32.mrf.mxu2  ;;  %v1851_v9 = vsel %vm1595_vm2, %v1150_v8, %v1723_v61  ;;  %v1866_v61 = vsel %vm1610_vm4, %v5525_v52, %v1738_v13  ;;  %v1870_v8 = vsel %vm1614_vm5, %v5535_v29, %v1742_v26  ;;  %v4622_v13 = vld [vmem:[#allocation7 + $0x34] sm:$0xf0]  ;;  %v4317_v26 = vld [vmem:[#allocation7 + $0xb0] sm:$0xf]  ;;  %vm1580_vm2 = vcmp.ge.f32.partialorder %v5595_v7, 0.0 }
 0x197   : > { %v1063_v0 = vadd.f32 %v1062_v37, %v5573_v47  ;;  %v4584_v37 = vld [vmem:[#allocation4 + $0x10c] sm:$0xf] }
 0x198   : > { %v1243_v21 = vpop.f32.mrf.mxu0 }
 0x199   : > { %v1151_v62 = vpop.f32.mrf.mxu3  ;;  %v1244_v55 = vadd.f32 %v1243_v21, %v5566_v15  ;;  %v1332_v43 = vpop.f32.mrf.mxu1  ;;  %v3986_v21 = vor.u32 %v4552_v54, %v3983_v32  ;;  %v4261_v54 = vld [vmem:[#allocation7 + $0x40] sm:$0xf] }
 0x19a   : > { %v1152_v30 = vadd.f32 %v1151_v62, %v1063_v0 }
 0x19b   : > { %v5663_v46 = vadd.f32 %v1332_v43, %v1244_v55  ;;  %1104 = vmatmul.bf16.gmra.mxu2 %v5383_v17  ;;  %1282 = vmatmul.bf16.gmra.mxu0 %v5383_v17  ;;  %v4114_v55 = vor.u32 %v4584_v37, %v4111_v11 }
 0x19c   : > { %vm1599_vm3 = vcmp.ge.f32.partialorder %v1152_v30, 0.0  ;;  %v1727_v2 = vmul.f32 0.2, %v1152_v30  ;;  %1371 = vmatmul.bf16.gmra.mxu1 %v5387_v19  ;;  %1399 = vmatpush.bf16.msra.mxu2 %v3986_v21 }
 0x19d   : > { %1488 = vmatpush.bf16.msra.mxu3 %v4114_v55 }
 0x19e   : > { %1193 = vmatmul.bf16.gmra.mxu3 %v5387_v19  ;;  %v1855_v57 = vsel %vm1599_vm3, %v1152_v30, %v1727_v2  ;;  %v1065_v35 = vpop.f32.mrf.mxu2  ;;  %v5683_v2 = vpack.c.bf16 %v1870_v8, %v1866_v61  ;;  %vm1584_vm3 = vcmp.ge.f32.partialorder %v5613_v5, 0.0 }
 0x19f   : > { %v5672_v0 = vpack.c.bf16 %v1855_v57, %v1851_v9  ;;  %v1066_v62 = vadd.f32 %v1065_v35, %v5573_v47  ;;  %v4624_v57 = vld [vmem:[#allocation7 + $0x44] sm:$0xf0]  ;;  %v4325_v35 = vld [vmem:[#allocation7 + $0xc0] sm:$0xf] }
 0x1a0   : > { %v1245_v43 = vpop.f32.mrf.mxu0  ;;  %v4262_v11 = vor.u32 %v4624_v57, %v4261_v54  ;;  %v1746_v54 = vmul.f32 0.2, %v5539_v53 }
 0x1a1   : > { %v1154_v38 = vpop.f32.mrf.mxu3  ;;  %v1246_v17 = vadd.f32 %v1245_v43, %v5566_v15  ;;  %v1334_v59 = vpop.f32.mrf.mxu1 }
 0x1a2   : > { %v1155_v19 = vadd.f32 %v1154_v38, %v1066_v62  ;;  %v4640_v62 = vld [vmem:[#allocation7 + $0xc4] sm:$0xf0]  ;;  %2411 = vmatpush.bf16.msra.mxu0 %v4262_v11 }
 0x1a3   : > { %v5681_v30 = vadd.f32 %v1334_v59, %v1246_v17  ;;  %v4326_v21 = vor.u32 %v4640_v62, %v4325_v35  ;;  %v4253_v17 = vld [vmem:[#allocation7 + $0x30] sm:$0xf]  ;;  %v1750_v35 = vmul.f32 0.2, %v5549_v28  ;;  %v4245_v62 = vld [vmem:[#allocation7 + $0x20] sm:$0xf] }
 0x1a4   : > { %vm1603_vm6 = vcmp.ge.f32.partialorder %v1155_v19, 0.0  ;;  %v1731_v55 = vmul.f32 0.2, %v1155_v19  ;;  %v4254_v8 = vor.u32 %v4622_v13, %v4253_v17 }
 0x1a5   : > { %2500 = vmatpush.bf16.msra.mxu1 %v4326_v21  ;;  %v4309_v21 = vld [vmem:[#allocation7 + $0xa0] sm:$0xf] }
 0x1a6   : > { %v1067_v9 = vpop.f32.mrf.mxu2  ;;  %2412 = vmatpush.bf16.msra.mxu0 %v4254_v8 }
 0x1a7   : > { %v1068_v32 = vadd.f32 %v1067_v9, %v5573_v47  ;;  %v4638_v9 = vld [vmem:[#allocation7 + $0xb4] sm:$0xf0] }
 0x1a8   : > { %v1248_v38 = vpop.f32.mrf.mxu0  ;;  %v4318_v57 = vor.u32 %v4638_v9, %v4317_v26  ;;  %v4636_v26 = vld [vmem:[#allocation7 + $0xa4] sm:$0xf0] }
 0x1a9   : > { %v1156_v37 = vpop.f32.mrf.mxu3  ;;  %v1249_v29 = vadd.f32 %v1248_v38, %v5566_v15  ;;  %v1337_v59 = vpop.f32.mrf.mxu1  ;;  %v4620_v38 = vld [vmem:[#allocation7 + $0x24] sm:$0xf0] }
 0x1aa   : > { %v1157_v52 = vadd.f32 %v1156_v37, %v1068_v32  ;;  %v1859_v32 = vsel %vm1603_vm6, %v1155_v19, %v1731_v55  ;;  %2501 = vmatpush.bf16.msra.mxu1 %v4318_v57  ;;  %v4246_v13 = vor.u32 %v4620_v38, %v4245_v62  ;;  %v1874_v55 = vsel %vm1618_vm8, %v5539_v53, %v1746_v54  ;;  %v4618_v57 = vld [vmem:[#allocation7 + $0x14] sm:$0xf0]  ;;  %v4616_v53 = vld [vmem:[#allocation7 + $0x4] sm:$0xf0]  ;;  %v4293_v54 = vld [vmem:[#allocation7 + $0x80] sm:$0xf] }
 0x1ab   : > { %v5687_v61 = vadd.f32 %v1337_v59, %v1249_v29  ;;  %1109 = vmatmul.bf16.gmra.mxu2 %v5403_v10  ;;  %1287 = vmatmul.bf16.gmra.mxu0 %v5403_v10  ;;  %v4634_v38 = vld [vmem:[#allocation7 + $0x94] sm:$0xf0]  ;;  %vm1588_vm6 = vcmp.ge.f32.partialorder %v5617_v51, 0.0 }
 0x1ac   : > { %vm1607_vm7 = vcmp.ge.f32.partialorder %v1157_v52, 0.0  ;;  %v1735_v43 = vmul.f32 0.2, %v1157_v52  ;;  %1376 = vmatmul.bf16.gmra.mxu1 %v5407_v12  ;;  %2413 = vmatpush.bf16.msra.mxu0 %v4246_v13 }
 0x1ae   : > { %1198 = vmatmul.bf16.gmra.mxu3 %v5407_v12  ;;  %v1863_v37 = vsel %vm1607_vm7, %v1157_v52, %v1735_v43  ;;  %v1070_v11 = vpop.f32.mrf.mxu2  ;;  %v4310_v12 = vor.u32 %v4636_v26, %v4309_v21  ;;  %v1878_v52 = vsel %vm1622_vm9, %v5549_v28, %v1750_v35  ;;  %v4237_v43 = vld [vmem:[#allocation7 + $0x10] sm:$0xf]  ;;  %v4632_v35 = vld [vmem:[#allocation7 + $0x84] sm:$0xf0]  ;;  %vm1592_vm7 = vcmp.ge.f32.partialorder %v5635_v31, 0.0 }
 0x1af   : > { %v5699_v29 = vpack.c.bf16 %v1863_v37, %v1859_v32  ;;  %v1071_v59 = vadd.f32 %v1070_v11, %v5573_v47  ;;  %v4301_v32 = vld [vmem:[#allocation7 + $0x90] sm:$0xf]  ;;  %v5709_v37 = vpack.c.bf16 %v1878_v52, %v1874_v55  ;;  %v4238_v62 = vor.u32 %v4618_v57, %v4237_v43 }
 0x1b0   : > { %v1250_v9 = vpop.f32.mrf.mxu0  ;;  %2502 = vmatpush.bf16.msra.mxu1 %v4310_v12  ;;  %v4302_v21 = vor.u32 %v4634_v38, %v4301_v32  ;;  %v1754_v32 = vmul.f32 0.2, %v5553_v1  ;;  %v4413_v38 = vld [vmem:[#allocation7 + $0x170] sm:$0xf] }
 0x1b1   : > { %v1159_v17 = vpop.f32.mrf.mxu3  ;;  %v1251_v8 = vadd.f32 %v1250_v9, %v5566_v15  ;;  %v1339_v19 = vpop.f32.mrf.mxu1  ;;  %6882 = vst [vmem:[#allocation42_spill] sm:$0xff] %v5709_v37  ;;  %2414 = vmatpush.bf16.msra.mxu0 %v4238_v62  ;;  %v4294_v9 = vor.u32 %v4632_v35, %v4293_v54  ;;  %v1758_v62 = vmul.f32 0.2, %v5563_v56  ;;  %v4477_v54 = vld [vmem:[#allocation7 + $0x1f0] sm:$0xf] }
 0x1b2   : > { %v1160_v10 = vadd.f32 %v1159_v17, %v1071_v59  ;;  %v4229_v17 = vld [vmem:[#allocation7] sm:$0xf] }
 0x1b3   : > { %v5711_v11 = vadd.f32 %v1339_v19, %v1251_v8  ;;  %v4230_v12 = vor.u32 %v4616_v53, %v4229_v17  ;;  %v4662_v53 = vld [vmem:[#allocation7 + $0x174] sm:$0xf0] }
 0x1b4   : > { %2503 = vmatpush.bf16.msra.mxu1 %v4302_v21  ;;  %v1739_v55 = vmul.f32 0.2, %v1160_v10  ;;  %vm1611_vm10 = vcmp.ge.f32.partialorder %v1160_v10, 0.0 }
 0x1b5   : > { %2415 = vmatpush.bf16.msra.mxu0 %v4230_v12 }
 0x1b6   : > { %v1072_v59 = vpop.f32.mrf.mxu2  ;;  %v1867_v21 = vsel %vm1611_vm10, %v1160_v10, %v1739_v55  ;;  %v1882_v10 = vsel %vm1626_vm12, %v5553_v1, %v1754_v32  ;;  %v1886_v55 = vsel %vm1630_vm13, %v5563_v56, %v1758_v62  ;;  %vm1596_vm10 = vcmp.ge.f32.partialorder %v5641_v34, 0.0 }
 0x1b7   : > { %v1073_v13 = vadd.f32 %v1072_v59, %v5573_v47 }
 0x1b8   : > { %v1253_v26 = vpop.f32.mrf.mxu0  ;;  %2504 = vmatpush.bf16.msra.mxu1 %v4294_v9 }
 0x1b9   : > { %v1161_v28 = vpop.f32.mrf.mxu3  ;;  %v1254_v8 = vadd.f32 %v1253_v26, %v5566_v15  ;;  %v1342_v19 = vpop.f32.mrf.mxu1  ;;  %v4414_v26 = vor.u32 %v4662_v53, %v4413_v38 }
 0x1ba   : > { %v1162_v52 = vadd.f32 %v1161_v28, %v1073_v13  ;;  %v4678_v13 = vld [vmem:[#allocation7 + $0x1f4] sm:$0xf0] }
 0x1bb   : > { %v5715_v57 = vadd.f32 %v1342_v19, %v1254_v8  ;;  %1114 = vmatmul.bf16.gmra.mxu2 %v5423_v6  ;;  %1292 = vmatmul.bf16.gmra.mxu0 %v5423_v6  ;;  %v4478_v9 = vor.u32 %v4678_v13, %v4477_v54 }
 0x1bc   : > { %vm1615_vm11 = vcmp.ge.f32.partialorder %v1162_v52, 0.0  ;;  %v1743_v43 = vmul.f32 0.2, %v1162_v52  ;;  %1381 = vmatmul.bf16.gmra.mxu1 %v5427_v14  ;;  %2586 = vmatpush.bf16.msrb.mxu2 %v4414_v26 }
 0x1bd   : > { %2675 = vmatpush.bf16.msrb.mxu3 %v4478_v9 }
 0x1be   : > { %1203 = vmatmul.bf16.gmra.mxu3 %v5427_v14  ;;  %v1871_v59 = vsel %vm1615_vm11, %v1162_v52, %v1743_v43  ;;  %v1075_v17 = vpop.f32.mrf.mxu2  ;;  %v5735_v43 = vpack.c.bf16 %v1886_v55, %v1882_v10  ;;  %vm1600_vm11 = vcmp.ge.f32.partialorder %v5659_v48, 0.0 }
 0x1bf   : > { %v5724_v28 = vpack.c.bf16 %v1871_v59, %v1867_v21  ;;  %v1076_v12 = vadd.f32 %v1075_v17, %v5573_v47 }
 0x1c0   : > { %v1255_v8 = vpop.f32.mrf.mxu0 }
 0x1c1   : > { %v1164_v35 = vpop.f32.mrf.mxu3  ;;  %v1256_v14 = vadd.f32 %v1255_v8, %v5566_v15  ;;  %v1344_v6 = vpop.f32.mrf.mxu1 }
 0x1c2   : > { %v1165_v19 = vadd.f32 %v1164_v35, %v1076_v12 }
 0x1c3   : > { %v5733_v52 = vadd.f32 %v1344_v6, %v1256_v14 }
 0x1c4   : > { %v1747_v53 = vmul.f32 0.2, %v1165_v19  ;;  %vm1619_vm14 = vcmp.ge.f32.partialorder %v1165_v19, 0.0 }
 0x1c6   : > { %v1077_v21 = vpop.f32.mrf.mxu2  ;;  %v1875_v6 = vsel %vm1619_vm14, %v1165_v19, %v1747_v53  ;;  %vm1604_vm14 = vcmp.ge.f32.partialorder %v5663_v46, 0.0 }
 0x1c7   : > { %v1078_v38 = vadd.f32 %v1077_v21, %v5573_v47 }
 0x1c8   : > { %v1258_v17 = vpop.f32.mrf.mxu0 }
 0x1c9   : > { %v1166_v59 = vpop.f32.mrf.mxu3  ;;  %v1259_v13 = vadd.f32 %v1258_v17, %v5566_v15  ;;  %v1347_v12 = vpop.f32.mrf.mxu1 }
 0x1ca   : > { %v1167_v54 = vadd.f32 %v1166_v59, %v1078_v38 }
 0x1cb   : > { %v5739_v1 = vadd.f32 %v1347_v12, %v1259_v13  ;;  %1119 = vmatmul.bf16.gmra.mxu2 %v5443_v39  ;;  %1297 = vmatmul.bf16.gmra.mxu0 %v5443_v39 }
 0x1cc   : > { %vm1623_vm15 = vcmp.ge.f32.partialorder %v1167_v54, 0.0  ;;  %v1751_v35 = vmul.f32 0.2, %v1167_v54  ;;  %1386 = vmatmul.bf16.gmra.mxu1 %v5447_v45 }
 0x1ce   : > { %1208 = vmatmul.bf16.gmra.mxu3 %v5447_v45  ;;  %v1879_v14 = vsel %vm1623_vm15, %v1167_v54, %v1751_v35  ;;  %v1080_v56 = vpop.f32.mrf.mxu2  ;;  %vm1608_vm15 = vcmp.ge.f32.partialorder %v5681_v30, 0.0 }
 0x1cf   : > { %v5745_v32 = vpack.c.bf16 %v1879_v14, %v1875_v6  ;;  %v1081_v62 = vadd.f32 %v1080_v56, %v5573_v47  ;;  %v1708_v14 = vmul.f32 0.2, %v5595_v7  ;;  %v1712_v56 = vmul.f32 0.2, %v5613_v5 }
 0x1d0   : > { %v1260_v9 = vpop.f32.mrf.mxu0 }
 0x1d1   : > { %6883 = vst [vmem:[#allocation43_spill] sm:$0xff] %v5745_v32  ;;  %v1169_v26 = vpop.f32.mrf.mxu3  ;;  %v1261_v10 = vadd.f32 %v1260_v9, %v5566_v15  ;;  %v1349_v55 = vpop.f32.mrf.mxu1 }
 0x1d2   : > { %v1170_v8 = vadd.f32 %v1169_v26, %v1081_v62  ;;  %v4405_v62 = vld [vmem:[#allocation7 + $0x160] sm:$0xf] }
 0x1d3   : > { %v5749_v21 = vadd.f32 %v1349_v55, %v1261_v10  ;;  %v4660_v55 = vld [vmem:[#allocation7 + $0x164] sm:$0xf0] }
 0x1d4   : > { %v1755_v19 = vmul.f32 0.2, %v1170_v8  ;;  %vm1627_vm0 = vcmp.ge.f32.partialorder %v1170_v8, 0.0 }
 0x1d6   : > { %v1082_v38 = vpop.f32.mrf.mxu2  ;;  %v1883_v26 = vsel %vm1627_vm0, %v1170_v8, %v1755_v19  ;;  %v1836_v8 = vsel %vm1580_vm2, %v5595_v7, %v1708_v14  ;;  %v1840_v19 = vsel %vm1584_vm3, %v5613_v5, %v1712_v56  ;;  %vm1612_vm2 = vcmp.ge.f32.partialorder %v5687_v61, 0.0 }
 0x1d7   : > { %v1083_v59 = vadd.f32 %v1082_v38, %v5573_v47  ;;  %v4469_v38 = vld [vmem:[#allocation7 + $0x1e0] sm:$0xf]  ;;  %vm1616_vm3 = vcmp.ge.f32.partialorder %v5711_v11, 0.0 }
 0x1d8   : > { %v1263_v13 = vpop.f32.mrf.mxu0 }
 0x1d9   : > { %v1171_v17 = vpop.f32.mrf.mxu3  ;;  %v1264_v54 = vadd.f32 %v1263_v13, %v5566_v15  ;;  %v1352_v12 = vpop.f32.mrf.mxu1  ;;  %v4406_v13 = vor.u32 %v4660_v55, %v4405_v62 }
 0x1da   : > { %v1172_v53 = vadd.f32 %v1171_v17, %v1083_v59  ;;  %v4676_v59 = vld [vmem:[#allocation7 + $0x1e4] sm:$0xf0] }
 0x1db   : > { %v5753_v6 = vadd.f32 %v1352_v12, %v1264_v54  ;;  %1400 = vmatmul.bf16.vlgmr.msra.gmra.mxu2 %v5301_v63  ;;  %2416 = vmatmul.bf16.vlgmr.msra.gmra.mxu0 %v5466_v33  ;;  %v4470_v54 = vor.u32 %v4676_v59, %v4469_v38 }
 0x1dc   : > { %vm1631_vm1 = vcmp.ge.f32.partialorder %v1172_v53, 0.0  ;;  %v1759_v35 = vmul.f32 0.2, %v1172_v53  ;;  %2505 = vmatmul.bf16.vlgmr.msra.gmra.mxu1 %v5605_v49  ;;  %2587 = vmatpush.bf16.msrb.mxu2 %v4406_v13 }
 0x1dd   : > { %2676 = vmatpush.bf16.msrb.mxu3 %v4470_v54 }
 0x1de   : > { %1489 = vmatmul.bf16.vlgmr.msra.gmra.mxu3 %v5305_v4  ;;  %v1887_v9 = vsel %vm1631_vm1, %v1172_v53, %v1759_v35  ;;  %v1085_v10 = vpop.f32.mrf.mxu2  ;;  %v5773_v35 = vpack.c.bf16 %v1840_v19, %v1836_v8 }
 0x1df   : > { %v5762_v63 = vpack.c.bf16 %v1887_v9, %v1883_v26  ;;  %v1086_v17 = vadd.f32 %v1085_v10, %v5573_v47 }
 0x1e0   : > { %v1265_v12 = vpop.f32.mrf.mxu0 }
 0x1e1   : > { %6884 = vst [vmem:[#allocation44_spill] sm:$0xff] %v5762_v63  ;;  %v1174_v4 = vpop.f32.mrf.mxu3  ;;  %v1266_v33 = vadd.f32 %v1265_v12, %v5566_v15  ;;  %v1354_v45 = vpop.f32.mrf.mxu1 }
 0x1e2   : > { %v1175_v49 = vadd.f32 %v1174_v4, %v1086_v17 }
 0x1e3   : > { %v5771_v53 = vadd.f32 %v1354_v45, %v1266_v33  ;;  %v1716_v45 = vmul.f32 0.2, %v5617_v51  ;;  %v1720_v33 = vmul.f32 0.2, %v5635_v31 }
 0x1e4   : > { %v1763_v55 = vmul.f32 0.2, %v1175_v49  ;;  %vm1635_vm4 = vcmp.ge.f32.partialorder %v1175_v49, 0.0 }
 0x1e6   : > { %v1087_v26 = vpop.f32.mrf.mxu2  ;;  %v1891_v5 = vsel %vm1635_vm4, %v1175_v49, %v1763_v55  ;;  %v1848_v49 = vsel %vm1592_vm7, %v5635_v31, %v1720_v33  ;;  %v1724_v31 = vmul.f32 0.2, %v5641_v34  ;;  %v4397_v33 = vld [vmem:[#allocation7 + $0x150] sm:$0xf]  ;;  %vm1624_vm7 = vcmp.ge.f32.partialorder %v5733_v52, 0.0 }
 0x1e7   : > { %v1088_v62 = vadd.f32 %v1087_v26, %v5573_v47  ;;  %v1844_v26 = vsel %vm1588_vm6, %v5617_v51, %v1716_v45  ;;  %v1728_v45 = vmul.f32 0.2, %v5659_v48  ;;  %vm1620_vm6 = vcmp.ge.f32.partialorder %v5715_v57, 0.0 }
 0x1e8   : > { %v1268_v10 = vpop.f32.mrf.mxu0 }
 0x1e9   : > { %v1176_v9 = vpop.f32.mrf.mxu3  ;;  %v1269_v59 = vadd.f32 %v1268_v10, %v5566_v15  ;;  %v1357_v17 = vpop.f32.mrf.mxu1 }
 0x1ea   : > { %v1177_v38 = vadd.f32 %v1176_v9, %v1088_v62  ;;  %v5793_v62 = vpack.c.bf16 %v1848_v49, %v1844_v26  ;;  %v4674_v26 = vld [vmem:[#allocation7 + $0x1d4] sm:$0xf0] }
 0x1eb   : > { %v5777_v7 = vadd.f32 %v1357_v17, %v1269_v59  ;;  %1405 = vmatmul.bf16.gmra.mxu2 %v5321_v22  ;;  %2421 = vmatmul.bf16.gmra.mxu0 %v5589_v20 }
 0x1ec   : > { %vm1639_vm5 = vcmp.ge.f32.partialorder %v1177_v38, 0.0  ;;  %v1767_v4 = vmul.f32 0.2, %v1177_v38  ;;  %2510 = vmatmul.bf16.gmra.mxu1 %v5626_v27 }
 0x1ee   : > { %1494 = vmatmul.bf16.gmra.mxu3 %v5325_v24  ;;  %v1895_v14 = vsel %vm1639_vm5, %v1177_v38, %v1767_v4  ;;  %v1090_v56 = vpop.f32.mrf.mxu2 }
 0x1ef   : > { %v5787_v13 = vpack.c.bf16 %v1895_v14, %v1891_v5  ;;  %v1091_v22 = vadd.f32 %v1090_v56, %v5573_v47 }
 0x1f0   : > { %v1270_v12 = vpop.f32.mrf.mxu0 }
 0x1f1   : > { %6885 = vst [vmem:[#allocation45_spill] sm:$0xff] %v5787_v13  ;;  %v1179_v54 = vpop.f32.mrf.mxu3  ;;  %v1271_v8 = vadd.f32 %v1270_v12, %v5566_v15  ;;  %v1359_v19 = vpop.f32.mrf.mxu1 }
 0x1f2   : > { %v1180_v24 = vadd.f32 %v1179_v54, %v1091_v22 }
 0x1f3   : > { %v5795_v9 = vadd.f32 %v1359_v19, %v1271_v8  ;;  %v4658_v8 = vld [vmem:[#allocation7 + $0x154] sm:$0xf0]  ;;  %v4461_v19 = vld [vmem:[#allocation7 + $0x1d0] sm:$0xf] }
 0x1f4   : > { %v1771_v17 = vmul.f32 0.2, %v1180_v24  ;;  %vm1643_vm8 = vcmp.ge.f32.partialorder %v1180_v24, 0.0 }
 0x1f6   : > { %v1092_v10 = vpop.f32.mrf.mxu2  ;;  %v1899_v22 = vsel %vm1643_vm8, %v1180_v24, %v1771_v17  ;;  %v1852_v24 = vsel %vm1596_vm10, %v5641_v34, %v1724_v31  ;;  %v1856_v17 = vsel %vm1600_vm11, %v5659_v48, %v1728_v45  ;;  %v1732_v48 = vmul.f32 0.2, %v5663_v46 }
 0x1f7   : > { %v1093_v55 = vadd.f32 %v1092_v10, %v5573_v47  ;;  %v4398_v10 = vor.u32 %v4658_v8, %v4397_v33  ;;  %v1736_v31 = vmul.f32 0.2, %v5681_v30  ;;  %vm1628_vm8 = vcmp.ge.f32.partialorder %v5739_v1, 0.0 }
 0x1f8   : > { %v1273_v59 = vpop.f32.mrf.mxu0  ;;  %vm1632_vm11 = vcmp.ge.f32.partialorder %v5749_v21, 0.0 }
 0x1f9   : > { %v1181_v38 = vpop.f32.mrf.mxu3  ;;  %v1274_v5 = vadd.f32 %v1273_v59, %v5566_v15  ;;  %v1362_v14 = vpop.f32.mrf.mxu1  ;;  %2588 = vmatpush.bf16.msrb.mxu2 %v4398_v10 }
 0x1fa   : > { %v1182_v4 = vadd.f32 %v1181_v38, %v1093_v55  ;;  %v4462_v55 = vor.u32 %v4674_v26, %v4461_v19 }
 0x1fb   : > { %v5799_v51 = vadd.f32 %v1362_v14, %v1274_v5  ;;  %1410 = vmatmul.bf16.gmra.mxu2 %v5341_v40  ;;  %2426 = vmatmul.bf16.gmra.mxu0 %v5611_v3 }
 0x1fc   : > { %vm1647_vm9 = vcmp.ge.f32.partialorder %v1182_v4, 0.0  ;;  %v1775_v56 = vmul.f32 0.2, %v1182_v4  ;;  %2515 = vmatmul.bf16.gmra.mxu1 %v5651_v36  ;;  %2677 = vmatpush.bf16.msrb.mxu3 %v4462_v55 }
 0x1fe   : > { %1499 = vmatmul.bf16.gmra.mxu3 %v5345_v42  ;;  %v1903_v54 = vsel %vm1647_vm9, %v1182_v4, %v1775_v56  ;;  %v1095_v12 = vpop.f32.mrf.mxu2  ;;  %v5819_v56 = vpack.c.bf16 %v1856_v17, %v1852_v24 }
 0x1ff   : > { %v5808_v40 = vpack.c.bf16 %v1903_v54, %v1899_v22  ;;  %v1096_v49 = vadd.f32 %v1095_v12, %v5573_v47 }
 0x200   : > { %v1275_v38 = vpop.f32.mrf.mxu0 }
 0x201   : > { %v1184_v42 = vpop.f32.mrf.mxu3  ;;  %v1276_v5 = vadd.f32 %v1275_v38, %v5566_v15  ;;  %v1364_v14 = vpop.f32.mrf.mxu1 }
 0x202   : > { %v1185_v59 = vadd.f32 %v1184_v42, %v1096_v49 }
 0x203   : > { %v5817_v4 = vadd.f32 %v1364_v14, %v1276_v5 }
 0x204   : > { %v1779_v8 = vmul.f32 0.2, %v1185_v59  ;;  %vm1651_vm12 = vcmp.ge.f32.partialorder %v1185_v59, 0.0 }
 0x206   : > { %v1097_v22 = vpop.f32.mrf.mxu2  ;;  %v1907_v45 = vsel %vm1651_vm12, %v1185_v59, %v1779_v8  ;;  %v1864_v59 = vsel %vm1608_vm15, %v5681_v30, %v1736_v31  ;;  %v1740_v30 = vmul.f32 0.2, %v5687_v61  ;;  %v4389_v31 = vld [vmem:[#allocation7 + $0x140] sm:$0xf]  ;;  %vm1640_vm15 = vcmp.ge.f32.partialorder %v5771_v53, 0.0 }
 0x207   : > { %v1098_v33 = vadd.f32 %v1097_v22, %v5573_v47  ;;  %v1860_v22 = vsel %vm1604_vm14, %v5663_v46, %v1732_v48  ;;  %v1744_v48 = vmul.f32 0.2, %v5711_v11  ;;  %vm1636_vm14 = vcmp.ge.f32.partialorder %v5753_v6, 0.0 }
 0x208   : > { %v1278_v12 = vpop.f32.mrf.mxu0 }
 0x209   : > { %v1186_v54 = vpop.f32.mrf.mxu3  ;;  %v1279_v26 = vadd.f32 %v1278_v12, %v5566_v15  ;;  %v1367_v49 = vpop.f32.mrf.mxu1 }
 0x20a   : > { %v1187_v19 = vadd.f32 %v1186_v54, %v1098_v33  ;;  %v5839_v33 = vpack.c.bf16 %v1864_v59, %v1860_v22  ;;  %v4672_v22 = vld [vmem:[#allocation7 + $0x1c4] sm:$0xf0] }
 0x20b   : > { %v5823_v34 = vadd.f32 %v1367_v49, %v1279_v26  ;;  %1415 = vmatmul.bf16.gmra.mxu2 %v5361_v58  ;;  %2431 = vmatmul.bf16.gmra.mxu0 %v5637_v44 }
 0x20c   : > { %vm1655_vm13 = vcmp.ge.f32.partialorder %v1187_v19, 0.0  ;;  %v1783_v42 = vmul.f32 0.2, %v1187_v19  ;;  %2520 = vmatmul.bf16.gmra.mxu1 %v5672_v0 }
 0x20e   : > { %1504 = vmatmul.bf16.gmra.mxu3 %v5365_v60  ;;  %v1911_v10 = vsel %vm1655_vm13, %v1187_v19, %v1783_v42  ;;  %v1100_v55 = vpop.f32.mrf.mxu2 }
 0x20f   : > { %v5833_v38 = vpack.c.bf16 %v1911_v10, %v1907_v45  ;;  %v1101_v58 = vadd.f32 %v1100_v55, %v5573_v47 }
 0x210   : > { %v1280_v14 = vpop.f32.mrf.mxu0 }
 0x211   : > { %6886 = vst [vmem:[#allocation46_spill] sm:$0xff] %v5833_v38  ;;  %v1189_v5 = vpop.f32.mrf.mxu3  ;;  %v1281_v24 = vadd.f32 %v1280_v14, %v5566_v15  ;;  %v1369_v17 = vpop.f32.mrf.mxu1 }
 0x212   : > { %v1190_v60 = vadd.f32 %v1189_v5, %v1101_v58 }
 0x213   : > { %v5841_v54 = vadd.f32 %v1369_v17, %v1281_v24  ;;  %v4656_v24 = vld [vmem:[#allocation7 + $0x144] sm:$0xf0]  ;;  %v4453_v17 = vld [vmem:[#allocation7 + $0x1c0] sm:$0xf] }
 0x214   : > { %v1787_v49 = vmul.f32 0.2, %v1190_v60  ;;  %vm1659_vm0 = vcmp.ge.f32.partialorder %v1190_v60, 0.0 }
 0x216   : > { %v1102_v12 = vpop.f32.mrf.mxu2  ;;  %v1915_v58 = vsel %vm1659_vm0, %v1190_v60, %v1787_v49  ;;  %v1868_v60 = vsel %vm1612_vm2, %v5687_v61, %v1740_v30  ;;  %v1872_v49 = vsel %vm1616_vm3, %v5711_v11, %v1744_v48  ;;  %v6888_v11 = vld [vmem:[#allocation20_spill] sm:$0xff]  ;;  %v6889_v30 = vld [vmem:[#allocation22_spill] sm:$0xff]  ;;  %v1748_v48 = vmul.f32 0.2, %v5715_v57 }
 0x217   : > { %v1103_v8 = vadd.f32 %v1102_v12, %v5573_v47  ;;  %v4390_v12 = vor.u32 %v4656_v24, %v4389_v31  ;;  %vm1644_vm2 = vcmp.ge.f32.partialorder %v5777_v7, 0.0  ;;  %vm1648_vm3 = vcmp.ge.f32.partialorder %v5795_v9, 0.0 }
 0x218   : > { %v1283_v26 = vpop.f32.mrf.mxu0 }
 0x219   : > { %v1191_v19 = vpop.f32.mrf.mxu3  ;;  %v1284_v45 = vadd.f32 %v1283_v26, %v5566_v15  ;;  %v1372_v10 = vpop.f32.mrf.mxu1  ;;  %2589 = vmatpush.bf16.msrb.mxu2 %v4390_v12  ;;  %v1752_v12 = vmul.f32 0.2, %v5733_v52 }
 0x21a   : > { %v1192_v42 = vadd.f32 %v1191_v19, %v1103_v8  ;;  %v4454_v8 = vor.u32 %v4672_v22, %v4453_v17 }
 0x21b   : > { %v5845_v46 = vadd.f32 %v1372_v10, %v1284_v45  ;;  %1420 = vmatmul.bf16.gmra.mxu2 %v5381_v16  ;;  %2436 = vmatmul.bf16.gmra.mxu0 %v5657_v50 }
 0x21c   : > { %vm1663_vm1 = vcmp.ge.f32.partialorder %v1192_v42, 0.0  ;;  %v1791_v55 = vmul.f32 0.2, %v1192_v42  ;;  %2525 = vmatmul.bf16.gmra.mxu1 %v5699_v29  ;;  %2678 = vmatpush.bf16.msrb.mxu3 %v4454_v8 }
 0x21e   : > { %1509 = vmatmul.bf16.gmra.mxu3 %v5385_v18  ;;  %v1919_v5 = vsel %vm1663_vm1, %v1192_v42, %v1791_v55  ;;  %v1105_v14 = vpop.f32.mrf.mxu2  ;;  %v5865_v55 = vpack.c.bf16 %v1872_v49, %v1868_v60 }
 0x21f   : > { %v5854_v16 = vpack.c.bf16 %v1919_v5, %v1915_v58  ;;  %v1106_v59 = vadd.f32 %v1105_v14, %v5573_v47 }
 0x220   : > { %v1285_v19 = vpop.f32.mrf.mxu0 }
 0x221   : > { %6887 = vst [vmem:[#allocation47_spill] sm:$0xff] %v5854_v16  ;;  %v1194_v18 = vpop.f32.mrf.mxu3  ;;  %v1286_v45 = vadd.f32 %v1285_v19, %v5566_v15  ;;  %v1374_v10 = vpop.f32.mrf.mxu1 }
 0x222   : > { %v1195_v26 = vadd.f32 %v1194_v18, %v1106_v59 }
 0x223   : > { %v5863_v42 = vadd.f32 %v1374_v10, %v1286_v45 }
 0x224   : > { %v1795_v24 = vmul.f32 0.2, %v1195_v26  ;;  %vm1667_vm4 = vcmp.ge.f32.partialorder %v1195_v26, 0.0 }
 0x226   : > { %v1107_v58 = vpop.f32.mrf.mxu2  ;;  %v1923_v8 = vsel %vm1667_vm4, %v1195_v26, %v1795_v24  ;;  %v1880_v26 = vsel %vm1624_vm7, %v5733_v52, %v1752_v12  ;;  %v6893_v12 = vld [vmem:[#allocation26_spill] sm:$0xff]  ;;  %vm1656_vm7 = vcmp.ge.f32.partialorder %v5817_v4, 0.0 }
 0x227   : > { %v1108_v31 = vadd.f32 %v1107_v58, %v5573_v47 }
 0x228   : > { %v1288_v14 = vpop.f32.mrf.mxu0 }
 0x229   : > { %v1196_v5 = vpop.f32.mrf.mxu3  ;;  %v1289_v22 = vadd.f32 %v1288_v14, %v5566_v15  ;;  %v1377_v59 = vpop.f32.mrf.mxu1 }
 0x22a   : > { %v1197_v17 = vadd.f32 %v1196_v5, %v1108_v31 }
 0x22b   : > { %v5869_v61 = vadd.f32 %v1377_v59, %v1289_v22  ;;  %1425 = vmatmul.bf16.gmra.mxu2 %v6888_v11  ;;  %2441 = vmatmul.bf16.gmra.mxu0 %v5683_v2  ;;  %v1876_v22 = vsel %vm1620_vm6, %v5715_v57, %v1748_v48  ;;  %v6892_v48 = vld [vmem:[#allocation24_spill] sm:$0xff]  ;;  %vm1652_vm6 = vcmp.ge.f32.partialorder %v5799_v51, 0.0 }
 0x22c   : > { %vm1671_vm5 = vcmp.ge.f32.partialorder %v1197_v17, 0.0  ;;  %v1799_v18 = vmul.f32 0.2, %v1197_v17  ;;  %2530 = vmatmul.bf16.gmra.mxu1 %v5724_v28  ;;  %v5885_v24 = vpack.c.bf16 %v1880_v26, %v1876_v22  ;;  %v1760_v22 = vmul.f32 0.2, %v5749_v21 }
 0x22e   : > { %1514 = vmatmul.bf16.gmra.mxu3 %v6889_v30  ;;  %v1927_v19 = vsel %vm1671_vm5, %v1197_v17, %v1799_v18  ;;  %v1110_v45 = vpop.f32.mrf.mxu2  ;;  %6891 = vst [vmem:[#allocation22_spill] sm:$0xff] %v5885_v24 }
 0x22f   : > { %v5879_v10 = vpack.c.bf16 %v1927_v19, %v1923_v8  ;;  %v1111_v60 = vadd.f32 %v1110_v45, %v5573_v47 }
 0x230   : > { %v1290_v58 = vpop.f32.mrf.mxu0 }
 0x231   : > { %6890 = vst [vmem:[#allocation20_spill] sm:$0xff] %v5879_v10  ;;  %v1199_v49 = vpop.f32.mrf.mxu3  ;;  %v1291_v5 = vadd.f32 %v1290_v58, %v5566_v15  ;;  %v1379_v14 = vpop.f32.mrf.mxu1  ;;  %v4654_v58 = vld [vmem:[#allocation7 + $0x134] sm:$0xf0] }
 0x232   : > { %v1200_v31 = vadd.f32 %v1199_v49, %v1111_v60  ;;  %v4381_v49 = vld [vmem:[#allocation7 + $0x130] sm:$0xf] }
 0x233   : > { %v5887_v17 = vadd.f32 %v1379_v14, %v1291_v5  ;;  %v4445_v5 = vld [vmem:[#allocation7 + $0x1b0] sm:$0xf]  ;;  %v1756_v14 = vmul.f32 0.2, %v5739_v1  ;;  %v4382_v26 = vor.u32 %v4654_v58, %v4381_v49 }
 0x234   : > { %v1803_v60 = vmul.f32 0.2, %v1200_v31  ;;  %vm1675_vm9 = vcmp.ge.f32.partialorder %v1200_v31, 0.0 }
 0x235   : > { %2590 = vmatpush.bf16.msrb.mxu2 %v4382_v26 }
 0x236   : > { %v1112_v59 = vpop.f32.mrf.mxu2 }
 0x237   : > { %v1113_v18 = vadd.f32 %v1112_v59, %v5573_v47  ;;  %v4670_v59 = vld [vmem:[#allocation7 + $0x1b4] sm:$0xf0] }
 0x238   : > { %v1293_v30 = vpop.f32.mrf.mxu0 }
 0x239   : > { %v1201_v11 = vpop.f32.mrf.mxu3  ;;  %v1294_v19 = vadd.f32 %v1293_v30, %v5566_v15  ;;  %v1382_v45 = vpop.f32.mrf.mxu1  ;;  %v1931_v30 = vsel %vm1675_vm9, %v1200_v31, %v1803_v60  ;;  %v1888_v31 = vsel %vm1632_vm11, %v5749_v21, %v1760_v22  ;;  %v6895_v21 = vld [vmem:[#allocation28_spill] sm:$0xff]  ;;  %v1764_v22 = vmul.f32 0.2, %v5753_v6 }
 0x23a   : > { %v1202_v8 = vadd.f32 %v1201_v11, %v1113_v18  ;;  %v4446_v11 = vor.u32 %v4670_v59, %v4445_v5  ;;  %v1884_v5 = vsel %vm1628_vm8, %v5739_v1, %v1756_v14  ;;  %v6896_v14 = vld [vmem:[#allocation29_spill] sm:$0xff]  ;;  %vm1664_vm11 = vcmp.ge.f32.partialorder %v5841_v54, 0.0 }
 0x23b   : > { %v5892_v52 = vadd.f32 %v1382_v45, %v1294_v19  ;;  %1430 = vmatmul.bf16.gmra.mxu2 %v6892_v48  ;;  %2446 = vmatmul.bf16.gmra.mxu0 %v5709_v37  ;;  %v5911_v60 = vpack.c.bf16 %v1888_v31, %v1884_v5 }
 0x23c   : > { %vm1679_vm10 = vcmp.ge.f32.partialorder %v1202_v8, 0.0  ;;  %v1807_v57 = vmul.f32 0.2, %v1202_v8  ;;  %2535 = vmatmul.bf16.gmra.mxu1 %v5745_v32  ;;  %2679 = vmatpush.bf16.msrb.mxu3 %v4446_v11 }
 0x23e   : > { %1519 = vmatmul.bf16.gmra.mxu3 %v6893_v12  ;;  %v1115_v18 = vpop.f32.mrf.mxu2  ;;  %v1935_v19 = vsel %vm1679_vm10, %v1202_v8, %v1807_v57  ;;  %vm1660_vm10 = vcmp.ge.f32.partialorder %v5823_v34, 0.0 }
 0x23f   : > { %v1116_v45 = vadd.f32 %v1115_v18, %v5573_v47  ;;  %v5904_v12 = vpack.c.bf16 %v1935_v19, %v1931_v30 }
 0x240   : > { %v1295_v32 = vpop.f32.mrf.mxu0 }
 0x241   : > { %v1204_v48 = vpop.f32.mrf.mxu3  ;;  %6894 = vst [vmem:[#allocation24_spill] sm:$0xff] %v5904_v12  ;;  %v1296_v49 = vadd.f32 %v1295_v32, %v5566_v15  ;;  %v1384_v58 = vpop.f32.mrf.mxu1 }
 0x242   : > { %v1205_v37 = vadd.f32 %v1204_v48, %v1116_v45  ;;  %v1768_v48 = vmul.f32 0.2, %v5771_v53 }
 0x243   : > { %v5913_v8 = vadd.f32 %v1384_v58, %v1296_v49 }
 0x244   : > { %v1811_v11 = vmul.f32 0.2, %v1205_v37  ;;  %vm1683_vm12 = vcmp.ge.f32.partialorder %v1205_v37, 0.0 }
 0x246   : > { %v1117_v57 = vpop.f32.mrf.mxu2  ;;  %v1939_v49 = vsel %vm1683_vm12, %v1205_v37, %v1811_v11  ;;  %v1896_v37 = vsel %vm1640_vm15, %v5771_v53, %v1768_v48  ;;  %v2082_v11 = vld [vmem:[%s6789_s4] sm:$0x3]  ;;  %vm1672_vm15 = vcmp.ge.f32.partialorder %v5863_v42, 0.0 }
 0x247   : > { %v1118_v26 = vadd.f32 %v1117_v57, %v5573_v47 }
 0x248   : > { %v1298_v18 = vpop.f32.mrf.mxu0 }
 0x249   : > { %v1206_v59 = vpop.f32.mrf.mxu3  ;;  %v1299_v32 = vadd.f32 %v1298_v18, %v5566_v15  ;;  %v1387_v19 = vpop.f32.mrf.mxu1 }
 0x24a   : > { %v1207_v30 = vadd.f32 %v1206_v59, %v1118_v26 }
 0x24b   : > { %v5917_v1 = vadd.f32 %v1387_v19, %v1299_v32  ;;  %1435 = vmatmul.bf16.gmra.mxu2 %v6895_v21  ;;  %2451 = vmatmul.bf16.gmra.mxu0 %v5735_v43  ;;  %v1892_v21 = vsel %vm1636_vm14, %v5753_v6, %v1764_v22  ;;  %vm1668_vm14 = vcmp.ge.f32.partialorder %v5845_v46, 0.0 }
 0x24c   : > { %vm1687_vm13 = vcmp.ge.f32.partialorder %v1207_v30, 0.0  ;;  %v1815_v45 = vmul.f32 0.2, %v1207_v30  ;;  %2540 = vmatmul.bf16.gmra.mxu1 %v5762_v63 }
 0x24e   : > { %1524 = vmatmul.bf16.gmra.mxu3 %v6896_v14  ;;  %v1943_v58 = vsel %vm1687_vm13, %v1207_v30, %v1815_v45  ;;  %v1120_v5 = vpop.f32.mrf.mxu2  ;;  %v5936_v30 = vpack.c.bf16 %v1896_v37, %v1892_v21  ;;  %v4629_v14 = vld [vmem:[#allocation7 + $0x74] sm:$0xf]  ;;  %v1772_v37 = vmul.f32 0.2, %v5777_v7 }
 0x24f   : > { %v5927_v31 = vpack.c.bf16 %v1943_v58, %v1939_v49  ;;  %v1121_v57 = vadd.f32 %v1120_v5, %v5573_v47  ;;  %v4287_v49 = vld [vmem:[#allocation7 + $0x78] sm:$0xf0]  ;;  %v4645_v58 = vld [vmem:[#allocation7 + $0xf4] sm:$0xf] }
 0x250   : > { %v1300_v59 = vpop.f32.mrf.mxu0  ;;  %6897 = vst [vmem:[#allocation26_spill] sm:$0xff] %v5936_v30  ;;  %v4351_v5 = vld [vmem:[#allocation7 + $0xf8] sm:$0xf0] }
 0x251   : > { %v1209_v26 = vpop.f32.mrf.mxu3  ;;  %v1301_v32 = vadd.f32 %v1300_v59, %v5566_v15  ;;  %v1389_v19 = vpop.f32.mrf.mxu1  ;;  %v4290_v15 = vor.u32 %v4629_v14, %v4287_v49  ;;  %v6899_v14 = vld [vmem:[#allocation13_spill] sm:$0xff]  ;;  %v6900_v49 = vld [vmem:[#allocation32_spill] sm:$0xff] }
 0x252   : > { %v1210_v18 = vadd.f32 %v1209_v26, %v1121_v57  ;;  %v5940_v57 = vperm.slane %v2082_v11, 0  ;;  %v4354_v26 = vor.u32 %v4645_v58, %v4351_v5  ;;  %v6901_v5 = vld [vmem:[#allocation14_spill] sm:$0xff] }
 0x253   : > { %v5938_v45 = vadd.f32 %v1389_v19, %v1301_v32  ;;  %2764 = vmatpush.bf16.msrb.mxu0 %v4290_v15  ;;  %v4373_v15 = vld [vmem:[#allocation7 + $0x120] sm:$0xf] }
 0x254   : > { %2853 = vmatpush.bf16.msrb.mxu1 %v4354_v26  ;;  %v1819_v48 = vmul.f32 0.2, %v1210_v18  ;;  %vm1691_vm0 = vcmp.ge.f32.partialorder %v1210_v18, 0.0  ;;  %v4652_v26 = vld [vmem:[#allocation7 + $0x124] sm:$0xf0] }
 0x256   : > { %v1122_v59 = vpop.f32.mrf.mxu2 }
 0x257   : > { %v1123_v6 = vadd.f32 %v1122_v59, %v5573_v47  ;;  %v4926_v47 = vld [vmem:[#allocation6] sm:$0xf]  ;;  %v4437_v59 = vld [vmem:[#allocation7 + $0x1a0] sm:$0xf] }
 0x258   : > { %v2417_v22 = vpop.f32.mrf.mxu0  ;;  %v5949_v58 = vperm.slane %v4926_v47, 3 }
 0x259   : > { %v1211_v53 = vpop.f32.mrf.mxu3  ;;  %v2418_v32 = vadd.f32 %v2417_v22, %v5940_v57  ;;  %v2506_v19 = vpop.f32.mrf.mxu1  ;;  %v4668_v22 = vld [vmem:[#allocation7 + $0x1a4] sm:$0xf0] }
 0x25a   : > { %v1212_v21 = vadd.f32 %v1211_v53, %v1123_v6  ;;  %v1776_v6 = vmul.f32 0.2, %v5795_v9  ;;  %v4374_v53 = vor.u32 %v4652_v26, %v4373_v15  ;;  %v4438_v47 = vor.u32 %v4668_v22, %v4437_v59 }
 0x25b   : > { %v5945_v30 = vadd.f32 %v2506_v19, %v2418_v32  ;;  %1440 = vmatmul.bf16.gmra.mxu2 %v6899_v14  ;;  %2456 = vmatmul.bf16.gmra.mxu0 %v6900_v49  ;;  %v1947_v32 = vsel %vm1691_vm0, %v1210_v18, %v1819_v48  ;;  %v1900_v48 = vsel %vm1644_vm2, %v5777_v7, %v1772_v37  ;;  %v1780_v37 = vmul.f32 0.2, %v5799_v51 }
 0x25c   : > { %vm1695_vm1 = vcmp.ge.f32.partialorder %v1212_v21, 0.0  ;;  %v1823_v11 = vmul.f32 0.2, %v1212_v21  ;;  %2545 = vmatmul.bf16.gmra.mxu1 %v5787_v13  ;;  %2591 = vmatpush.bf16.msrb.mxu2 %v4374_v53  ;;  %vm1676_vm2 = vcmp.ge.f32.partialorder %v5869_v61, 0.0 }
 0x25d   : > { %6898 = vst [vmem:[#allocation28_spill] sm:$0xff] %v5945_v30  ;;  %2680 = vmatpush.bf16.msrb.mxu3 %v4438_v47 }
 0x25e   : > { %1529 = vmatmul.bf16.gmra.mxu3 %v6901_v5  ;;  %v1951_v19 = vsel %vm1695_vm1, %v1212_v21, %v1823_v11  ;;  %v1401_v14 = vpop.f32.mrf.mxu2  ;;  %v1904_v21 = vsel %vm1648_vm3, %v5795_v9, %v1776_v6  ;;  %v6904_v9 = vld [vmem:[#allocation33_spill] sm:$0xff]  ;;  %v1784_v6 = vmul.f32 0.2, %v5817_v4  ;;  %vm1680_vm3 = vcmp.ge.f32.partialorder %v5887_v17, 0.0 }
 0x25f   : > { %v5958_v5 = vpack.c.bf16 %v1951_v19, %v1947_v32  ;;  %v1402_v30 = vadd.f32 %v1401_v14, %v5949_v58  ;;  %v5964_v11 = vpack.c.bf16 %v1904_v21, %v1900_v48 }
 0x260   : > { %v2419_v49 = vpop.f32.mrf.mxu0 }
 0x261   : > { %6902 = vst [vmem:[#allocation29_spill] sm:$0xff] %v5958_v5  ;;  %v1490_v13 = vpop.f32.mrf.mxu3  ;;  %v2420_v26 = vadd.f32 %v2419_v49, %v5940_v57  ;;  %v2508_v18 = vpop.f32.mrf.mxu1 }
 0x262   : > { %v1491_v15 = vadd.f32 %v1490_v13, %v1402_v30 }
 0x263   : > { %v5966_v63 = vadd.f32 %v2508_v18, %v2420_v26 }
 0x264   : > { %v1701_v53 = vmul.f32 0.2, %v1491_v15  ;;  %vm1573_vm4 = vcmp.ge.f32.partialorder %v1491_v15, 0.0 }
 0x266   : > { %v1403_v59 = vpop.f32.mrf.mxu2  ;;  %v1829_v47 = vsel %vm1573_vm4, %v1491_v15, %v1701_v53  ;;  %v1912_v15 = vsel %vm1656_vm7, %v5817_v4, %v1784_v6  ;;  %vm1688_vm7 = vcmp.ge.f32.partialorder %v5913_v8, 0.0 }
 0x267   : > { %v1404_v22 = vadd.f32 %v1403_v59, %v5949_v58 }
 0x268   : > { %v2422_v19 = vpop.f32.mrf.mxu0 }
 0x269   : > { %v1492_v32 = vpop.f32.mrf.mxu3  ;;  %v2423_v13 = vadd.f32 %v2422_v19, %v5940_v57  ;;  %v2511_v30 = vpop.f32.mrf.mxu1  ;;  %v1908_v19 = vsel %vm1652_vm6, %v5799_v51, %v1780_v37  ;;  %vm1684_vm6 = vcmp.ge.f32.partialorder %v5892_v52, 0.0 }
 0x26a   : > { %v1493_v14 = vadd.f32 %v1492_v32, %v1404_v22  ;;  %v5986_v53 = vpack.c.bf16 %v1912_v15, %v1908_v19  ;;  %v6907_v15 = vld [vmem:[#allocation34_spill] sm:$0xff] }
 0x26b   : > { %v5970_v7 = vadd.f32 %v2511_v30, %v2423_v13  ;;  %1445 = vmatmul.bf16.gmra.mxu2 %v5323_v23  ;;  %2461 = vmatmul.bf16.gmra.mxu0 %v6904_v9  ;;  %v4627_v13 = vld [vmem:[#allocation7 + $0x64] sm:$0xf]  ;;  %v4279_v30 = vld [vmem:[#allocation7 + $0x68] sm:$0xf0] }
 0x26c   : > { %vm1577_vm5 = vcmp.ge.f32.partialorder %v1493_v14, 0.0  ;;  %v1705_v49 = vmul.f32 0.2, %v1493_v14  ;;  %2550 = vmatmul.bf16.gmra.mxu1 %v5808_v40 }
 0x26d   : > { %6903 = vst [vmem:[#allocation13_spill] sm:$0xff] %v5970_v7 }
 0x26e   : > { %1534 = vmatmul.bf16.gmra.mxu3 %v5327_v25  ;;  %v1833_v26 = vsel %vm1577_vm5, %v1493_v14, %v1705_v49  ;;  %v1406_v48 = vpop.f32.mrf.mxu2  ;;  %v4643_v49 = vld [vmem:[#allocation7 + $0xe4] sm:$0xf] }
 0x26f   : > { %v5980_v18 = vpack.c.bf16 %v1833_v26, %v1829_v47  ;;  %v1407_v23 = vadd.f32 %v1406_v48, %v5949_v58  ;;  %v4343_v47 = vld [vmem:[#allocation7 + $0xe8] sm:$0xf0]  ;;  %v4282_v26 = vor.u32 %v4627_v13, %v4279_v30  ;;  %v4365_v13 = vld [vmem:[#allocation7 + $0x110] sm:$0xf]  ;;  %v4650_v30 = vld [vmem:[#allocation7 + $0x114] sm:$0xf0] }
 0x270   : > { %v2424_v59 = vpop.f32.mrf.mxu0  ;;  %v4346_v48 = vor.u32 %v4643_v49, %v4343_v47  ;;  %v4429_v49 = vld [vmem:[#allocation7 + $0x190] sm:$0xf]  ;;  %v1792_v47 = vmul.f32 0.2, %v5841_v54 }
 0x271   : > { %6905 = vst [vmem:[#allocation14_spill] sm:$0xff] %v5980_v18  ;;  %v1495_v21 = vpop.f32.mrf.mxu3  ;;  %v2425_v22 = vadd.f32 %v2424_v59, %v5940_v57  ;;  %v2513_v32 = vpop.f32.mrf.mxu1  ;;  %2765 = vmatpush.bf16.msrb.mxu0 %v4282_v26  ;;  %v4366_v26 = vor.u32 %v4650_v30, %v4365_v13 }
 0x272   : > { %v1496_v25 = vadd.f32 %v1495_v21, %v1407_v23  ;;  %2854 = vmatpush.bf16.msrb.mxu1 %v4346_v48  ;;  %v4666_v48 = vld [vmem:[#allocation7 + $0x194] sm:$0xf0] }
 0x273   : > { %v5988_v14 = vadd.f32 %v2513_v32, %v2425_v22  ;;  %v1788_v22 = vmul.f32 0.2, %v5823_v34  ;;  %2592 = vmatpush.bf16.msrb.mxu2 %v4366_v26 }
 0x274   : > { %v1709_v51 = vmul.f32 0.2, %v1496_v25  ;;  %vm1581_vm8 = vcmp.ge.f32.partialorder %v1496_v25, 0.0 }
 0x276   : > { %v1408_v7 = vpop.f32.mrf.mxu2 }
 0x277   : > { %v1409_v23 = vadd.f32 %v1408_v7, %v5949_v58  ;;  %v6908_v7 = vld [vmem:[#allocation15_spill] sm:$0xff] }
 0x278   : > { %v2427_v59 = vpop.f32.mrf.mxu0 }
 0x279   : > { %v1497_v21 = vpop.f32.mrf.mxu3  ;;  %v2428_v4 = vadd.f32 %v2427_v59, %v5940_v57  ;;  %v2516_v6 = vpop.f32.mrf.mxu1  ;;  %v4430_v59 = vor.u32 %v4666_v48, %v4429_v49 }
 0x27a   : > { %v1498_v37 = vadd.f32 %v1497_v21, %v1409_v23  ;;  %v1837_v23 = vsel %vm1581_vm8, %v1496_v25, %v1709_v51  ;;  %v1916_v25 = vsel %vm1660_vm10, %v5823_v34, %v1788_v22  ;;  %v1920_v51 = vsel %vm1664_vm11, %v5841_v54, %v1792_v47  ;;  %v6911_v54 = vld [vmem:[#allocation16_spill] sm:$0xff]  ;;  %v6912_v22 = vld [vmem:[#allocation35_spill] sm:$0xff]  ;;  %v6913_v47 = vld [vmem:[#allocation17_spill] sm:$0xff] }
 0x27b   : > { %v5993_v19 = vadd.f32 %v2516_v6, %v2428_v4  ;;  %1450 = vmatmul.bf16.gmra.mxu2 %v5343_v41  ;;  %2466 = vmatmul.bf16.gmra.mxu0 %v6907_v15  ;;  %vm1692_vm10 = vcmp.ge.f32.partialorder %v5917_v1, 0.0  ;;  %vm1696_vm11 = vcmp.ge.f32.partialorder %v5938_v45, 0.0 }
 0x27c   : > { %vm1585_vm9 = vcmp.ge.f32.partialorder %v1498_v37, 0.0  ;;  %v1713_v32 = vmul.f32 0.2, %v1498_v37  ;;  %2555 = vmatmul.bf16.gmra.mxu1 %v5833_v38  ;;  %2681 = vmatpush.bf16.msrb.mxu3 %v4430_v59 }
 0x27d   : > { %6906 = vst [vmem:[#allocation33_spill] sm:$0xff] %v5993_v19 }
 0x27e   : > { %1539 = vmatmul.bf16.gmra.mxu3 %v6908_v7  ;;  %v1841_v21 = vsel %vm1585_vm9, %v1498_v37, %v1713_v32  ;;  %v1411_v41 = vpop.f32.mrf.mxu2  ;;  %v6008_v37 = vpack.c.bf16 %v1920_v51, %v1916_v25 }
 0x27f   : > { %v6002_v4 = vpack.c.bf16 %v1841_v21, %v1837_v23  ;;  %v1412_v6 = vadd.f32 %v1411_v41, %v5949_v58 }
 0x280   : > { %v2429_v19 = vpop.f32.mrf.mxu0  ;;  %6909 = vst [vmem:[#allocation34_spill] sm:$0xff] %v6008_v37 }
 0x281   : > { %v1500_v7 = vpop.f32.mrf.mxu3  ;;  %v2430_v13 = vadd.f32 %v2429_v19, %v5940_v57  ;;  %v2518_v30 = vpop.f32.mrf.mxu1 }
 0x282   : > { %v1501_v38 = vadd.f32 %v1500_v7, %v1412_v6  ;;  %v1796_v7 = vmul.f32 0.2, %v5845_v46 }
 0x283   : > { %v6010_v32 = vadd.f32 %v2518_v30, %v2430_v13  ;;  %v1800_v13 = vmul.f32 0.2, %v5863_v42 }
 0x284   : > { %v1717_v26 = vmul.f32 0.2, %v1501_v38  ;;  %vm1589_vm12 = vcmp.ge.f32.partialorder %v1501_v38, 0.0 }
 0x286   : > { %v1413_v49 = vpop.f32.mrf.mxu2  ;;  %v1845_v30 = vsel %vm1589_vm12, %v1501_v38, %v1717_v26  ;;  %v1928_v38 = vsel %vm1672_vm15, %v5863_v42, %v1800_v13 }
 0x287   : > { %v1414_v48 = vadd.f32 %v1413_v49, %v5949_v58 }
 0x288   : > { %v2432_v21 = vpop.f32.mrf.mxu0 }
 0x289   : > { %v1502_v23 = vpop.f32.mrf.mxu3  ;;  %v2433_v59 = vadd.f32 %v2432_v21, %v5940_v57  ;;  %v2521_v6 = vpop.f32.mrf.mxu1 }
 0x28a   : > { %v1503_v41 = vadd.f32 %v1502_v23, %v1414_v48 }
 0x28b   : > { %v6014_v34 = vadd.f32 %v2521_v6, %v2433_v59  ;;  %1455 = vmatmul.bf16.gmra.mxu2 %v6911_v54  ;;  %2471 = vmatmul.bf16.gmra.mxu0 %v6912_v22 }
 0x28c   : > { %vm1593_vm13 = vcmp.ge.f32.partialorder %v1503_v41, 0.0  ;;  %v1721_v19 = vmul.f32 0.2, %v1503_v41  ;;  %2560 = vmatmul.bf16.gmra.mxu1 %v5854_v16 }
 0x28d   : > { %6910 = vst [vmem:[#allocation15_spill] sm:$0xff] %v6014_v34  ;;  %v4271_v34 = vld [vmem:[#allocation7 + $0x58] sm:$0xf0] }
 0x28e   : > { %1544 = vmatmul.bf16.gmra.mxu3 %v6913_v47  ;;  %v1849_v25 = vsel %vm1593_vm13, %v1503_v41, %v1721_v19  ;;  %v1416_v51 = vpop.f32.mrf.mxu2  ;;  %v1924_v47 = vsel %vm1668_vm14, %v5845_v46, %v1796_v7  ;;  %v4625_v19 = vld [vmem:[#allocation7 + $0x54] sm:$0xf] }
 0x28f   : > { %v6024_v49 = vpack.c.bf16 %v1849_v25, %v1845_v30  ;;  %v1417_v48 = vadd.f32 %v1416_v51, %v5949_v58  ;;  %v6030_v26 = vpack.c.bf16 %v1928_v38, %v1924_v47  ;;  %v4641_v30 = vld [vmem:[#allocation7 + $0xd4] sm:$0xf]  ;;  %v4335_v25 = vld [vmem:[#allocation7 + $0xd8] sm:$0xf0]  ;;  %v4274_v16 = vor.u32 %v4625_v19, %v4271_v34  ;;  %v6917_v34 = vld [vmem:[#allocation18_spill] sm:$0xff] }
 0x290   : > { %v2434_v21 = vpop.f32.mrf.mxu0  ;;  %v4338_v51 = vor.u32 %v4641_v30, %v4335_v25  ;;  %v6918_v38 = vld [vmem:[#allocation36_spill] sm:$0xff]  ;;  %v4648_v19 = vld [vmem:[#allocation7 + $0x104] sm:$0xf0]  ;;  %v4421_v30 = vld [vmem:[#allocation7 + $0x180] sm:$0xf] }
 0x291   : > { %6914 = vst [vmem:[#allocation16_spill] sm:$0xff] %v6024_v49  ;;  %v1505_v23 = vpop.f32.mrf.mxu3  ;;  %v2435_v6 = vadd.f32 %v2434_v21, %v5940_v57  ;;  %v2523_v54 = vpop.f32.mrf.mxu1  ;;  %2766 = vmatpush.bf16.msrb.mxu0 %v4274_v16  ;;  %v4357_v16 = vld [vmem:[#allocation7 + $0x100] sm:$0xf]  ;;  %v1808_v25 = vmul.f32 0.2, %v5887_v17 }
 0x292   : > { %v1506_v59 = vadd.f32 %v1505_v23, %v1417_v48  ;;  %6915 = vst [vmem:[#allocation17_spill] sm:$0xff] %v6030_v26  ;;  %2855 = vmatpush.bf16.msrb.mxu1 %v4338_v51  ;;  %v4358_v51 = vor.u32 %v4648_v19, %v4357_v16 }
 0x293   : > { %v6032_v41 = vadd.f32 %v2523_v54, %v2435_v6  ;;  %v1804_v6 = vmul.f32 0.2, %v5869_v61 }
 0x294   : > { %v1725_v46 = vmul.f32 0.2, %v1506_v59  ;;  %vm1597_vm0 = vcmp.ge.f32.partialorder %v1506_v59, 0.0  ;;  %2593 = vmatpush.bf16.msrb.mxu2 %v4358_v51 }
 0x296   : > { %v1418_v22 = vpop.f32.mrf.mxu2 }
 0x297   : > { %v1419_v48 = vadd.f32 %v1418_v22, %v5949_v58  ;;  %v6919_v22 = vld [vmem:[#allocation19_spill] sm:$0xff] }
 0x298   : > { %v2437_v21 = vpop.f32.mrf.mxu0 }
 0x299   : > { %v1507_v23 = vpop.f32.mrf.mxu3  ;;  %v2438_v42 = vadd.f32 %v2437_v21, %v5940_v57  ;;  %v2526_v13 = vpop.f32.mrf.mxu1 }
 0x29a   : > { %v1508_v7 = vadd.f32 %v1507_v23, %v1419_v48  ;;  %v4664_v48 = vld [vmem:[#allocation7 + $0x184] sm:$0xf0]  ;;  %v1853_v23 = vsel %vm1597_vm0, %v1506_v59, %v1725_v46  ;;  %v1932_v59 = vsel %vm1676_vm2, %v5869_v61, %v1804_v6  ;;  %v1936_v46 = vsel %vm1680_vm3, %v5887_v17, %v1808_v25  ;;  %v4621_v25 = vld [vmem:[#allocation7 + $0x34] sm:$0xf] }
 0x29b   : > { %v6037_v47 = vadd.f32 %v2526_v13, %v2438_v42  ;;  %1460 = vmatmul.bf16.gmra.mxu2 %v6917_v34  ;;  %2476 = vmatmul.bf16.gmra.mxu0 %v6918_v38  ;;  %v4422_v13 = vor.u32 %v4664_v48, %v4421_v30  ;;  %v4623_v48 = vld [vmem:[#allocation7 + $0x44] sm:$0xf] }
 0x29c   : > { %vm1601_vm1 = vcmp.ge.f32.partialorder %v1508_v7, 0.0  ;;  %v1729_v54 = vmul.f32 0.2, %v1508_v7  ;;  %2565 = vmatmul.bf16.gmra.mxu1 %v5879_v10 }
 0x29d   : > { %6916 = vst [vmem:[#allocation48_spill] sm:$0xff] %v6037_v47  ;;  %2682 = vmatpush.bf16.msrb.mxu3 %v4422_v13 }
 0x29e   : > { %1549 = vmatmul.bf16.gmra.mxu3 %v6919_v22  ;;  %v1857_v21 = vsel %vm1601_vm1, %v1508_v7, %v1729_v54  ;;  %v1421_v42 = vpop.f32.mrf.mxu2  ;;  %v6052_v7 = vpack.c.bf16 %v1936_v46, %v1932_v59 }
 0x29f   : > { %v6046_v34 = vpack.c.bf16 %v1857_v21, %v1853_v23  ;;  %v1422_v22 = vadd.f32 %v1421_v42, %v5949_v58  ;;  %v4263_v23 = vld [vmem:[#allocation7 + $0x48] sm:$0xf0]  ;;  %v4639_v21 = vld [vmem:[#allocation7 + $0xc4] sm:$0xf] }
 0x2a0   : > { %v2439_v10 = vpop.f32.mrf.mxu0  ;;  %6920 = vst [vmem:[#allocation18_spill] sm:$0xff] %v6052_v7  ;;  %v4266_v13 = vor.u32 %v4623_v48, %v4263_v23  ;;  %v6923_v48 = vld [vmem:[#allocation37_spill] sm:$0xff] }
 0x2a1   : > { %v1510_v47 = vpop.f32.mrf.mxu3  ;;  %v2440_v16 = vadd.f32 %v2439_v10, %v5940_v57  ;;  %v2528_v19 = vpop.f32.mrf.mxu1 }
 0x2a2   : > { %v1511_v38 = vadd.f32 %v1510_v47, %v1422_v22  ;;  %v4327_v47 = vld [vmem:[#allocation7 + $0xc8] sm:$0xf0]  ;;  %2767 = vmatpush.bf16.msrb.mxu0 %v4266_v13 }
 0x2a3   : > { %v6054_v54 = vadd.f32 %v2528_v19, %v2440_v16  ;;  %v4330_v10 = vor.u32 %v4639_v21, %v4327_v47  ;;  %v4255_v16 = vld [vmem:[#allocation7 + $0x38] sm:$0xf0]  ;;  %v4637_v19 = vld [vmem:[#allocation7 + $0xb4] sm:$0xf]  ;;  %v1816_v47 = vmul.f32 0.2, %v5913_v8 }
 0x2a4   : > { %vm1605_vm4 = vcmp.ge.f32.partialorder %v1511_v38, 0.0  ;;  %v1733_v26 = vmul.f32 0.2, %v1511_v38  ;;  %v4258_v23 = vor.u32 %v4621_v25, %v4255_v16  ;;  %v4319_v21 = vld [vmem:[#allocation7 + $0xb8] sm:$0xf0] }
 0x2a5   : > { %2856 = vmatpush.bf16.msrb.mxu1 %v4330_v10  ;;  %v4322_v13 = vor.u32 %v4637_v19, %v4319_v21  ;;  %v4247_v25 = vld [vmem:[#allocation7 + $0x28] sm:$0xf0]  ;;  %v4635_v16 = vld [vmem:[#allocation7 + $0xa4] sm:$0xf] }
 0x2a6   : > { %v1423_v30 = vpop.f32.mrf.mxu2  ;;  %2768 = vmatpush.bf16.msrb.mxu0 %v4258_v23  ;;  %v4311_v21 = vld [vmem:[#allocation7 + $0xa8] sm:$0xf0] }
 0x2a7   : > { %v1424_v51 = vadd.f32 %v1423_v30, %v5949_v58  ;;  %v6922_v30 = vld [vmem:[#allocation21_spill] sm:$0xff] }
 0x2a8   : > { %v2442_v22 = vpop.f32.mrf.mxu0 }
 0x2a9   : > { %v1512_v42 = vpop.f32.mrf.mxu3  ;;  %v2443_v17 = vadd.f32 %v2442_v22, %v5940_v57  ;;  %v2531_v6 = vpop.f32.mrf.mxu1  ;;  %v1861_v22 = vsel %vm1605_vm4, %v1511_v38, %v1733_v26  ;;  %2857 = vmatpush.bf16.msrb.mxu1 %v4322_v13  ;;  %v4239_v13 = vld [vmem:[#allocation7 + $0x18] sm:$0xf0] }
 0x2aa   : > { %v1513_v61 = vadd.f32 %v1512_v42, %v1424_v51  ;;  %v1812_v51 = vmul.f32 0.2, %v5892_v52  ;;  %v6924_v42 = vld [vmem:[#allocation23_spill] sm:$0xff] }
 0x2ab   : > { %v6058_v46 = vadd.f32 %v2531_v6, %v2443_v17  ;;  %1465 = vmatmul.bf16.gmra.mxu2 %v6922_v30  ;;  %2481 = vmatmul.bf16.gmra.mxu0 %v6923_v48  ;;  %v4619_v6 = vld [vmem:[#allocation7 + $0x24] sm:$0xf]  ;;  %v4314_v48 = vor.u32 %v4635_v16, %v4311_v21 }
 0x2ac   : > { %vm1609_vm5 = vcmp.ge.f32.partialorder %v1513_v61, 0.0  ;;  %v1737_v59 = vmul.f32 0.2, %v1513_v61  ;;  %2570 = vmatmul.bf16.gmra.mxu1 %v5904_v12  ;;  %v4250_v19 = vor.u32 %v4619_v6, %v4247_v25  ;;  %v1940_v38 = vsel %vm1684_vm6, %v5892_v52, %v1812_v51  ;;  %v4615_v16 = vld [vmem:[#allocation7 + $0x4] sm:$0xf] }
 0x2ad   : > { %6921 = vst [vmem:[#allocation19_spill] sm:$0xff] %v6058_v46  ;;  %2858 = vmatpush.bf16.msrb.mxu1 %v4314_v48  ;;  %v4231_v52 = vld [vmem:[#allocation7 + $0x8] sm:$0xf0]  ;;  %v4631_v51 = vld [vmem:[#allocation7 + $0x84] sm:$0xf] }
 0x2ae   : > { %1554 = vmatmul.bf16.gmra.mxu3 %v6924_v42  ;;  %v1865_v10 = vsel %vm1609_vm5, %v1513_v61, %v1737_v59  ;;  %v1426_v17 = vpop.f32.mrf.mxu2  ;;  %2769 = vmatpush.bf16.msrb.mxu0 %v4250_v19  ;;  %v1944_v61 = vsel %vm1688_vm7, %v5913_v8, %v1816_v47  ;;  %v4617_v59 = vld [vmem:[#allocation7 + $0x14] sm:$0xf]  ;;  %v4234_v48 = vor.u32 %v4615_v16, %v4231_v52  ;;  %v4295_v47 = vld [vmem:[#allocation7 + $0x88] sm:$0xf0]  ;;  %v4415_v16 = vld [vmem:[#allocation7 + $0x178] sm:$0xf0] }
 0x2af   : > { %v6070_v30 = vpack.c.bf16 %v1865_v10, %v1861_v22  ;;  %v1427_v42 = vadd.f32 %v1426_v17, %v5949_v58  ;;  %v4633_v22 = vld [vmem:[#allocation7 + $0x94] sm:$0xf]  ;;  %v6080_v10 = vpack.c.bf16 %v1944_v61, %v1940_v38  ;;  %v4298_v21 = vor.u32 %v4631_v51, %v4295_v47 }
 0x2b0   : > { %v2444_v12 = vpop.f32.mrf.mxu0  ;;  %v4677_v52 = vld [vmem:[#allocation7 + $0x1f4] sm:$0xf]  ;;  %v1824_v51 = vmul.f32 0.2, %v5938_v45 }
 0x2b1   : > { %6925 = vst [vmem:[#allocation21_spill] sm:$0xff] %v6070_v30  ;;  %v1515_v46 = vpop.f32.mrf.mxu3  ;;  %v2445_v23 = vadd.f32 %v2444_v12, %v5940_v57  ;;  %v2533_v26 = vpop.f32.mrf.mxu1  ;;  %v4303_v12 = vld [vmem:[#allocation7 + $0x98] sm:$0xf0] }
 0x2b2   : > { %v1516_v7 = vadd.f32 %v1515_v46, %v1427_v42  ;;  %v4242_v46 = vor.u32 %v4617_v59, %v4239_v13  ;;  %v4306_v6 = vor.u32 %v4633_v22, %v4303_v12  ;;  %v1820_v59 = vmul.f32 0.2, %v5917_v1  ;;  %v6928_v12 = vld [vmem:[#allocation38_spill] sm:$0xff] }
 0x2b3   : > { %v6082_v17 = vadd.f32 %v2533_v26, %v2445_v23 }
 0x2b4   : > { %2770 = vmatpush.bf16.msrb.mxu0 %v4242_v46  ;;  %2859 = vmatpush.bf16.msrb.mxu1 %v4306_v6  ;;  %v1741_v38 = vmul.f32 0.2, %v1516_v7  ;;  %vm1613_vm8 = vcmp.ge.f32.partialorder %v1516_v7, 0.0  ;;  %v6927_v46 = vld [vmem:[#allocation25_spill] sm:$0xff]  ;;  %v6929_v6 = vld [vmem:[#allocation27_spill] sm:$0xff] }
 0x2b6   : > { %v1428_v25 = vpop.f32.mrf.mxu2 }
 0x2b7   : > { %v1429_v42 = vadd.f32 %v1428_v25, %v5949_v58  ;;  %v4661_v25 = vld [vmem:[#allocation7 + $0x174] sm:$0xf] }
 0x2b8   : > { %v2447_v19 = vpop.f32.mrf.mxu0  ;;  %2771 = vmatpush.bf16.msrb.mxu0 %v4234_v48  ;;  %2860 = vmatpush.bf16.msrb.mxu1 %v4298_v21  ;;  %v1869_v48 = vsel %vm1613_vm8, %v1516_v7, %v1741_v38  ;;  %v1948_v7 = vsel %vm1692_vm10, %v5917_v1, %v1820_v59  ;;  %v1952_v38 = vsel %vm1696_vm11, %v5938_v45, %v1824_v51  ;;  %v6932_v45 = vld [vmem:[#allocation39_spill] sm:$0xff]  ;;  %v6933_v59 = vld [vmem:[#allocation30_spill] sm:$0xff] }
 0x2b9   : > { %v1517_v8 = vpop.f32.mrf.mxu3  ;;  %v2448_v23 = vadd.f32 %v2447_v19, %v5940_v57  ;;  %v2536_v26 = vpop.f32.mrf.mxu1 }
 0x2ba   : > { %v1518_v61 = vadd.f32 %v1517_v8, %v1429_v42  ;;  %v4418_v42 = vor.u32 %v4661_v25, %v4415_v16  ;;  %v4479_v8 = vld [vmem:[#allocation7 + $0x1f8] sm:$0xf0] }
 0x2bb   : > { %v6087_v22 = vadd.f32 %v2536_v26, %v2448_v23  ;;  %1470 = vmatmul.bf16.gmra.mxu2 %v6927_v46  ;;  %2486 = vmatmul.bf16.gmra.mxu0 %v6928_v12  ;;  %v4482_v21 = vor.u32 %v4677_v52, %v4479_v8 }
 0x2bc   : > { %vm1617_vm9 = vcmp.ge.f32.partialorder %v1518_v61, 0.0  ;;  %v1745_v13 = vmul.f32 0.2, %v1518_v61  ;;  %2575 = vmatmul.bf16.gmra.mxu1 %v5927_v31  ;;  %2942 = vmatpush.bf16.msra.mxu2 %v4418_v42 }
 0x2bd   : > { %6926 = vst [vmem:[#allocation23_spill] sm:$0xff] %v6087_v22  ;;  %3031 = vmatpush.bf16.msra.mxu3 %v4482_v21 }
 0x2be   : > { %1559 = vmatmul.bf16.gmra.mxu3 %v6929_v6  ;;  %v1873_v47 = vsel %vm1617_vm9, %v1518_v61, %v1745_v13  ;;  %v1431_v19 = vpop.f32.mrf.mxu2  ;;  %v6103_v61 = vpack.c.bf16 %v1952_v38, %v1948_v7 }
 0x2bf   : > { %v6097_v23 = vpack.c.bf16 %v1873_v47, %v1869_v48  ;;  %v1432_v26 = vadd.f32 %v1431_v19, %v5949_v58 }
 0x2c0   : > { %v2449_v6 = vpop.f32.mrf.mxu0  ;;  %6930 = vst [vmem:[#allocation25_spill] sm:$0xff] %v6103_v61 }
 0x2c1   : > { %v1520_v46 = vpop.f32.mrf.mxu3  ;;  %v2450_v25 = vadd.f32 %v2449_v6, %v5940_v57  ;;  %v2538_v16 = vpop.f32.mrf.mxu1 }
 0x2c2   : > { %v1521_v22 = vadd.f32 %v1520_v46, %v1432_v26 }
 0x2c3   : > { %v6105_v13 = vadd.f32 %v2538_v16, %v2450_v25 }
 0x2c4   : > { %v1749_v42 = vmul.f32 0.2, %v1521_v22  ;;  %vm1621_vm12 = vcmp.ge.f32.partialorder %v1521_v22, 0.0 }
 0x2c6   : > { %v1433_v52 = vpop.f32.mrf.mxu2  ;;  %v1877_v51 = vsel %vm1621_vm12, %v1521_v22, %v1749_v42 }
 0x2c7   : > { %v1434_v8 = vadd.f32 %v1433_v52, %v5949_v58 }
 0x2c8   : > { %v2452_v47 = vpop.f32.mrf.mxu0 }
 0x2c9   : > { %v1522_v48 = vpop.f32.mrf.mxu3  ;;  %v2453_v21 = vadd.f32 %v2452_v47, %v5940_v57  ;;  %v2541_v26 = vpop.f32.mrf.mxu1 }
 0x2ca   : > { %v1523_v19 = vadd.f32 %v1522_v48, %v1434_v8 }
 0x2cb   : > { %v6109_v1 = vadd.f32 %v2541_v26, %v2453_v21  ;;  %1475 = vmatmul.bf16.gmra.mxu2 %v5443_v39  ;;  %2491 = vmatmul.bf16.gmra.mxu0 %v6932_v45 }
 0x2cc   : > { %vm1625_vm13 = vcmp.ge.f32.partialorder %v1523_v19, 0.0  ;;  %v1753_v46 = vmul.f32 0.2, %v1523_v19  ;;  %2580 = vmatmul.bf16.gmra.mxu1 %v5958_v5 }
 0x2cd   : > { %6931 = vst [vmem:[#allocation38_spill] sm:$0xff] %v6109_v1 }
 0x2ce   : > { %1564 = vmatmul.bf16.gmra.mxu3 %v6933_v59  ;;  %v1881_v6 = vsel %vm1625_vm13, %v1523_v19, %v1753_v46  ;;  %v1436_v25 = vpop.f32.mrf.mxu2 }
 0x2cf   : > { %v6115_v16 = vpack.c.bf16 %v1881_v6, %v1877_v51  ;;  %v1437_v7 = vadd.f32 %v1436_v25, %v5949_v58  ;;  %v6937_v25 = vld [vmem:[#allocation40_spill] sm:$0xff] }
 0x2d0   : > { %v2454_v52 = vpop.f32.mrf.mxu0 }
 0x2d1   : > { %6934 = vst [vmem:[#allocation27_spill] sm:$0xff] %v6115_v16  ;;  %v1525_v38 = vpop.f32.mrf.mxu3  ;;  %v2455_v48 = vadd.f32 %v2454_v52, %v5940_v57  ;;  %v2543_v47 = vpop.f32.mrf.mxu1  ;;  %v4659_v52 = vld [vmem:[#allocation7 + $0x164] sm:$0xf] }
 0x2d2   : > { %v1526_v8 = vadd.f32 %v1525_v38, %v1437_v7  ;;  %v6938_v7 = vld [vmem:[#allocation31_spill] sm:$0xff]  ;;  %v6939_v38 = vld [vmem:[#allocation41_spill] sm:$0xff] }
 0x2d3   : > { %v6119_v39 = vadd.f32 %v2543_v47, %v2455_v48  ;;  %v4407_v48 = vld [vmem:[#allocation7 + $0x168] sm:$0xf0]  ;;  %v4675_v47 = vld [vmem:[#allocation7 + $0x1e4] sm:$0xf] }
 0x2d4   : > { %v1757_v22 = vmul.f32 0.2, %v1526_v8  ;;  %vm1629_vm14 = vcmp.ge.f32.partialorder %v1526_v8, 0.0 }
 0x2d5   : > { %6935 = vst [vmem:[#allocation30_spill] sm:$0xff] %v6119_v39 }
 0x2d6   : > { %v1438_v21 = vpop.f32.mrf.mxu2 }
 0x2d7   : > { %v1439_v26 = vadd.f32 %v1438_v21, %v5949_v58  ;;  %v4410_v21 = vor.u32 %v4659_v52, %v4407_v48 }
 0x2d8   : > { %v2457_v1 = vpop.f32.mrf.mxu0 }
 0x2d9   : > { %v1527_v59 = vpop.f32.mrf.mxu3  ;;  %v2458_v19 = vadd.f32 %v2457_v1, %v5940_v57  ;;  %v2546_v46 = vpop.f32.mrf.mxu1  ;;  %v1885_v1 = vsel %vm1629_vm14, %v1526_v8, %v1757_v22  ;;  %2943 = vmatpush.bf16.msra.mxu2 %v4410_v21 }
 0x2da   : > { %v1528_v42 = vadd.f32 %v1527_v59, %v1439_v26  ;;  %v4471_v26 = vld [vmem:[#allocation7 + $0x1e8] sm:$0xf0] }
 0x2db   : > { %v6123_v6 = vadd.f32 %v2546_v46, %v2458_v19  ;;  %2594 = vmatmul.bf16.vlgmr.msrb.gmra.mxu2 %v6937_v25  ;;  %2772 = vmatmul.bf16.vlgmr.msrb.gmra.mxu0 %v6938_v7  ;;  %v4474_v5 = vor.u32 %v4675_v47, %v4471_v26 }
 0x2dc   : > { %vm1633_vm15 = vcmp.ge.f32.partialorder %v1528_v42, 0.0  ;;  %v1761_v51 = vmul.f32 0.2, %v1528_v42  ;;  %2861 = vmatmul.bf16.vlgmr.msrb.gmra.mxu1 %v6939_v38 }
 0x2dd   : > { %6936 = vst [vmem:[#allocation49_spill] sm:$0xff] %v6123_v6  ;;  %3032 = vmatpush.bf16.msra.mxu3 %v4474_v5 }
 0x2de   : > { %2683 = vmatmul.bf16.vlgmr.msrb.gmra.mxu3 %v5980_v18  ;;  %v1889_v59 = vsel %vm1633_vm15, %v1528_v42, %v1761_v51  ;;  %v1441_v39 = vpop.f32.mrf.mxu2 }
 0x2df   : > { %v6129_v45 = vpack.c.bf16 %v1889_v59, %v1885_v1  ;;  %v1442_v19 = vadd.f32 %v1441_v39, %v5949_v58 }
 0x2e0   : > { %v2459_v7 = vpop.f32.mrf.mxu0 }
 0x2e1   : > { %6940 = vst [vmem:[#allocation31_spill] sm:$0xff] %v6129_v45  ;;  %v1530_v46 = vpop.f32.mrf.mxu3  ;;  %v2460_v38 = vadd.f32 %v2459_v7, %v5940_v57  ;;  %v2548_v18 = vpop.f32.mrf.mxu1 }
 0x2e2   : > { %v1531_v6 = vadd.f32 %v1530_v46, %v1442_v19 }
 0x2e3   : > { %v6133_v25 = vadd.f32 %v2548_v18, %v2460_v38 }
 0x2e4   : > { %v1765_v51 = vmul.f32 0.2, %v1531_v6  ;;  %vm1637_vm0 = vcmp.ge.f32.partialorder %v1531_v6, 0.0 }
 0x2e6   : > { %v1443_v52 = vpop.f32.mrf.mxu2  ;;  %v1893_v18 = vsel %vm1637_vm0, %v1531_v6, %v1765_v51 }
 0x2e7   : > { %v1444_v8 = vadd.f32 %v1443_v52, %v5949_v58 }
 0x2e8   : > { %v2462_v42 = vpop.f32.mrf.mxu0 }
 0x2e9   : > { %v1532_v22 = vpop.f32.mrf.mxu3  ;;  %v2463_v47 = vadd.f32 %v2462_v42, %v5940_v57  ;;  %v2551_v39 = vpop.f32.mrf.mxu1 }
 0x2ea   : > { %v1533_v48 = vadd.f32 %v1532_v22, %v1444_v8 }
 0x2eb   : > { %v6137_v5 = vadd.f32 %v2551_v39, %v2463_v47  ;;  %2599 = vmatmul.bf16.gmra.mxu2 %v5773_v35  ;;  %2777 = vmatmul.bf16.gmra.mxu0 %v5589_v20 }
 0x2ec   : > { %vm1641_vm1 = vcmp.ge.f32.partialorder %v1533_v48, 0.0  ;;  %v1769_v21 = vmul.f32 0.2, %v1533_v48  ;;  %2866 = vmatmul.bf16.gmra.mxu1 %v5626_v27 }
 0x2ee   : > { %2688 = vmatmul.bf16.gmra.mxu3 %v6002_v4  ;;  %v1897_v26 = vsel %vm1641_vm1, %v1533_v48, %v1769_v21  ;;  %v1446_v1 = vpop.f32.mrf.mxu2 }
 0x2ef   : > { %v6143_v59 = vpack.c.bf16 %v1897_v26, %v1893_v18  ;;  %v1447_v19 = vadd.f32 %v1446_v1, %v5949_v58  ;;  %v4657_v26 = vld [vmem:[#allocation7 + $0x154] sm:$0xf]  ;;  %v4399_v1 = vld [vmem:[#allocation7 + $0x158] sm:$0xf0] }
 0x2f0   : > { %v2464_v7 = vpop.f32.mrf.mxu0 }
 0x2f1   : > { %6941 = vst [vmem:[#allocation41_spill] sm:$0xff] %v6143_v59  ;;  %v1535_v46 = vpop.f32.mrf.mxu3  ;;  %v2465_v52 = vadd.f32 %v2464_v7, %v5940_v57  ;;  %v2553_v8 = vpop.f32.mrf.mxu1  ;;  %v4463_v7 = vld [vmem:[#allocation7 + $0x1d8] sm:$0xf0] }
 0x2f2   : > { %v1536_v38 = vadd.f32 %v1535_v46, %v1447_v19  ;;  %v4673_v19 = vld [vmem:[#allocation7 + $0x1d4] sm:$0xf]  ;;  %v4402_v46 = vor.u32 %v4657_v26, %v4399_v1 }
 0x2f3   : > { %v6147_v22 = vadd.f32 %v2553_v8, %v2465_v52 }
 0x2f4   : > { %v1773_v6 = vmul.f32 0.2, %v1536_v38  ;;  %vm1645_vm2 = vcmp.ge.f32.partialorder %v1536_v38, 0.0  ;;  %2944 = vmatpush.bf16.msra.mxu2 %v4402_v46 }
 0x2f6   : > { %v1448_v20 = vpop.f32.mrf.mxu2  ;;  %v1901_v52 = vsel %vm1645_vm2, %v1536_v38, %v1773_v6 }
 0x2f7   : > { %v1449_v42 = vadd.f32 %v1448_v20, %v5949_v58 }
 0x2f8   : > { %v2467_v27 = vpop.f32.mrf.mxu0 }
 0x2f9   : > { %v1537_v47 = vpop.f32.mrf.mxu3  ;;  %v2468_v48 = vadd.f32 %v2467_v27, %v5940_v57  ;;  %v2556_v39 = vpop.f32.mrf.mxu1 }
 0x2fa   : > { %v1538_v51 = vadd.f32 %v1537_v47, %v1449_v42  ;;  %v4466_v42 = vor.u32 %v4673_v19, %v4463_v7 }
 0x2fb   : > { %v6151_v18 = vadd.f32 %v2556_v39, %v2468_v48  ;;  %2604 = vmatmul.bf16.gmra.mxu2 %v5793_v62  ;;  %2782 = vmatmul.bf16.gmra.mxu0 %v5611_v3 }
 0x2fc   : > { %vm1649_vm3 = vcmp.ge.f32.partialorder %v1538_v51, 0.0  ;;  %v1777_v21 = vmul.f32 0.2, %v1538_v51  ;;  %2871 = vmatmul.bf16.gmra.mxu1 %v5651_v36  ;;  %3033 = vmatpush.bf16.msra.mxu3 %v4466_v42 }
 0x2fd   : > { %6942 = vst [vmem:[#allocation50_spill] sm:$0xff] %v6151_v18 }
 0x2fe   : > { %2693 = vmatmul.bf16.gmra.mxu3 %v6024_v49  ;;  %v1905_v8 = vsel %vm1649_vm3, %v1538_v51, %v1777_v21  ;;  %v1451_v20 = vpop.f32.mrf.mxu2 }
 0x2ff   : > { %v6157_v47 = vpack.c.bf16 %v1905_v8, %v1901_v52  ;;  %v1452_v27 = vadd.f32 %v1451_v20, %v5949_v58 }
 0x300   : > { %v2469_v3 = vpop.f32.mrf.mxu0 }
 0x301   : > { %v1540_v48 = vpop.f32.mrf.mxu3  ;;  %v2470_v36 = vadd.f32 %v2469_v3, %v5940_v57  ;;  %v2558_v18 = vpop.f32.mrf.mxu1 }
 0x302   : > { %v1541_v39 = vadd.f32 %v1540_v48, %v1452_v27 }
 0x303   : > { %v6161_v49 = vadd.f32 %v2558_v18, %v2470_v36 }
 0x304   : > { %v1781_v21 = vmul.f32 0.2, %v1541_v39  ;;  %vm1653_vm4 = vcmp.ge.f32.partialorder %v1541_v39, 0.0 }
 0x306   : > { %v1453_v26 = vpop.f32.mrf.mxu2  ;;  %v1909_v18 = vsel %vm1653_vm4, %v1541_v39, %v1781_v21 }
 0x307   : > { %v1454_v38 = vadd.f32 %v1453_v26, %v5949_v58 }
 0x308   : > { %v2472_v51 = vpop.f32.mrf.mxu0 }
 0x309   : > { %v1542_v6 = vpop.f32.mrf.mxu3  ;;  %v2473_v19 = vadd.f32 %v2472_v51, %v5940_v57  ;;  %v2561_v7 = vpop.f32.mrf.mxu1 }
 0x30a   : > { %v1543_v1 = vadd.f32 %v1542_v6, %v1454_v38 }
 0x30b   : > { %v6165_v52 = vadd.f32 %v2561_v7, %v2473_v19  ;;  %2609 = vmatmul.bf16.gmra.mxu2 %v5819_v56  ;;  %2787 = vmatmul.bf16.gmra.mxu0 %v5637_v44 }
 0x30c   : > { %vm1657_vm5 = vcmp.ge.f32.partialorder %v1543_v1, 0.0  ;;  %v1785_v46 = vmul.f32 0.2, %v1543_v1  ;;  %2876 = vmatmul.bf16.gmra.mxu1 %v5672_v0 }
 0x30e   : > { %2698 = vmatmul.bf16.gmra.mxu3 %v6046_v34  ;;  %v1913_v8 = vsel %vm1657_vm5, %v1543_v1, %v1785_v46  ;;  %v1456_v20 = vpop.f32.mrf.mxu2 }
 0x30f   : > { %v6171_v42 = vpack.c.bf16 %v1913_v8, %v1909_v18  ;;  %v1457_v27 = vadd.f32 %v1456_v20, %v5949_v58  ;;  %v4655_v8 = vld [vmem:[#allocation7 + $0x144] sm:$0xf]  ;;  %v4391_v20 = vld [vmem:[#allocation7 + $0x148] sm:$0xf0] }
 0x310   : > { %v2474_v3 = vpop.f32.mrf.mxu0 }
 0x311   : > { %v1545_v48 = vpop.f32.mrf.mxu3  ;;  %v2475_v26 = vadd.f32 %v2474_v3, %v5940_v57  ;;  %v2563_v38 = vpop.f32.mrf.mxu1  ;;  %v4455_v3 = vld [vmem:[#allocation7 + $0x1c8] sm:$0xf0] }
 0x312   : > { %v1546_v36 = vadd.f32 %v1545_v48, %v1457_v27  ;;  %v4671_v27 = vld [vmem:[#allocation7 + $0x1c4] sm:$0xf]  ;;  %v4394_v48 = vor.u32 %v4655_v8, %v4391_v20 }
 0x313   : > { %v6175_v6 = vadd.f32 %v2563_v38, %v2475_v26 }
 0x314   : > { %v1789_v39 = vmul.f32 0.2, %v1546_v36  ;;  %vm1661_vm6 = vcmp.ge.f32.partialorder %v1546_v36, 0.0  ;;  %2945 = vmatpush.bf16.msra.mxu2 %v4394_v48 }
 0x316   : > { %v1458_v44 = vpop.f32.mrf.mxu2  ;;  %v1917_v26 = vsel %vm1661_vm6, %v1546_v36, %v1789_v39 }
 0x317   : > { %v1459_v51 = vadd.f32 %v1458_v44, %v5949_v58 }
 0x318   : > { %v2477_v0 = vpop.f32.mrf.mxu0 }
 0x319   : > { %v1547_v19 = vpop.f32.mrf.mxu3  ;;  %v2478_v1 = vadd.f32 %v2477_v0, %v5940_v57  ;;  %v2566_v7 = vpop.f32.mrf.mxu1 }
 0x31a   : > { %v1548_v21 = vadd.f32 %v1547_v19, %v1459_v51  ;;  %v4458_v51 = vor.u32 %v4671_v27, %v4455_v3 }
 0x31b   : > { %v6179_v18 = vadd.f32 %v2566_v7, %v2478_v1  ;;  %2614 = vmatmul.bf16.gmra.mxu2 %v5839_v33  ;;  %2792 = vmatmul.bf16.gmra.mxu0 %v5657_v50 }
 0x31c   : > { %vm1665_vm7 = vcmp.ge.f32.partialorder %v1548_v21, 0.0  ;;  %v1793_v46 = vmul.f32 0.2, %v1548_v21  ;;  %2881 = vmatmul.bf16.gmra.mxu1 %v5699_v29  ;;  %3034 = vmatpush.bf16.msra.mxu3 %v4458_v51 }
 0x31d   : > { %6943 = vst [vmem:[#allocation51_spill] sm:$0xff] %v6179_v18 }
 0x31e   : > { %2703 = vmatmul.bf16.gmra.mxu3 %v6070_v30  ;;  %v1921_v38 = vsel %vm1665_vm7, %v1548_v21, %v1793_v46  ;;  %v1461_v44 = vpop.f32.mrf.mxu2 }
 0x31f   : > { %v6185_v19 = vpack.c.bf16 %v1921_v38, %v1917_v26  ;;  %v1462_v0 = vadd.f32 %v1461_v44, %v5949_v58 }
 0x320   : > { %v2479_v50 = vpop.f32.mrf.mxu0 }
 0x321   : > { %6944 = vst [vmem:[#allocation52_spill] sm:$0xff] %v6185_v19  ;;  %v1550_v1 = vpop.f32.mrf.mxu3  ;;  %v2480_v29 = vadd.f32 %v2479_v50, %v5940_v57  ;;  %v2568_v18 = vpop.f32.mrf.mxu1 }
 0x322   : > { %v1551_v7 = vadd.f32 %v1550_v1, %v1462_v0 }
 0x323   : > { %v6189_v30 = vadd.f32 %v2568_v18, %v2480_v29 }
 0x324   : > { %v1797_v46 = vmul.f32 0.2, %v1551_v7  ;;  %vm1669_vm8 = vcmp.ge.f32.partialorder %v1551_v7, 0.0 }
 0x326   : > { %v1463_v8 = vpop.f32.mrf.mxu2  ;;  %v1925_v18 = vsel %vm1669_vm8, %v1551_v7, %v1797_v46 }
 0x327   : > { %v1464_v36 = vadd.f32 %v1463_v8, %v5949_v58 }
 0x328   : > { %v2482_v21 = vpop.f32.mrf.mxu0 }
 0x329   : > { %v1552_v39 = vpop.f32.mrf.mxu3  ;;  %v2483_v27 = vadd.f32 %v2482_v21, %v5940_v57  ;;  %v2571_v3 = vpop.f32.mrf.mxu1 }
 0x32a   : > { %v1553_v20 = vadd.f32 %v1552_v39, %v1464_v36 }
 0x32b   : > { %v6193_v26 = vadd.f32 %v2571_v3, %v2483_v27  ;;  %2619 = vmatmul.bf16.gmra.mxu2 %v5865_v55  ;;  %2797 = vmatmul.bf16.gmra.mxu0 %v5683_v2 }
 0x32c   : > { %vm1673_vm9 = vcmp.ge.f32.partialorder %v1553_v20, 0.0  ;;  %v1801_v48 = vmul.f32 0.2, %v1553_v20  ;;  %2886 = vmatmul.bf16.gmra.mxu1 %v5724_v28 }
 0x32e   : > { %2708 = vmatmul.bf16.gmra.mxu3 %v6097_v23  ;;  %v1929_v38 = vsel %vm1673_vm9, %v1553_v20, %v1801_v48  ;;  %v1466_v44 = vpop.f32.mrf.mxu2 }
 0x32f   : > { %v6199_v51 = vpack.c.bf16 %v1929_v38, %v1925_v18  ;;  %v1467_v0 = vadd.f32 %v1466_v44, %v5949_v58  ;;  %v6948_v38 = vld [vmem:[#allocation42_spill] sm:$0xff]  ;;  %v6949_v44 = vld [vmem:[#allocation43_spill] sm:$0xff] }
 0x330   : > { %v2484_v50 = vpop.f32.mrf.mxu0 }
 0x331   : > { %6945 = vst [vmem:[#allocation53_spill] sm:$0xff] %v6199_v51  ;;  %v1555_v1 = vpop.f32.mrf.mxu3  ;;  %v2485_v8 = vadd.f32 %v2484_v50, %v5940_v57  ;;  %v2573_v36 = vpop.f32.mrf.mxu1  ;;  %v4669_v50 = vld [vmem:[#allocation7 + $0x1b4] sm:$0xf] }
 0x332   : > { %v1556_v29 = vadd.f32 %v1555_v1, %v1467_v0  ;;  %v4653_v0 = vld [vmem:[#allocation7 + $0x134] sm:$0xf]  ;;  %v4383_v1 = vld [vmem:[#allocation7 + $0x138] sm:$0xf0] }
 0x333   : > { %v6203_v39 = vadd.f32 %v2573_v36, %v2485_v8  ;;  %v4386_v8 = vor.u32 %v4653_v0, %v4383_v1  ;;  %v4447_v36 = vld [vmem:[#allocation7 + $0x1b8] sm:$0xf0] }
 0x334   : > { %v1805_v7 = vmul.f32 0.2, %v1556_v29  ;;  %vm1677_vm10 = vcmp.ge.f32.partialorder %v1556_v29, 0.0 }
 0x335   : > { %6946 = vst [vmem:[#allocation54_spill] sm:$0xff] %v6203_v39  ;;  %2946 = vmatpush.bf16.msra.mxu2 %v4386_v8 }
 0x336   : > { %v1468_v2 = vpop.f32.mrf.mxu2 }
 0x337   : > { %v1469_v21 = vadd.f32 %v1468_v2, %v5949_v58  ;;  %v1933_v2 = vsel %vm1677_vm10, %v1556_v29, %v1805_v7 }
 0x338   : > { %v2487_v28 = vpop.f32.mrf.mxu0 }
 0x339   : > { %v1557_v27 = vpop.f32.mrf.mxu3  ;;  %v2488_v20 = vadd.f32 %v2487_v28, %v5940_v57  ;;  %v2576_v3 = vpop.f32.mrf.mxu1  ;;  %v4450_v28 = vor.u32 %v4669_v50, %v4447_v36 }
 0x33a   : > { %v1558_v46 = vadd.f32 %v1557_v27, %v1469_v21 }
 0x33b   : > { %v6207_v18 = vadd.f32 %v2576_v3, %v2488_v20  ;;  %2624 = vmatmul.bf16.gmra.mxu2 %v5885_v24  ;;  %2802 = vmatmul.bf16.gmra.mxu0 %v6948_v38 }
 0x33c   : > { %vm1681_vm11 = vcmp.ge.f32.partialorder %v1558_v46, 0.0  ;;  %v1809_v48 = vmul.f32 0.2, %v1558_v46  ;;  %2891 = vmatmul.bf16.gmra.mxu1 %v6949_v44  ;;  %3035 = vmatpush.bf16.msra.mxu3 %v4450_v28 }
 0x33d   : > { %6947 = vst [vmem:[#allocation55_spill] sm:$0xff] %v6207_v18 }
 0x33e   : > { %2713 = vmatmul.bf16.gmra.mxu3 %v6115_v16  ;;  %v1937_v21 = vsel %vm1681_vm11, %v1558_v46, %v1809_v48  ;;  %v1471_v27 = vpop.f32.mrf.mxu2 }
 0x33f   : > { %v6213_v39 = vpack.c.bf16 %v1937_v21, %v1933_v2  ;;  %v1472_v20 = vadd.f32 %v1471_v27, %v5949_v58 }
 0x340   : > { %v2489_v38 = vpop.f32.mrf.mxu0 }
 0x341   : > { %6950 = vst [vmem:[#allocation42_spill] sm:$0xff] %v6213_v39  ;;  %v1560_v3 = vpop.f32.mrf.mxu3  ;;  %v2490_v44 = vadd.f32 %v2489_v38, %v5940_v57  ;;  %v2578_v16 = vpop.f32.mrf.mxu1 }
 0x342   : > { %v1561_v18 = vadd.f32 %v1560_v3, %v1472_v20 }
 0x343   : > { %v6217_v24 = vadd.f32 %v2578_v16, %v2490_v44  ;;  %v6952_v16 = vld [vmem:[#allocation44_spill] sm:$0xff] }
 0x344   : > { %v1813_v48 = vmul.f32 0.2, %v1561_v18  ;;  %vm1685_vm12 = vcmp.ge.f32.partialorder %v1561_v18, 0.0 }
 0x346   : > { %v1473_v0 = vpop.f32.mrf.mxu2  ;;  %v1941_v21 = vsel %vm1685_vm12, %v1561_v18, %v1813_v48  ;;  %v4927_v18 = vld [vmem:[%s6789_s4] sm:$0x3] }
 0x347   : > { %v1474_v29 = vadd.f32 %v1473_v0, %v5949_v58  ;;  %v6236_v48 = vperm.slane %v4927_v18, 1 }
 0x348   : > { %v2492_v46 = vpop.f32.mrf.mxu0 }
 0x349   : > { %v1562_v7 = vpop.f32.mrf.mxu3  ;;  %v2493_v50 = vadd.f32 %v2492_v46, %v5940_v57  ;;  %v2581_v36 = vpop.f32.mrf.mxu1 }
 0x34a   : > { %v1563_v1 = vadd.f32 %v1562_v7, %v1474_v29 }
 0x34b   : > { %v6221_v2 = vadd.f32 %v2581_v36, %v2493_v50  ;;  %2629 = vmatmul.bf16.gmra.mxu2 %v5911_v60  ;;  %2807 = vmatmul.bf16.gmra.mxu0 %v5735_v43  ;;  %v4686_v43 = vld [vmem:[#allocation9 + $0x38] sm:$0xff] }
 0x34c   : > { %vm1689_vm13 = vcmp.ge.f32.partialorder %v1563_v1, 0.0  ;;  %v1817_v8 = vmul.f32 0.2, %v1563_v1  ;;  %2896 = vmatmul.bf16.gmra.mxu1 %v6952_v16  ;;  %v4694_v50 = vld [vmem:[#allocation9 + $0x78] sm:$0xff]  ;;  %3476 = vmatpush.bf16.msra.mxu0 %v4686_v43  ;;  %v4375_v43 = vld [vmem:[#allocation7 + $0x128] sm:$0xf0] }
 0x34d   : > { %6951 = vst [vmem:[#allocation43_spill] sm:$0xff] %v6221_v2  ;;  %3565 = vmatpush.bf16.msra.mxu1 %v4694_v50  ;;  %v4667_v50 = vld [vmem:[#allocation7 + $0x1a4] sm:$0xf] }
 0x34e   : > { %2718 = vmatmul.bf16.gmra.mxu3 %v6129_v45  ;;  %v1945_v27 = vsel %vm1689_vm13, %v1563_v1, %v1817_v8  ;;  %v1476_v28 = vpop.f32.mrf.mxu2 }
 0x34f   : > { %v6227_v20 = vpack.c.bf16 %v1945_v27, %v1941_v21  ;;  %v1477_v3 = vadd.f32 %v1476_v28, %v5949_v58 }
 0x350   : > { %v2494_v44 = vpop.f32.mrf.mxu0 }
 0x351   : > { %v1565_v38 = vpop.f32.mrf.mxu3  ;;  %v2495_v29 = vadd.f32 %v2494_v44, %v5940_v57  ;;  %v2583_v7 = vpop.f32.mrf.mxu1  ;;  %v6955_v44 = vld [vmem:[#allocation26_spill] sm:$0xff] }
 0x352   : > { %v1566_v0 = vadd.f32 %v1565_v38, %v1477_v3 }
 0x353   : > { %v6231_v46 = vadd.f32 %v2583_v7, %v2495_v29  ;;  %v6956_v29 = vld [vmem:[#allocation32_spill] sm:$0xff]  ;;  %v6957_v7 = vld [vmem:[#allocation45_spill] sm:$0xff] }
 0x354   : > { %v1821_v21 = vmul.f32 0.2, %v1566_v0  ;;  %vm1693_vm14 = vcmp.ge.f32.partialorder %v1566_v0, 0.0 }
 0x355   : > { %6953 = vst [vmem:[#allocation44_spill] sm:$0xff] %v6231_v46 }
 0x356   : > { %v1478_v1 = vpop.f32.mrf.mxu2 }
 0x357   : > { %v1479_v36 = vadd.f32 %v1478_v1, %v5949_v58  ;;  %v4651_v58 = vld [vmem:[#allocation7 + $0x124] sm:$0xf]  ;;  %v4439_v1 = vld [vmem:[#allocation7 + $0x1a8] sm:$0xf0] }
 0x358   : > { %v2773_v16 = vpop.f32.mrf.mxu0  ;;  %v4378_v18 = vor.u32 %v4651_v58, %v4375_v43  ;;  %v4442_v46 = vor.u32 %v4667_v50, %v4439_v1 }
 0x359   : > { %v1567_v8 = vpop.f32.mrf.mxu3  ;;  %v2774_v27 = vadd.f32 %v2773_v16, %v6236_v48  ;;  %v2862_v28 = vpop.f32.mrf.mxu1 }
 0x35a   : > { %v1568_v57 = vadd.f32 %v1567_v8, %v1479_v36  ;;  %v1949_v36 = vsel %vm1693_vm14, %v1566_v0, %v1821_v21  ;;  %2947 = vmatpush.bf16.msra.mxu2 %v4378_v18  ;;  %3036 = vmatpush.bf16.msra.mxu3 %v4442_v46 }
 0x35b   : > { %v6240_v38 = vadd.f32 %v2862_v28, %v2774_v27  ;;  %2634 = vmatmul.bf16.gmra.mxu2 %v6955_v44  ;;  %2812 = vmatmul.bf16.gmra.mxu0 %v6956_v29  ;;  %v6959_v27 = vld [vmem:[#allocation28_spill] sm:$0xff] }
 0x35c   : > { %vm1697_vm15 = vcmp.ge.f32.partialorder %v1568_v57, 0.0  ;;  %v1825_v3 = vmul.f32 0.2, %v1568_v57  ;;  %2901 = vmatmul.bf16.gmra.mxu1 %v6957_v7 }
 0x35d   : > { %6954 = vst [vmem:[#allocation56_spill] sm:$0xff] %v6240_v38 }
 0x35e   : > { %2723 = vmatmul.bf16.gmra.mxu3 %v6143_v59  ;;  %v1953_v8 = vsel %vm1697_vm15, %v1568_v57, %v1825_v3  ;;  %v2595_v16 = vpop.f32.mrf.mxu2 }
 0x35f   : > { %v6246_v2 = vpack.c.bf16 %v1953_v8, %v1949_v36  ;;  %v2596_v28 = vadd.f32 %v2595_v16, %v6959_v27  ;;  %v6960_v8 = vld [vmem:[#allocation13_spill] sm:$0xff] }
 0x360   : > { %v2775_v29 = vpop.f32.mrf.mxu0 }
 0x361   : > { %6958 = vst [vmem:[#allocation32_spill] sm:$0xff] %v6246_v2  ;;  %v2684_v38 = vpop.f32.mrf.mxu3  ;;  %v2776_v7 = vadd.f32 %v2775_v29, %v6236_v48  ;;  %v2864_v44 = vpop.f32.mrf.mxu1 }
 0x362   : > { %v2685_v59 = vadd.f32 %v2684_v38, %v2596_v28 }
 0x363   : > { %v6250_v45 = vadd.f32 %v2864_v44, %v2776_v7 }
 0x364   : > { %v3184_v3 = vmul.f32 0.2, %v2685_v59  ;;  %vm3120_vm0 = vcmp.ge.f32.partialorder %v2685_v59, 0.0 }
 0x366   : > { %v2597_v58 = vpop.f32.mrf.mxu2 }
 0x367   : > { %v2598_v0 = vadd.f32 %v2597_v58, %v5966_v63  ;;  %v6260_v63 = vsel %vm3120_vm0, %v2685_v59, %v3184_v3 }
 0x368   : > { %v2778_v57 = vpop.f32.mrf.mxu0 }
 0x369   : > { %v2686_v21 = vpop.f32.mrf.mxu3  ;;  %v2779_v50 = vadd.f32 %v2778_v57, %v6236_v48  ;;  %v2867_v1 = vpop.f32.mrf.mxu1 }
 0x36a   : > { %v2687_v43 = vadd.f32 %v2686_v21, %v2598_v0  ;;  %v4685_v0 = vld [vmem:[#allocation9 + $0x30] sm:$0xff] }
 0x36b   : > { %v6254_v46 = vadd.f32 %v2867_v1, %v2779_v50  ;;  %2639 = vmatmul.bf16.gmra.mxu2 %v5964_v11  ;;  %2817 = vmatmul.bf16.gmra.mxu0 %v6904_v9 }
 0x36c   : > { %vm3122_vm1 = vcmp.ge.f32.partialorder %v2687_v43, 0.0  ;;  %v3186_v18 = vmul.f32 0.2, %v2687_v43  ;;  %2906 = vmatmul.bf16.gmra.mxu1 %v5808_v40  ;;  %v4693_v40 = vld [vmem:[#allocation9 + $0x70] sm:$0xff]  ;;  %3477 = vmatpush.bf16.msra.mxu0 %v4685_v0 }
 0x36d   : > { %3566 = vmatpush.bf16.msra.mxu1 %v4693_v40 }
 0x36e   : > { %2728 = vmatmul.bf16.gmra.mxu3 %v6157_v47  ;;  %v6262_v38 = vsel %vm3122_vm1, %v2687_v43, %v3186_v18  ;;  %v2600_v36 = vpop.f32.mrf.mxu2 }
 0x36f   : > { %v2601_v16 = vadd.f32 %v2600_v36, %v6960_v8 }
 0x370   : > { %v2780_v28 = vpop.f32.mrf.mxu0 }
 0x371   : > { %v2689_v27 = vpop.f32.mrf.mxu3  ;;  %v2781_v7 = vadd.f32 %v2780_v28, %v6236_v48  ;;  %v2869_v9 = vpop.f32.mrf.mxu1  ;;  %v4665_v28 = vld [vmem:[#allocation7 + $0x194] sm:$0xf] }
 0x372   : > { %v2690_v29 = vadd.f32 %v2689_v27, %v2601_v16  ;;  %v6961_v16 = vld [vmem:[#allocation46_spill] sm:$0xff]  ;;  %v4367_v27 = vld [vmem:[#allocation7 + $0x118] sm:$0xf0] }
 0x373   : > { %v6268_v58 = vadd.f32 %v2869_v9, %v2781_v7  ;;  %v4431_v9 = vld [vmem:[#allocation7 + $0x198] sm:$0xf0] }
 0x374   : > { %v3188_v43 = vmul.f32 0.2, %v2690_v29  ;;  %vm3124_vm2 = vcmp.ge.f32.partialorder %v2690_v29, 0.0 }
 0x376   : > { %v2602_v59 = vpop.f32.mrf.mxu2  ;;  %v6278_v0 = vsel %vm3124_vm2, %v2690_v29, %v3188_v43 }
 0x377   : > { %v2603_v21 = vadd.f32 %v2602_v59, %v5988_v14  ;;  %v4649_v14 = vld [vmem:[#allocation7 + $0x114] sm:$0xf] }
 0x378   : > { %v2783_v3 = vpop.f32.mrf.mxu0  ;;  %v4370_v7 = vor.u32 %v4649_v14, %v4367_v27 }
 0x379   : > { %v2691_v57 = vpop.f32.mrf.mxu3  ;;  %v2784_v1 = vadd.f32 %v2783_v3, %v6236_v48  ;;  %v2872_v18 = vpop.f32.mrf.mxu1  ;;  %v6962_v3 = vld [vmem:[#allocation33_spill] sm:$0xff] }
 0x37a   : > { %v2692_v50 = vadd.f32 %v2691_v57, %v2603_v21  ;;  %v4434_v21 = vor.u32 %v4665_v28, %v4431_v9  ;;  %2948 = vmatpush.bf16.msra.mxu2 %v4370_v7 }
 0x37b   : > { %v6272_v8 = vadd.f32 %v2872_v18, %v2784_v1  ;;  %2644 = vmatmul.bf16.gmra.mxu2 %v5986_v53  ;;  %2822 = vmatmul.bf16.gmra.mxu0 %v6907_v15 }
 0x37c   : > { %vm3126_vm3 = vcmp.ge.f32.partialorder %v2692_v50, 0.0  ;;  %v3190_v36 = vmul.f32 0.2, %v2692_v50  ;;  %2911 = vmatmul.bf16.gmra.mxu1 %v6961_v16  ;;  %3037 = vmatpush.bf16.msra.mxu3 %v4434_v21 }
 0x37e   : > { %2733 = vmatmul.bf16.gmra.mxu3 %v6171_v42  ;;  %v6280_v40 = vsel %vm3126_vm3, %v2692_v50, %v3190_v36  ;;  %v2605_v59 = vpop.f32.mrf.mxu2 }
 0x37f   : > { %v2606_v15 = vadd.f32 %v2605_v59, %v6962_v3  ;;  %v6964_v3 = vld [vmem:[#allocation35_spill] sm:$0xff] }
 0x380   : > { %v2785_v18 = vpop.f32.mrf.mxu0 }
 0x381   : > { %v2694_v1 = vpop.f32.mrf.mxu3  ;;  %v2786_v44 = vadd.f32 %v2785_v18, %v6236_v48  ;;  %v2874_v14 = vpop.f32.mrf.mxu1 }
 0x382   : > { %v2695_v16 = vadd.f32 %v2694_v1, %v2606_v15 }
 0x383   : > { %v6286_v27 = vadd.f32 %v2874_v14, %v2786_v44  ;;  %v6965_v44 = vld [vmem:[#allocation47_spill] sm:$0xff] }
 0x384   : > { %v3192_v28 = vmul.f32 0.2, %v2695_v16  ;;  %vm3128_vm4 = vcmp.ge.f32.partialorder %v2695_v16, 0.0  ;;  %v6966_v14 = vld [vmem:[#allocation15_spill] sm:$0xff] }
 0x386   : > { %v2607_v29 = vpop.f32.mrf.mxu2 }
 0x387   : > { %v2608_v43 = vadd.f32 %v2607_v29, %v6010_v32  ;;  %v6296_v32 = vsel %vm3128_vm4, %v2695_v16, %v3192_v28 }
 0x388   : > { %v2788_v36 = vpop.f32.mrf.mxu0 }
 0x389   : > { %v2696_v50 = vpop.f32.mrf.mxu3  ;;  %v2789_v57 = vadd.f32 %v2788_v36, %v6236_v48  ;;  %v2877_v59 = vpop.f32.mrf.mxu1 }
 0x38a   : > { %v2697_v9 = vadd.f32 %v2696_v50, %v2608_v43 }
 0x38b   : > { %v6290_v21 = vadd.f32 %v2877_v59, %v2789_v57  ;;  %2649 = vmatmul.bf16.gmra.mxu2 %v6008_v37  ;;  %2827 = vmatmul.bf16.gmra.mxu0 %v6964_v3 }
 0x38c   : > { %vm3130_vm5 = vcmp.ge.f32.partialorder %v2697_v9, 0.0  ;;  %v3194_v7 = vmul.f32 0.2, %v2697_v9  ;;  %2916 = vmatmul.bf16.gmra.mxu1 %v6965_v44  ;;  %v4692_v44 = vld [vmem:[#allocation9 + $0x68] sm:$0xff] }
 0x38d   : > { %6963 = vst [vmem:[#allocation45_spill] sm:$0xff] %v6290_v21  ;;  %v4684_v21 = vld [vmem:[#allocation9 + $0x28] sm:$0xff]  ;;  %3567 = vmatpush.bf16.msra.mxu1 %v4692_v44  ;;  %v4663_v44 = vld [vmem:[#allocation7 + $0x184] sm:$0xf] }
 0x38e   : > { %2738 = vmatmul.bf16.gmra.mxu3 %v6185_v19  ;;  %v6298_v15 = vsel %vm3130_vm5, %v2697_v9, %v3194_v7  ;;  %v2610_v1 = vpop.f32.mrf.mxu2  ;;  %3478 = vmatpush.bf16.msra.mxu0 %v4684_v21  ;;  %v6971_v21 = vld [vmem:[#allocation20_spill] sm:$0xff] }
 0x38f   : > { %v2611_v29 = vadd.f32 %v2610_v1, %v6966_v14 }
 0x390   : > { %v2790_v43 = vpop.f32.mrf.mxu0 }
 0x391   : > { %v2699_v57 = vpop.f32.mrf.mxu3  ;;  %v2791_v36 = vadd.f32 %v2790_v43, %v6236_v48  ;;  %v2879_v59 = vpop.f32.mrf.mxu1  ;;  %v6969_v43 = vld [vmem:[#allocation17_spill] sm:$0xff] }
 0x392   : > { %v2700_v50 = vadd.f32 %v2699_v57, %v2611_v29 }
 0x393   : > { %v6304_v3 = vadd.f32 %v2879_v59, %v2791_v36  ;;  %v6970_v36 = vld [vmem:[#allocation36_spill] sm:$0xff]  ;;  %v4359_v59 = vld [vmem:[#allocation7 + $0x108] sm:$0xf0] }
 0x394   : > { %v3196_v18 = vmul.f32 0.2, %v2700_v50  ;;  %vm3132_vm6 = vcmp.ge.f32.partialorder %v2700_v50, 0.0 }
 0x395   : > { %6967 = vst [vmem:[#allocation28_spill] sm:$0xff] %v6304_v3 }
 0x396   : > { %v2612_v16 = vpop.f32.mrf.mxu2 }
 0x397   : > { %v2613_v28 = vadd.f32 %v2612_v16, %v6032_v41  ;;  %v4647_v41 = vld [vmem:[#allocation7 + $0x104] sm:$0xf] }
 0x398   : > { %v2793_v7 = vpop.f32.mrf.mxu0  ;;  %v4362_v16 = vor.u32 %v4647_v41, %v4359_v59 }
 0x399   : > { %v2701_v9 = vpop.f32.mrf.mxu3  ;;  %v2794_v1 = vadd.f32 %v2793_v7, %v6236_v48  ;;  %v2882_v14 = vpop.f32.mrf.mxu1 }
 0x39a   : > { %v2702_v19 = vadd.f32 %v2701_v9, %v2613_v28  ;;  %v4423_v28 = vld [vmem:[#allocation7 + $0x188] sm:$0xf0]  ;;  %v6314_v9 = vsel %vm3132_vm6, %v2700_v50, %v3196_v18  ;;  %2949 = vmatpush.bf16.msra.mxu2 %v4362_v16  ;;  %v4683_v50 = vld [vmem:[#allocation9 + $0x20] sm:$0xff] }
 0x39b   : > { %v6308_v57 = vadd.f32 %v2882_v14, %v2794_v1  ;;  %2654 = vmatmul.bf16.gmra.mxu2 %v6969_v43  ;;  %2832 = vmatmul.bf16.gmra.mxu0 %v6970_v36  ;;  %v4426_v1 = vor.u32 %v4663_v44, %v4423_v28  ;;  %v6976_v16 = vld [vmem:[#allocation37_spill] sm:$0xff] }
 0x39c   : > { %vm3134_vm7 = vcmp.ge.f32.partialorder %v2702_v19, 0.0  ;;  %v3198_v29 = vmul.f32 0.2, %v2702_v19  ;;  %2921 = vmatmul.bf16.gmra.mxu1 %v6971_v21  ;;  %3479 = vmatpush.bf16.msra.mxu0 %v4683_v50 }
 0x39d   : > { %6968 = vst [vmem:[#allocation13_spill] sm:$0xff] %v6308_v57  ;;  %v6972_v57 = vld [vmem:[#allocation48_spill] sm:$0xff]  ;;  %3038 = vmatpush.bf16.msra.mxu3 %v4426_v1 }
 0x39e   : > { %2743 = vmatmul.bf16.gmra.mxu3 %v6199_v51  ;;  %v6316_v7 = vsel %vm3134_vm7, %v2702_v19, %v3198_v29  ;;  %v2615_v3 = vpop.f32.mrf.mxu2  ;;  %v4682_v1 = vld [vmem:[#allocation9 + $0x18] sm:$0xff] }
 0x39f   : > { %v2616_v36 = vadd.f32 %v2615_v3, %v6972_v57 }
 0x3a0   : > { %v6321_v51 = vpop.f32.mrf.mxu0  ;;  %3480 = vmatpush.bf16.msra.mxu0 %v4682_v1  ;;  %v4680_v1 = vld [vmem:[#allocation9 + $0x8] sm:$0xff] }
 0x3a1   : > { %v2704_v43 = vpop.f32.mrf.mxu3  ;;  %v6323_v37 = vpop.f32.mrf.mxu1 }
 0x3a2   : > { %v2705_v21 = vadd.f32 %v2704_v43, %v2616_v36  ;;  %6973 = vst [vmem:[#allocation46_spill] sm:$0xff] %v6323_v37  ;;  %v6975_v43 = vld [vmem:[#allocation18_spill] sm:$0xff] }
 0x3a4   : > { %v3200_v59 = vmul.f32 0.2, %v2705_v21  ;;  %vm3136_vm8 = vcmp.ge.f32.partialorder %v2705_v21, 0.0 }
 0x3a6   : > { %v2617_v41 = vpop.f32.mrf.mxu2  ;;  %v6333_v36 = vsel %vm3136_vm8, %v2705_v21, %v3200_v59 }
 0x3a7   : > { %v2618_v18 = vadd.f32 %v2617_v41, %v6054_v54  ;;  %v6977_v54 = vld [vmem:[#allocation24_spill] sm:$0xff] }
 0x3a8   : > { %v2798_v29 = vpop.f32.mrf.mxu0 }
 0x3a9   : > { %v2706_v19 = vpop.f32.mrf.mxu3  ;;  %v2799_v28 = vadd.f32 %v2798_v29, %v6236_v48  ;;  %v2887_v14 = vpop.f32.mrf.mxu1 }
 0x3aa   : > { %v2707_v44 = vadd.f32 %v2706_v19, %v2618_v18 }
 0x3ab   : > { %v6327_v57 = vadd.f32 %v2887_v14, %v2799_v28  ;;  %2659 = vmatmul.bf16.gmra.mxu2 %v6975_v43  ;;  %2837 = vmatmul.bf16.gmra.mxu0 %v6976_v16  ;;  %v6978_v14 = vld [vmem:[#allocation19_spill] sm:$0xff] }
 0x3ac   : > { %vm3138_vm9 = vcmp.ge.f32.partialorder %v2707_v44, 0.0  ;;  %v3202_v3 = vmul.f32 0.2, %v2707_v44  ;;  %2926 = vmatmul.bf16.gmra.mxu1 %v6977_v54  ;;  %v4681_v28 = vld [vmem:[#allocation9 + $0x10] sm:$0xff]  ;;  %v4691_v54 = vld [vmem:[#allocation9 + $0x60] sm:$0xff] }
 0x3ad   : > { %6974 = vst [vmem:[#allocation33_spill] sm:$0xff] %v6327_v57  ;;  %3481 = vmatpush.bf16.msra.mxu0 %v4681_v28  ;;  %3568 = vmatpush.bf16.msra.mxu1 %v4691_v54 }
 0x3ae   : > { %2748 = vmatmul.bf16.gmra.mxu3 %v6213_v39  ;;  %v6335_v41 = vsel %vm3138_vm9, %v2707_v44, %v3202_v3  ;;  %v2620_v18 = vpop.f32.mrf.mxu2  ;;  %v4679_v3 = vld [vmem:[#allocation9] sm:$0xff] }
 0x3af   : > { %v2621_v50 = vadd.f32 %v2620_v18, %v6978_v14 }
 0x3b0   : > { %v6340_v57 = vpop.f32.mrf.mxu0 }
 0x3b1   : > { %v2709_v29 = vpop.f32.mrf.mxu3  ;;  %v6342_v43 = vpop.f32.mrf.mxu1  ;;  %3482 = vmatpush.bf16.msra.mxu0 %v4680_v1  ;;  %v6980_v1 = vld [vmem:[#allocation23_spill] sm:$0xff] }
 0x3b2   : > { %v2710_v16 = vadd.f32 %v2709_v29, %v2621_v50 }
 0x3b4   : > { %v3204_v39 = vmul.f32 0.2, %v2710_v16  ;;  %vm3140_vm10 = vcmp.ge.f32.partialorder %v2710_v16, 0.0 }
 0x3b5   : > { %3483 = vmatpush.bf16.msra.mxu0 %v4679_v3 }
 0x3b6   : > { %v2622_v21 = vpop.f32.mrf.mxu2 }
 0x3b7   : > { %v2623_v59 = vadd.f32 %v2622_v21, %v6082_v17  ;;  %v6352_v17 = vsel %vm3140_vm10, %v2710_v16, %v3204_v39 }
 0x3b8   : > { %v2803_v19 = vpop.f32.mrf.mxu0 }
 0x3b9   : > { %v2711_v44 = vpop.f32.mrf.mxu3  ;;  %v2804_v14 = vadd.f32 %v2803_v19, %v6236_v48  ;;  %v2892_v37 = vpop.f32.mrf.mxu1 }
 0x3ba   : > { %v2712_v18 = vadd.f32 %v2711_v44, %v2623_v59 }
 0x3bb   : > { %v6346_v29 = vadd.f32 %v2892_v37, %v2804_v14  ;;  %2664 = vmatmul.bf16.gmra.mxu2 %v6080_v10  ;;  %2842 = vmatmul.bf16.gmra.mxu0 %v6928_v12 }
 0x3bc   : > { %vm3142_vm11 = vcmp.ge.f32.partialorder %v2712_v18, 0.0  ;;  %v3206_v50 = vmul.f32 0.2, %v2712_v18  ;;  %2931 = vmatmul.bf16.gmra.mxu1 %v5927_v31 }
 0x3bd   : > { %6979 = vst [vmem:[#allocation35_spill] sm:$0xff] %v6346_v29 }
 0x3be   : > { %2753 = vmatmul.bf16.gmra.mxu3 %v6227_v20  ;;  %v6354_v28 = vsel %vm3142_vm11, %v2712_v18, %v3206_v50  ;;  %v2625_v19 = vpop.f32.mrf.mxu2 }
 0x3bf   : > { %v2626_v21 = vadd.f32 %v2625_v19, %v6980_v1  ;;  %v6984_v1 = vld [vmem:[#allocation39_spill] sm:$0xff] }
 0x3c0   : > { %v6359_v59 = vpop.f32.mrf.mxu0 }
 0x3c1   : > { %v2714_v37 = vpop.f32.mrf.mxu3  ;;  %6981 = vst [vmem:[#allocation47_spill] sm:$0xff] %v6359_v59  ;;  %v6361_v3 = vpop.f32.mrf.mxu1 }
 0x3c2   : > { %v2715_v44 = vadd.f32 %v2714_v37, %v2626_v21  ;;  %6982 = vst [vmem:[#allocation15_spill] sm:$0xff] %v6361_v3  ;;  %v6985_v21 = vld [vmem:[#allocation29_spill] sm:$0xff] }
 0x3c4   : > { %v3208_v16 = vmul.f32 0.2, %v2715_v44  ;;  %vm3144_vm12 = vcmp.ge.f32.partialorder %v2715_v44, 0.0 }
 0x3c6   : > { %v2627_v12 = vpop.f32.mrf.mxu2 }
 0x3c7   : > { %v2628_v14 = vadd.f32 %v2627_v12, %v6105_v13  ;;  %v6371_v13 = vsel %vm3144_vm12, %v2715_v44, %v3208_v16 }
 0x3c8   : > { %v2808_v39 = vpop.f32.mrf.mxu0 }
 0x3c9   : > { %v2716_v31 = vpop.f32.mrf.mxu3  ;;  %v2809_v50 = vadd.f32 %v2808_v39, %v6236_v48  ;;  %v2897_v29 = vpop.f32.mrf.mxu1 }
 0x3ca   : > { %v2717_v18 = vadd.f32 %v2716_v31, %v2628_v14  ;;  %v6986_v31 = vld [vmem:[#allocation38_spill] sm:$0xff] }
 0x3cb   : > { %v6365_v19 = vadd.f32 %v2897_v29, %v2809_v50  ;;  %2669 = vmatmul.bf16.gmra.mxu2 %v6103_v61  ;;  %2847 = vmatmul.bf16.gmra.mxu0 %v6984_v1  ;;  %v4690_v1 = vld [vmem:[#allocation9 + $0x58] sm:$0xff] }
 0x3cc   : > { %vm3146_vm13 = vcmp.ge.f32.partialorder %v2717_v18, 0.0  ;;  %v3210_v54 = vmul.f32 0.2, %v2717_v18  ;;  %2936 = vmatmul.bf16.gmra.mxu1 %v6985_v21  ;;  %v6988_v21 = vld [vmem:[#allocation30_spill] sm:$0xff] }
 0x3cd   : > { %6983 = vst [vmem:[#allocation36_spill] sm:$0xff] %v6365_v19  ;;  %3569 = vmatpush.bf16.msra.mxu1 %v4690_v1  ;;  %v6992_v1 = vld [vmem:[#allocation14_spill] sm:$0xff] }
 0x3ce   : > { %2758 = vmatmul.bf16.gmra.mxu3 %v6246_v2  ;;  %v6373_v37 = vsel %vm3146_vm13, %v2717_v18, %v3210_v54  ;;  %v2630_v12 = vpop.f32.mrf.mxu2 }
 0x3cf   : > { %v2631_v39 = vadd.f32 %v2630_v12, %v6986_v31 }
 0x3d0   : > { %v6378_v50 = vpop.f32.mrf.mxu0 }
 0x3d1   : > { %v2719_v29 = vpop.f32.mrf.mxu3  ;;  %v6380_v61 = vpop.f32.mrf.mxu1 }
 0x3d2   : > { %v2720_v19 = vadd.f32 %v2719_v29, %v2631_v39  ;;  %6987 = vst [vmem:[#allocation20_spill] sm:$0xff] %v6380_v61  ;;  %v6990_v39 = vld [vmem:[#allocation40_spill] sm:$0xff]  ;;  %v6991_v29 = vpack.c.bf16 %v6262_v38, %v6260_v63 }
 0x3d4   : > { %v3212_v18 = vmul.f32 0.2, %v2720_v19  ;;  %vm3148_vm14 = vcmp.ge.f32.partialorder %v2720_v19, 0.0 }
 0x3d6   : > { %v2632_v2 = vpop.f32.mrf.mxu2 }
 0x3d7   : > { %v2633_v44 = vadd.f32 %v2632_v2, %v6988_v21  ;;  %v6391_v2 = vsel %vm3148_vm14, %v2720_v19, %v3212_v18 }
 0x3d8   : > { %v2813_v54 = vpop.f32.mrf.mxu0 }
 0x3d9   : > { %v2721_v16 = vpop.f32.mrf.mxu3  ;;  %v2814_v59 = vadd.f32 %v2813_v54, %v6236_v48  ;;  %v2902_v14 = vpop.f32.mrf.mxu1  ;;  %v6993_v54 = vld [vmem:[#allocation49_spill] sm:$0xff] }
 0x3da   : > { %v2722_v3 = vadd.f32 %v2721_v16, %v2633_v44 }
 0x3db   : > { %v6384_v31 = vadd.f32 %v2902_v14, %v2814_v59  ;;  %2950 = vmatmul.bf16.vlgmr.msra.gmra.mxu2 %v6990_v39  ;;  %3484 = vmatmul.bf16.vlgmr.msra.gmra.mxu0 %v6991_v29 }
 0x3dc   : > { %vm3150_vm15 = vcmp.ge.f32.partialorder %v2722_v3, 0.0  ;;  %v3214_v12 = vmul.f32 0.2, %v2722_v3 }
 0x3dd   : > { %6989 = vst [vmem:[#allocation48_spill] sm:$0xff] %v6384_v31 }
 0x3de   : > { %3039 = vmatmul.bf16.vlgmr.msra.gmra.mxu3 %v6992_v1  ;;  %v6393_v21 = vsel %vm3150_vm15, %v2722_v3, %v3214_v12  ;;  %v2635_v44 = vpop.f32.mrf.mxu2 }
 0x3df   : > { %v2636_v61 = vadd.f32 %v2635_v44, %v6993_v54 }
 0x3e0   : > { %v6398_v14 = vpop.f32.mrf.mxu0 }
 0x3e1   : > { %v2724_v59 = vpop.f32.mrf.mxu3  ;;  %v6400_v31 = vpop.f32.mrf.mxu1 }
 0x3e2   : > { %v2725_v39 = vadd.f32 %v2724_v59, %v2636_v61  ;;  %v6994_v61 = vpack.c.bf16 %v6280_v40, %v6278_v0  ;;  %v4689_v0 = vld [vmem:[#allocation9 + $0x50] sm:$0xff] }
 0x3e3   : > { %3570 = vmatpush.bf16.msra.mxu1 %v4689_v0 }
 0x3e4   : > { %v3216_v18 = vmul.f32 0.2, %v2725_v39  ;;  %vm3152_vm0 = vcmp.ge.f32.partialorder %v2725_v39, 0.0 }
 0x3e6   : > { %v2637_v63 = vpop.f32.mrf.mxu2 }
 0x3e7   : > { %v2638_v38 = vadd.f32 %v2637_v63, %v6133_v25  ;;  %v6411_v25 = vsel %vm3152_vm0, %v2725_v39, %v3216_v18 }
 0x3e8   : > { %v2818_v19 = vpop.f32.mrf.mxu0 }
 0x3e9   : > { %v2726_v29 = vpop.f32.mrf.mxu3  ;;  %v2819_v12 = vadd.f32 %v2818_v19, %v6236_v48  ;;  %v2907_v1 = vpop.f32.mrf.mxu1 }
 0x3ea   : > { %v2727_v3 = vadd.f32 %v2726_v29, %v2638_v38 }
 0x3eb   : > { %v6404_v44 = vadd.f32 %v2907_v1, %v2819_v12  ;;  %2955 = vmatmul.bf16.gmra.mxu2 %v5773_v35  ;;  %3489 = vmatmul.bf16.gmra.mxu0 %v6994_v61 }
 0x3ec   : > { %vm3154_vm1 = vcmp.ge.f32.partialorder %v2727_v3, 0.0  ;;  %v3218_v16 = vmul.f32 0.2, %v2727_v3 }
 0x3ee   : > { %3044 = vmatmul.bf16.gmra.mxu3 %v6002_v4  ;;  %v6413_v54 = vsel %vm3154_vm1, %v2727_v3, %v3218_v16  ;;  %v2640_v59 = vpop.f32.mrf.mxu2 }
 0x3ef   : > { %v2641_v38 = vadd.f32 %v2640_v59, %v6137_v5 }
 0x3f0   : > { %v6418_v19 = vpop.f32.mrf.mxu0 }
 0x3f1   : > { %v2729_v29 = vpop.f32.mrf.mxu3  ;;  %v6420_v12 = vpop.f32.mrf.mxu1 }
 0x3f2   : > { %v2730_v35 = vadd.f32 %v2729_v29, %v2641_v38  ;;  %v6995_v38 = vpack.c.bf16 %v6298_v15, %v6296_v32  ;;  %v6996_v29 = vld [vmem:[#allocation16_spill] sm:$0xff] }
 0x3f4   : > { %v3220_v18 = vmul.f32 0.2, %v2730_v35  ;;  %vm3156_vm2 = vcmp.ge.f32.partialorder %v2730_v35, 0.0 }
 0x3f6   : > { %v2642_v40 = vpop.f32.mrf.mxu2 }
 0x3f7   : > { %v2643_v4 = vadd.f32 %v2642_v40, %v6147_v22  ;;  %v6431_v22 = vsel %vm3156_vm2, %v2730_v35, %v3220_v18 }
 0x3f8   : > { %v2823_v16 = vpop.f32.mrf.mxu0 }
 0x3f9   : > { %v2731_v39 = vpop.f32.mrf.mxu3  ;;  %v2824_v1 = vadd.f32 %v2823_v16, %v6236_v48  ;;  %v2912_v61 = vpop.f32.mrf.mxu1 }
 0x3fa   : > { %v2732_v3 = vadd.f32 %v2731_v39, %v2643_v4  ;;  %v6997_v39 = vld [vmem:[#allocation50_spill] sm:$0xff] }
 0x3fb   : > { %v6424_v59 = vadd.f32 %v2912_v61, %v2824_v1  ;;  %2960 = vmatmul.bf16.gmra.mxu2 %v5793_v62  ;;  %3494 = vmatmul.bf16.gmra.mxu0 %v6995_v38 }
 0x3fc   : > { %vm3158_vm3 = vcmp.ge.f32.partialorder %v2732_v3, 0.0  ;;  %v3222_v5 = vmul.f32 0.2, %v2732_v3 }
 0x3fe   : > { %3049 = vmatmul.bf16.gmra.mxu3 %v6996_v29  ;;  %v6433_v0 = vsel %vm3158_vm3, %v2732_v3, %v3222_v5  ;;  %v2645_v40 = vpop.f32.mrf.mxu2 }
 0x3ff   : > { %v2646_v16 = vadd.f32 %v2645_v40, %v6997_v39  ;;  %v6998_v39 = vpack.c.bf16 %v6316_v7, %v6314_v9  ;;  %v4688_v9 = vld [vmem:[#allocation9 + $0x48] sm:$0xff] }
 0x400   : > { %v6438_v61 = vpop.f32.mrf.mxu0  ;;  %3571 = vmatpush.bf16.msra.mxu1 %v4688_v9 }
 0x401   : > { %v2734_v1 = vpop.f32.mrf.mxu3  ;;  %v6440_v63 = vpop.f32.mrf.mxu1 }
 0x402   : > { %v2735_v62 = vadd.f32 %v2734_v1, %v2646_v16 }
 0x404   : > { %v3224_v18 = vmul.f32 0.2, %v2735_v62  ;;  %vm3160_vm4 = vcmp.ge.f32.partialorder %v2735_v62, 0.0 }
 0x406   : > { %v2647_v32 = vpop.f32.mrf.mxu2 }
 0x407   : > { %v2648_v15 = vadd.f32 %v2647_v32, %v6161_v49  ;;  %v6451_v49 = vsel %vm3160_vm4, %v2735_v62, %v3224_v18 }
 0x408   : > { %v2828_v35 = vpop.f32.mrf.mxu0 }
 0x409   : > { %v2736_v38 = vpop.f32.mrf.mxu3  ;;  %v2829_v5 = vadd.f32 %v2828_v35, %v6236_v48  ;;  %v2917_v29 = vpop.f32.mrf.mxu1 }
 0x40a   : > { %v2737_v3 = vadd.f32 %v2736_v38, %v2648_v15 }
 0x40b   : > { %v6444_v40 = vadd.f32 %v2917_v29, %v2829_v5  ;;  %2965 = vmatmul.bf16.gmra.mxu2 %v5819_v56  ;;  %3499 = vmatmul.bf16.gmra.mxu0 %v6998_v39 }
 0x40c   : > { %vm3162_vm5 = vcmp.ge.f32.partialorder %v2737_v3, 0.0  ;;  %v3226_v4 = vmul.f32 0.2, %v2737_v3 }
 0x40e   : > { %3054 = vmatmul.bf16.gmra.mxu3 %v6046_v34  ;;  %v6453_v16 = vsel %vm3162_vm5, %v2737_v3, %v3226_v4  ;;  %v2650_v1 = vpop.f32.mrf.mxu2 }
 0x40f   : > { %v2651_v15 = vadd.f32 %v2650_v1, %v6165_v52 }
 0x410   : > { %v6458_v35 = vpop.f32.mrf.mxu0 }
 0x411   : > { %v2739_v38 = vpop.f32.mrf.mxu3  ;;  %v6460_v5 = vpop.f32.mrf.mxu1 }
 0x412   : > { %v2740_v56 = vadd.f32 %v2739_v38, %v2651_v15  ;;  %v6999_v15 = vpack.c.bf16 %v6335_v41, %v6333_v36  ;;  %v7000_v38 = vld [vmem:[#allocation21_spill] sm:$0xff] }
 0x414   : > { %v3228_v18 = vmul.f32 0.2, %v2740_v56  ;;  %vm3164_vm6 = vcmp.ge.f32.partialorder %v2740_v56, 0.0 }
 0x416   : > { %v2652_v7 = vpop.f32.mrf.mxu2 }
 0x417   : > { %v2653_v34 = vadd.f32 %v2652_v7, %v6175_v6  ;;  %v6471_v6 = vsel %vm3164_vm6, %v2740_v56, %v3228_v18 }
 0x418   : > { %v2833_v4 = vpop.f32.mrf.mxu0 }
 0x419   : > { %v2741_v62 = vpop.f32.mrf.mxu3  ;;  %v2834_v29 = vadd.f32 %v2833_v4, %v6236_v48  ;;  %v2922_v39 = vpop.f32.mrf.mxu1 }
 0x41a   : > { %v2742_v3 = vadd.f32 %v2741_v62, %v2653_v34  ;;  %v7001_v62 = vld [vmem:[#allocation51_spill] sm:$0xff] }
 0x41b   : > { %v6464_v1 = vadd.f32 %v2922_v39, %v2834_v29  ;;  %2970 = vmatmul.bf16.gmra.mxu2 %v5839_v33  ;;  %3504 = vmatmul.bf16.gmra.mxu0 %v6999_v15 }
 0x41c   : > { %vm3166_vm7 = vcmp.ge.f32.partialorder %v2742_v3, 0.0  ;;  %v3230_v52 = vmul.f32 0.2, %v2742_v3 }
 0x41e   : > { %3059 = vmatmul.bf16.gmra.mxu3 %v7000_v38  ;;  %v6473_v9 = vsel %vm3166_vm7, %v2742_v3, %v3230_v52  ;;  %v2655_v7 = vpop.f32.mrf.mxu2 }
 0x41f   : > { %v2656_v4 = vadd.f32 %v2655_v7, %v7001_v62  ;;  %v7002_v62 = vpack.c.bf16 %v6354_v28, %v6352_v17  ;;  %v4687_v17 = vld [vmem:[#allocation9 + $0x40] sm:$0xff] }
 0x420   : > { %v6478_v39 = vpop.f32.mrf.mxu0  ;;  %3572 = vmatpush.bf16.msra.mxu1 %v4687_v17  ;;  %v7008_v17 = vld [vmem:[#allocation27_spill] sm:$0xff] }
 0x421   : > { %v2744_v29 = vpop.f32.mrf.mxu3  ;;  %v6480_v32 = vpop.f32.mrf.mxu1 }
 0x422   : > { %v2745_v33 = vadd.f32 %v2744_v29, %v2656_v4 }
 0x424   : > { %v3232_v18 = vmul.f32 0.2, %v2745_v33  ;;  %vm3168_vm8 = vcmp.ge.f32.partialorder %v2745_v33, 0.0 }
 0x426   : > { %v2657_v36 = vpop.f32.mrf.mxu2 }
 0x427   : > { %v2658_v41 = vadd.f32 %v2657_v36, %v6189_v30  ;;  %v6491_v30 = vsel %vm3168_vm8, %v2745_v33, %v3232_v18 }
 0x428   : > { %v2838_v56 = vpop.f32.mrf.mxu0 }
 0x429   : > { %v2746_v15 = vpop.f32.mrf.mxu3  ;;  %v2839_v52 = vadd.f32 %v2838_v56, %v6236_v48  ;;  %v2927_v38 = vpop.f32.mrf.mxu1 }
 0x42a   : > { %v2747_v3 = vadd.f32 %v2746_v15, %v2658_v41 }
 0x42b   : > { %v6484_v7 = vadd.f32 %v2927_v38, %v2839_v52  ;;  %2975 = vmatmul.bf16.gmra.mxu2 %v5865_v55  ;;  %3509 = vmatmul.bf16.gmra.mxu0 %v7002_v62 }
 0x42c   : > { %vm3170_vm9 = vcmp.ge.f32.partialorder %v2747_v3, 0.0  ;;  %v3234_v34 = vmul.f32 0.2, %v2747_v3 }
 0x42e   : > { %3064 = vmatmul.bf16.gmra.mxu3 %v6097_v23  ;;  %v6493_v4 = vsel %vm3170_vm9, %v2747_v3, %v3234_v34  ;;  %v2660_v29 = vpop.f32.mrf.mxu2  ;;  %v7004_v23 = vld [vmem:[#allocation54_spill] sm:$0xff] }
 0x42f   : > { %v2661_v41 = vadd.f32 %v2660_v29, %v6193_v26 }
 0x430   : > { %v6498_v56 = vpop.f32.mrf.mxu0 }
 0x431   : > { %v2749_v15 = vpop.f32.mrf.mxu3  ;;  %v6500_v52 = vpop.f32.mrf.mxu1 }
 0x432   : > { %v2750_v55 = vadd.f32 %v2749_v15, %v2661_v41  ;;  %7003 = vst [vmem:[#allocation37_spill] sm:$0xff] %v6500_v52  ;;  %v7006_v41 = vld [vmem:[#allocation22_spill] sm:$0xff]  ;;  %v7007_v15 = vpack.c.bf16 %v6373_v37, %v6371_v13 }
 0x434   : > { %v3236_v3 = vmul.f32 0.2, %v2750_v55  ;;  %vm3172_vm10 = vcmp.ge.f32.partialorder %v2750_v55, 0.0 }
 0x436   : > { %v2662_v28 = vpop.f32.mrf.mxu2 }
 0x437   : > { %v2663_v33 = vadd.f32 %v2662_v28, %v7004_v23  ;;  %v6511_v28 = vsel %vm3172_vm10, %v2750_v55, %v3236_v3 }
 0x438   : > { %v2843_v34 = vpop.f32.mrf.mxu0 }
 0x439   : > { %v2751_v18 = vpop.f32.mrf.mxu3  ;;  %v2844_v62 = vadd.f32 %v2843_v34, %v6236_v48  ;;  %v2932_v36 = vpop.f32.mrf.mxu1  ;;  %v7009_v34 = vld [vmem:[#allocation55_spill] sm:$0xff] }
 0x43a   : > { %v2752_v38 = vadd.f32 %v2751_v18, %v2663_v33 }
 0x43b   : > { %v6504_v29 = vadd.f32 %v2932_v36, %v2844_v62  ;;  %2980 = vmatmul.bf16.gmra.mxu2 %v7006_v41  ;;  %3514 = vmatmul.bf16.gmra.mxu0 %v7007_v15 }
 0x43c   : > { %vm3174_vm11 = vcmp.ge.f32.partialorder %v2752_v38, 0.0  ;;  %v3238_v26 = vmul.f32 0.2, %v2752_v38 }
 0x43d   : > { %7005 = vst [vmem:[#allocation24_spill] sm:$0xff] %v6504_v29 }
 0x43e   : > { %3069 = vmatmul.bf16.gmra.mxu3 %v7008_v17  ;;  %v6513_v23 = vsel %vm3174_vm11, %v2752_v38, %v3238_v26  ;;  %v2665_v33 = vpop.f32.mrf.mxu2 }
 0x43f   : > { %v2666_v52 = vadd.f32 %v2665_v33, %v7009_v34  ;;  %v7014_v34 = vld [vmem:[#allocation31_spill] sm:$0xff] }
 0x440   : > { %v6518_v62 = vpop.f32.mrf.mxu0 }
 0x441   : > { %v2754_v36 = vpop.f32.mrf.mxu3  ;;  %7010 = vst [vmem:[#allocation19_spill] sm:$0xff] %v6518_v62  ;;  %v6520_v29 = vpop.f32.mrf.mxu1 }
 0x442   : > { %v2755_v41 = vadd.f32 %v2754_v36, %v2666_v52  ;;  %7011 = vst [vmem:[#allocation23_spill] sm:$0xff] %v6520_v29  ;;  %v7013_v52 = vpack.c.bf16 %v6393_v21, %v6391_v2 }
 0x444   : > { %v3240_v3 = vmul.f32 0.2, %v2755_v41  ;;  %vm3176_vm12 = vcmp.ge.f32.partialorder %v2755_v41, 0.0 }
 0x446   : > { %v2667_v13 = vpop.f32.mrf.mxu2 }
 0x447   : > { %v2668_v37 = vadd.f32 %v2667_v13, %v6217_v24  ;;  %v6531_v24 = vsel %vm3176_vm12, %v2755_v41, %v3240_v3  ;;  %v7017_v3 = vld [vmem:[#allocation26_spill] sm:$0xff] }
 0x448   : > { %v2848_v55 = vpop.f32.mrf.mxu0 }
 0x449   : > { %v2756_v15 = vpop.f32.mrf.mxu3  ;;  %v2849_v26 = vadd.f32 %v2848_v55, %v6236_v48  ;;  %v2937_v17 = vpop.f32.mrf.mxu1 }
 0x44a   : > { %v2757_v38 = vadd.f32 %v2756_v15, %v2668_v37  ;;  %v7015_v15 = vld [vmem:[#allocation43_spill] sm:$0xff] }
 0x44b   : > { %v6524_v33 = vadd.f32 %v2937_v17, %v2849_v26  ;;  %2985 = vmatmul.bf16.gmra.mxu2 %v5911_v60  ;;  %3519 = vmatmul.bf16.gmra.mxu0 %v7013_v52  ;;  %v7016_v60 = vld [vmem:[#allocation44_spill] sm:$0xff] }
 0x44c   : > { %vm3178_vm13 = vcmp.ge.f32.partialorder %v2757_v38, 0.0  ;;  %v3242_v18 = vmul.f32 0.2, %v2757_v38 }
 0x44d   : > { %7012 = vst [vmem:[#allocation39_spill] sm:$0xff] %v6524_v33 }
 0x44e   : > { %3074 = vmatmul.bf16.gmra.mxu3 %v7014_v34  ;;  %v6533_v36 = vsel %vm3178_vm13, %v2757_v38, %v3242_v18  ;;  %v2670_v13 = vpop.f32.mrf.mxu2  ;;  %v7018_v18 = vpack.c.bf16 %v6413_v54, %v6411_v25  ;;  %v7019_v38 = vld [vmem:[#allocation41_spill] sm:$0xff] }
 0x44f   : > { %v3340_v37 = vpack.c.bf16 %v6533_v36, %v6531_v24  ;;  %v2671_v55 = vadd.f32 %v2670_v13, %v7015_v15 }
 0x451   : > { %v2759_v26 = vpop.f32.mrf.mxu3 }
 0x452   : > { %v2760_v17 = vadd.f32 %v2759_v26, %v2671_v55 }
 0x454   : > { %v3244_v2 = vmul.f32 0.2, %v2760_v17  ;;  %vm3180_vm14 = vcmp.ge.f32.partialorder %v2760_v17, 0.0 }
 0x456   : > { %v2672_v33 = vpop.f32.mrf.mxu2  ;;  %v6544_v52 = vsel %vm3180_vm14, %v2760_v17, %v3244_v2  ;;  %v7021_v2 = vpack.c.bf16 %v6433_v0, %v6431_v22  ;;  %v6559_v22 = vpop.f32.mrf.mxu0  ;;  %v7022_v0 = vpack.c.bf16 %v6453_v16, %v6451_v49  ;;  %v7023_v16 = vld [vmem:[#allocation34_spill] sm:$0xff] }
 0x457   : > { %v2673_v29 = vadd.f32 %v2672_v33, %v7016_v60 }
 0x459   : > { %v2761_v62 = vpop.f32.mrf.mxu3 }
 0x45a   : > { %v2762_v21 = vadd.f32 %v2761_v62, %v2673_v29  ;;  %v7020_v62 = vld [vmem:[#allocation56_spill] sm:$0xff] }
 0x45b   : > { %2990 = vmatmul.bf16.gmra.mxu2 %v7017_v3  ;;  %3524 = vmatmul.bf16.gmra.mxu0 %v7018_v18 }
 0x45c   : > { %vm3182_vm15 = vcmp.ge.f32.partialorder %v2762_v21, 0.0  ;;  %v3246_v41 = vmul.f32 0.2, %v2762_v21 }
 0x45e   : > { %3079 = vmatmul.bf16.gmra.mxu3 %v7019_v38  ;;  %v6546_v34 = vsel %vm3182_vm15, %v2762_v21, %v3246_v41  ;;  %v2951_v13 = vpop.f32.mrf.mxu2 }
 0x45f   : > { %v3342_v33 = vpack.c.bf16 %v6546_v34, %v6544_v52  ;;  %v2952_v15 = vadd.f32 %v2951_v13, %v7020_v62 }
 0x461   : > { %v3040_v29 = vpop.f32.mrf.mxu3 }
 0x462   : > { %v3041_v55 = vadd.f32 %v3040_v29, %v2952_v15 }
 0x464   : > { %v3185_v25 = vmul.f32 0.2, %v3041_v55  ;;  %vm3121_vm0 = vcmp.ge.f32.partialorder %v3041_v55, 0.0 }
 0x466   : > { %v2953_v26 = vpop.f32.mrf.mxu2  ;;  %v3249_v21 = vsel %vm3121_vm0, %v3041_v55, %v3185_v25 }
 0x467   : > { %v2954_v60 = vadd.f32 %v2953_v26, %v6250_v45 }
 0x469   : > { %v3042_v3 = vpop.f32.mrf.mxu3 }
 0x46a   : > { %v3043_v54 = vadd.f32 %v3042_v3, %v2954_v60 }
 0x46b   : > { %2995 = vmatmul.bf16.gmra.mxu2 %v5964_v11  ;;  %3529 = vmatmul.bf16.gmra.mxu0 %v7021_v2 }
 0x46c   : > { %vm3123_vm1 = vcmp.ge.f32.partialorder %v3043_v54, 0.0  ;;  %v3187_v17 = vmul.f32 0.2, %v3043_v54 }
 0x46e   : > { %3084 = vmatmul.bf16.gmra.mxu3 %v6157_v47  ;;  %v3251_v41 = vsel %vm3123_vm1, %v3043_v54, %v3187_v17  ;;  %v2956_v38 = vpop.f32.mrf.mxu2  ;;  %v6567_v17 = vpop.f32.mrf.mxu0 }
 0x46f   : > { %v3313_v18 = vpack.c.bf16 %v3251_v41, %v3249_v21  ;;  %v2957_v45 = vadd.f32 %v2956_v38, %v6254_v46  ;;  %v7024_v38 = vpack.c.bf16 %v6473_v9, %v6471_v6 }
 0x471   : > { %v3045_v13 = vpop.f32.mrf.mxu3  ;;  %3573 = vmatmul.bf16.vlgmr.msra.gmra.mxu1 %v3313_v18 }
 0x472   : > { %v3046_v29 = vadd.f32 %v3045_v13, %v2957_v45  ;;  %v7025_v13 = vld [vmem:[#allocation52_spill] sm:$0xff] }
 0x474   : > { %v3189_v11 = vmul.f32 0.2, %v3046_v29  ;;  %vm3125_vm2 = vcmp.ge.f32.partialorder %v3046_v29, 0.0 }
 0x476   : > { %v2958_v62 = vpop.f32.mrf.mxu2  ;;  %v3253_v46 = vsel %vm3125_vm2, %v3046_v29, %v3189_v11 }
 0x477   : > { %v2959_v15 = vadd.f32 %v2958_v62, %v6268_v58 }
 0x479   : > { %v3047_v26 = vpop.f32.mrf.mxu3 }
 0x47a   : > { %v3048_v60 = vadd.f32 %v3047_v26, %v2959_v15  ;;  %v6575_v15 = vpop.f32.mrf.mxu0  ;;  %v7026_v26 = vld [vmem:[#allocation45_spill] sm:$0xff] }
 0x47b   : > { %3000 = vmatmul.bf16.gmra.mxu2 %v5986_v53  ;;  %3534 = vmatmul.bf16.gmra.mxu0 %v7022_v0  ;;  %v7027_v0 = vld [vmem:[#allocation28_spill] sm:$0xff] }
 0x47c   : > { %vm3127_vm3 = vcmp.ge.f32.partialorder %v3048_v60, 0.0  ;;  %v3191_v47 = vmul.f32 0.2, %v3048_v60 }
 0x47e   : > { %3089 = vmatmul.bf16.gmra.mxu3 %v6171_v42  ;;  %v3255_v55 = vsel %vm3127_vm3, %v3048_v60, %v3191_v47  ;;  %v2961_v3 = vpop.f32.mrf.mxu2 }
 0x47f   : > { %v3315_v58 = vpack.c.bf16 %v3255_v55, %v3253_v46  ;;  %v2962_v54 = vadd.f32 %v2961_v3, %v6272_v8 }
 0x481   : > { %v3050_v25 = vpop.f32.mrf.mxu3  ;;  %3578 = vmatmul.bf16.gmra.mxu1 %v3315_v58 }
 0x482   : > { %v3051_v2 = vadd.f32 %v3050_v25, %v2962_v54  ;;  %v6579_v3 = vpop.f32.mrf.mxu0  ;;  %v7028_v25 = vld [vmem:[#allocation17_spill] sm:$0xff]  ;;  %v7029_v54 = vpack.c.bf16 %v6493_v4, %v6491_v30 }
 0x484   : > { %v3193_v18 = vmul.f32 0.2, %v3051_v2  ;;  %vm3129_vm4 = vcmp.ge.f32.partialorder %v3051_v2, 0.0 }
 0x486   : > { %v2963_v21 = vpop.f32.mrf.mxu2  ;;  %v3257_v8 = vsel %vm3129_vm4, %v3051_v2, %v3193_v18  ;;  %v7030_v2 = vld [vmem:[#allocation53_spill] sm:$0xff] }
 0x487   : > { %v2964_v53 = vadd.f32 %v2963_v21, %v6286_v27 }
 0x489   : > { %v3052_v41 = vpop.f32.mrf.mxu3 }
 0x48a   : > { %v3053_v49 = vadd.f32 %v3052_v41, %v2964_v53 }
 0x48b   : > { %3005 = vmatmul.bf16.gmra.mxu2 %v7023_v16  ;;  %3539 = vmatmul.bf16.gmra.mxu0 %v7024_v38  ;;  %v7031_v16 = vld [vmem:[#allocation13_spill] sm:$0xff] }
 0x48c   : > { %vm3131_vm5 = vcmp.ge.f32.partialorder %v3053_v49, 0.0  ;;  %v3195_v42 = vmul.f32 0.2, %v3053_v49 }
 0x48e   : > { %3094 = vmatmul.bf16.gmra.mxu3 %v7025_v13  ;;  %v3259_v45 = vsel %vm3131_vm5, %v3053_v49, %v3195_v42  ;;  %v2966_v29 = vpop.f32.mrf.mxu2  ;;  %v2796_v42 = vadd.f32 %v6321_v51, %v6236_v48  ;;  %v6589_v13 = vpop.f32.mrf.mxu0  ;;  %v7034_v51 = vpack.c.bf16 %v6513_v23, %v6511_v28 }
 0x48f   : > { %v3317_v62 = vpack.c.bf16 %v3259_v45, %v3257_v8  ;;  %v2967_v11 = vadd.f32 %v2966_v29, %v7026_v26  ;;  %v7032_v8 = vld [vmem:[#allocation46_spill] sm:$0xff] }
 0x490   : > { %v2885_v45 = vadd.f32 %v7032_v8, %v2796_v42 }
 0x491   : > { %v3055_v27 = vpop.f32.mrf.mxu3  ;;  %3583 = vmatmul.bf16.gmra.mxu1 %v3317_v62 }
 0x492   : > { %v3056_v60 = vadd.f32 %v3055_v27, %v2967_v11 }
 0x494   : > { %v3197_v6 = vmul.f32 0.2, %v3056_v60  ;;  %vm3133_vm6 = vcmp.ge.f32.partialorder %v3056_v60, 0.0 }
 0x496   : > { %v2968_v47 = vpop.f32.mrf.mxu2  ;;  %v3261_v21 = vsel %vm3133_vm6, %v3056_v60, %v3197_v6  ;;  %v7033_v60 = vld [vmem:[#allocation18_spill] sm:$0xff] }
 0x497   : > { %v2969_v46 = vadd.f32 %v2968_v47, %v7027_v0  ;;  %v7035_v47 = vld [vmem:[#allocation42_spill] sm:$0xff]  ;;  %v6597_v0 = vpop.f32.mrf.mxu0 }
 0x499   : > { %v3057_v55 = vpop.f32.mrf.mxu3 }
 0x49a   : > { %v3058_v9 = vadd.f32 %v3057_v55, %v2969_v46 }
 0x49b   : > { %3010 = vmatmul.bf16.gmra.mxu2 %v7028_v25  ;;  %3544 = vmatmul.bf16.gmra.mxu0 %v7029_v54  ;;  %v2801_v25 = vadd.f32 %v6340_v57, %v6236_v48  ;;  %v7036_v54 = vld [vmem:[#allocation33_spill] sm:$0xff] }
 0x49c   : > { %vm3135_vm7 = vcmp.ge.f32.partialorder %v3058_v9, 0.0  ;;  %v3199_v58 = vmul.f32 0.2, %v3058_v9 }
 0x49e   : > { %3099 = vmatmul.bf16.gmra.mxu3 %v7030_v2  ;;  %v3263_v53 = vsel %vm3135_vm7, %v3058_v9, %v3199_v58  ;;  %v2971_v41 = vpop.f32.mrf.mxu2 }
 0x49f   : > { %v3319_v18 = vpack.c.bf16 %v3263_v53, %v3261_v21  ;;  %v2972_v38 = vadd.f32 %v2971_v41, %v7031_v16  ;;  %v2890_v21 = vadd.f32 %v6342_v43, %v2801_v25  ;;  %v6603_v23 = vpop.f32.mrf.mxu0 }
 0x4a1   : > { %v3060_v49 = vpop.f32.mrf.mxu3  ;;  %3588 = vmatmul.bf16.gmra.mxu1 %v3319_v18 }
 0x4a2   : > { %v3061_v29 = vadd.f32 %v3060_v49, %v2972_v38 }
 0x4a4   : > { %v3201_v27 = vmul.f32 0.2, %v3061_v29  ;;  %vm3137_vm8 = vcmp.ge.f32.partialorder %v3061_v29, 0.0 }
 0x4a6   : > { %v2973_v30 = vpop.f32.mrf.mxu2  ;;  %v3265_v46 = vsel %vm3137_vm8, %v3061_v29, %v3201_v27  ;;  %v7037_v29 = vld [vmem:[#allocation47_spill] sm:$0xff] }
 0x4a7   : > { %v2974_v4 = vadd.f32 %v2973_v30, %v2885_v45  ;;  %v2806_v30 = vadd.f32 %v7037_v29, %v6236_v48  ;;  %v7044_v29 = vld [vmem:[#allocation48_spill] sm:$0xff] }
 0x4a9   : > { %v3062_v62 = vpop.f32.mrf.mxu3 }
 0x4aa   : > { %v3063_v26 = vadd.f32 %v3062_v62, %v2974_v4  ;;  %v6612_v4 = vpop.f32.mrf.mxu0  ;;  %v7038_v62 = vld [vmem:[#allocation35_spill] sm:$0xff] }
 0x4ab   : > { %3015 = vmatmul.bf16.gmra.mxu2 %v7033_v60  ;;  %3549 = vmatmul.bf16.gmra.mxu0 %v7034_v51 }
 0x4ac   : > { %vm3139_vm9 = vcmp.ge.f32.partialorder %v3063_v26, 0.0  ;;  %v3203_v11 = vmul.f32 0.2, %v3063_v26 }
 0x4ae   : > { %3104 = vmatmul.bf16.gmra.mxu3 %v7035_v47  ;;  %v3267_v55 = vsel %vm3139_vm9, %v3063_v26, %v3203_v11  ;;  %v2976_v6 = vpop.f32.mrf.mxu2 }
 0x4af   : > { %v3321_v9 = vpack.c.bf16 %v3267_v55, %v3265_v46  ;;  %v2977_v2 = vadd.f32 %v2976_v6, %v7036_v54  ;;  %v7040_v46 = vld [vmem:[#allocation25_spill] sm:$0xff]  ;;  %v7041_v55 = vld [vmem:[#allocation32_spill] sm:$0xff] }
 0x4b1   : > { %v3065_v58 = vpop.f32.mrf.mxu3  ;;  %3593 = vmatmul.bf16.gmra.mxu1 %v3321_v9 }
 0x4b2   : > { %v3066_v53 = vadd.f32 %v3065_v58, %v2977_v2  ;;  %v6616_v51 = vpop.f32.mrf.mxu0  ;;  %v2811_v2 = vadd.f32 %v6378_v50, %v6236_v48  ;;  %v2816_v50 = vadd.f32 %v6398_v14, %v6236_v48 }
 0x4b4   : > { %v3205_v49 = vmul.f32 0.2, %v3066_v53  ;;  %vm3141_vm10 = vcmp.ge.f32.partialorder %v3066_v53, 0.0 }
 0x4b6   : > { %v2978_v28 = vpop.f32.mrf.mxu2  ;;  %v3269_v57 = vsel %vm3141_vm10, %v3066_v53, %v3205_v49 }
 0x4b7   : > { %v2979_v41 = vadd.f32 %v2978_v28, %v2890_v21  ;;  %v7042_v21 = vld [vmem:[#allocation36_spill] sm:$0xff] }
 0x4b8   : > { %v7043_v28 = vld [vmem:[#allocation20_spill] sm:$0xff] }
 0x4b9   : > { %v3067_v18 = vpop.f32.mrf.mxu3 }
 0x4ba   : > { %v3068_v42 = vadd.f32 %v3067_v18, %v2979_v41  ;;  %v2900_v41 = vadd.f32 %v7043_v28, %v2811_v2 }
 0x4bb   : > { %3020 = vmatmul.bf16.gmra.mxu2 %v6080_v10  ;;  %3554 = vmatmul.bf16.gmra.mxu0 %v3340_v37  ;;  %v7039_v10 = vld [vmem:[#allocation15_spill] sm:$0xff] }
 0x4bc   : > { %vm3143_vm11 = vcmp.ge.f32.partialorder %v3068_v42, 0.0  ;;  %v3207_v16 = vmul.f32 0.2, %v3068_v42  ;;  %v2895_v26 = vadd.f32 %v7039_v10, %v2806_v30 }
 0x4be   : > { %3109 = vmatmul.bf16.gmra.mxu3 %v6227_v20  ;;  %v3271_v43 = vsel %vm3143_vm11, %v3068_v42, %v3207_v16  ;;  %v2981_v38 = vpop.f32.mrf.mxu2 }
 0x4bf   : > { %v3323_v8 = vpack.c.bf16 %v3271_v43, %v3269_v57  ;;  %v2982_v27 = vadd.f32 %v2981_v38, %v7038_v62  ;;  %v2905_v62 = vadd.f32 %v6400_v31, %v2816_v50 }
 0x4c1   : > { %v3070_v45 = vpop.f32.mrf.mxu3  ;;  %3598 = vmatmul.bf16.gmra.mxu1 %v3323_v8 }
 0x4c2   : > { %v3071_v11 = vadd.f32 %v3070_v45, %v2982_v27  ;;  %v6631_v27 = vpop.f32.mrf.mxu1 }
 0x4c4   : > { %v3209_v20 = vmul.f32 0.2, %v3071_v11  ;;  %vm3145_vm12 = vcmp.ge.f32.partialorder %v3071_v11, 0.0 }
 0x4c6   : > { %v2983_v24 = vpop.f32.mrf.mxu2  ;;  %v3273_v6 = vsel %vm3145_vm12, %v3071_v11, %v3209_v20 }
 0x4c7   : > { %v2984_v36 = vadd.f32 %v2983_v24, %v2895_v26 }
 0x4c9   : > { %v3072_v37 = vpop.f32.mrf.mxu3 }
 0x4ca   : > { %v3073_v60 = vadd.f32 %v3072_v37, %v2984_v36  ;;  %v6636_v36 = vld [vmem:[%s6791_s6] ss:$0 sm:$0xff] }
 0x4cb   : > { %3025 = vmatmul.bf16.gmra.mxu2 %v7040_v46  ;;  %3559 = vmatmul.bf16.gmra.mxu0 %v3342_v33  ;;  %v3486_v31 = vadd.f32 %v6636_v36, %v6567_v17  ;;  %v3488_v17 = vadd.f32 %v6636_v36, %v6575_v15 }
 0x4cc   : > { %vm3147_vm13 = vcmp.ge.f32.partialorder %v3073_v60, 0.0  ;;  %v3211_v47 = vmul.f32 0.2, %v3073_v60 }
 0x4ce   : > { %3114 = vmatmul.bf16.gmra.mxu3 %v7041_v55  ;;  %v3275_v9 = vsel %vm3147_vm13, %v3073_v60, %v3211_v47  ;;  %v2986_v58 = vpop.f32.mrf.mxu2 }
 0x4cf   : > { %v3325_v25 = vpack.c.bf16 %v3275_v9, %v3273_v6  ;;  %v2987_v53 = vadd.f32 %v2986_v58, %v7042_v21 }
 0x4d1   : > { %v3075_v54 = vpop.f32.mrf.mxu3  ;;  %3603 = vmatmul.bf16.gmra.mxu1 %v3325_v25 }
 0x4d2   : > { %v3076_v18 = vadd.f32 %v3075_v54, %v2987_v53  ;;  %v2821_v54 = vadd.f32 %v6418_v19, %v6236_v48 }
 0x4d4   : > { %v3213_v34 = vmul.f32 0.2, %v3076_v18  ;;  %vm3149_vm14 = vcmp.ge.f32.partialorder %v3076_v18, 0.0  ;;  %v2910_v53 = vadd.f32 %v6420_v12, %v2821_v54  ;;  %v3491_v12 = vadd.f32 %v6636_v36, %v6579_v3 }
 0x4d6   : > { %v2988_v49 = vpop.f32.mrf.mxu2  ;;  %v3277_v57 = vsel %vm3149_vm14, %v3076_v18, %v3213_v34 }
 0x4d7   : > { %v2989_v42 = vadd.f32 %v2988_v49, %v2900_v41 }
 0x4d9   : > { %v3077_v52 = vpop.f32.mrf.mxu3 }
 0x4da   : > { %v3078_v33 = vadd.f32 %v3077_v52, %v2989_v42 }
 0x4dc   : > { %vm3151_vm15 = vcmp.ge.f32.partialorder %v3078_v33, 0.0  ;;  %v3215_v16 = vmul.f32 0.2, %v3078_v33 }
 0x4de   : > { %v3279_v43 = vsel %vm3151_vm15, %v3078_v33, %v3215_v16  ;;  %v2991_v38 = vpop.f32.mrf.mxu2 }
 0x4df   : > { %v3327_v8 = vpack.c.bf16 %v3279_v43, %v3277_v57  ;;  %v2992_v30 = vadd.f32 %v2991_v38, %v7044_v29  ;;  %v6648_v57 = vpop.f32.mrf.mxu0 }
 0x4e1   : > { %v3080_v45 = vpop.f32.mrf.mxu3  ;;  %3608 = vmatmul.bf16.gmra.mxu1 %v3327_v8 }
 0x4e2   : > { %v3081_v10 = vadd.f32 %v3080_v45, %v2992_v30 }
 0x4e4   : > { %v3217_v37 = vmul.f32 0.2, %v3081_v10  ;;  %vm3153_vm0 = vcmp.ge.f32.partialorder %v3081_v10, 0.0 }
 0x4e6   : > { %v2993_v26 = vpop.f32.mrf.mxu2  ;;  %v3281_v47 = vsel %vm3153_vm0, %v3081_v10, %v3217_v37 }
 0x4e7   : > { %v2994_v11 = vadd.f32 %v2993_v26, %v2905_v62  ;;  %v2826_v26 = vadd.f32 %v6438_v61, %v6236_v48  ;;  %v6664_v61 = vpop.f32.mrf.mxu0 }
 0x4e9   : > { %v3082_v24 = vpop.f32.mrf.mxu3 }
 0x4ea   : > { %v3083_v20 = vadd.f32 %v3082_v24, %v2994_v11 }
 0x4ec   : > { %vm3155_vm1 = vcmp.ge.f32.partialorder %v3083_v20, 0.0  ;;  %v3219_v14 = vmul.f32 0.2, %v3083_v20 }
 0x4ee   : > { %v3574_v60 = vpop.f32.mrf.mxu1  ;;  %v3283_v46 = vsel %vm3155_vm1, %v3083_v20, %v3219_v14  ;;  %v2996_v6 = vpop.f32.mrf.mxu2  ;;  %v3493_v14 = vadd.f32 %v6636_v36, %v6589_v13 }
 0x4ef   : > { %v3575_v55 = vadd.f32 %v3574_v60, %v3486_v31  ;;  %v3329_v9 = vpack.c.bf16 %v3283_v46, %v3281_v47  ;;  %v2997_v2 = vadd.f32 %v2996_v6, %v6404_v44  ;;  %v2915_v31 = vadd.f32 %v6440_v63, %v2826_v26 }
 0x4f1   : > { %v3085_v58 = vpop.f32.mrf.mxu3  ;;  %v3654_v25 = vsub.f32 0.0, %v3575_v55  ;;  %3613 = vmatmul.bf16.gmra.mxu1 %v3329_v9 }
 0x4f2   : > { %v3086_v28 = vadd.f32 %v3085_v58, %v2997_v2 }
 0x4f3   : > { %v3686_v21 = vmul.f32 1.442695, %v3654_v25 }
 0x4f4   : > { %v3221_v19 = vmul.f32 0.2, %v3086_v28  ;;  %vm3157_vm2 = vcmp.ge.f32.partialorder %v3086_v28, 0.0 }
 0x4f5   : > { %4798 = vpow2.f32 %v3686_v21 }
 0x4f6   : > { %v3576_v41 = vpop.f32.mrf.mxu1  ;;  %v2998_v49 = vpop.f32.mrf.mxu2  ;;  %v3285_v8 = vsel %vm3157_vm2, %v3086_v28, %v3221_v19 }
 0x4f7   : > { %v3577_v18 = vadd.f32 %v3576_v41, %v3488_v17  ;;  %v2999_v42 = vadd.f32 %v2998_v49, %v2910_v53  ;;  %v3496_v17 = vadd.f32 %v6636_v36, %v6597_v0 }
 0x4f9   : > { %v3087_v52 = vpop.f32.mrf.mxu3  ;;  %v3655_v34 = vsub.f32 0.0, %v3577_v18 }
 0x4fa   : > { %v3088_v33 = vadd.f32 %v3087_v52, %v2999_v42  ;;  %v6669_v52 = vpop.f32.mrf.mxu0 }
 0x4fb   : > { %v4799_v44 = vpop.eup %4798  ;;  %v3688_v16 = vmul.f32 1.442695, %v3655_v34 }
 0x4fc   : > { %v3750_v15 = vadd.f32 1.0, %v4799_v44  ;;  %vm3159_vm3 = vcmp.ge.f32.partialorder %v3088_v33, 0.0  ;;  %v3223_v43 = vmul.f32 0.2, %v3088_v33 }
 0x4fd   : > { %4800 = vpow2.f32 %v3688_v16 }
 0x4fe   : > { %4802 = vrcp.f32 %v3750_v15  ;;  %v3579_v38 = vpop.f32.mrf.mxu1  ;;  %v3287_v45 = vsel %vm3159_vm3, %v3088_v33, %v3223_v43  ;;  %v3001_v29 = vpop.f32.mrf.mxu2  ;;  %v2831_v33 = vadd.f32 %v6458_v35, %v6236_v48 }
 0x4ff   : > { %v3580_v50 = vadd.f32 %v3579_v38, %v3491_v12  ;;  %v3331_v30 = vpack.c.bf16 %v3287_v45, %v3285_v8  ;;  %v3002_v3 = vadd.f32 %v3001_v29, %v6424_v59  ;;  %v3498_v12 = vadd.f32 %v6636_v36, %v6603_v23 }
 0x500   : > { %v2920_v38 = vadd.f32 %v6460_v5, %v2831_v33 }
 0x501   : > { %v3090_v62 = vpop.f32.mrf.mxu3  ;;  %v3656_v10 = vsub.f32 0.0, %v3580_v50  ;;  %3618 = vmatmul.bf16.gmra.mxu1 %v3331_v30 }
 0x502   : > { %v3091_v60 = vadd.f32 %v3090_v62, %v3002_v3  ;;  %v6678_v62 = vpop.f32.mrf.mxu0 }
 0x503   : > { %v4801_v11 = vpop.eup %4800  ;;  %v3690_v24 = vmul.f32 1.442695, %v3656_v10 }
 0x504   : > { %v4803_v37 = vpop.eup %4802  ;;  %v3751_v20 = vadd.f32 1.0, %v4801_v11  ;;  %v3225_v58 = vmul.f32 0.2, %v3091_v60  ;;  %vm3161_vm4 = vcmp.ge.f32.partialorder %v3091_v60, 0.0 }
 0x505   : > { %3814 = vst [vmem:[%s6657_s8] sm:$0xff] %v4803_v37  ;;  %4804 = vpow2.f32 %v3690_v24  ;;  %v3501_v37 = vadd.f32 %v6636_v36, %v6612_v4 }
 0x506   : > { %4806 = vrcp.f32 %v3751_v20  ;;  %v3581_v47 = vpop.f32.mrf.mxu1  ;;  %v3003_v55 = vpop.f32.mrf.mxu2  ;;  %v3289_v28 = vsel %vm3161_vm4, %v3091_v60, %v3225_v58 }
 0x507   : > { %v3582_v46 = vadd.f32 %v3581_v47, %v3493_v14  ;;  %v3004_v59 = vadd.f32 %v3003_v55, %v2915_v31 }
 0x509   : > { %v3092_v6 = vpop.f32.mrf.mxu3  ;;  %v3657_v9 = vsub.f32 0.0, %v3582_v46 }
 0x50a   : > { %v3093_v25 = vadd.f32 %v3092_v6, %v3004_v59  ;;  %v2836_v6 = vadd.f32 %v6478_v39, %v6236_v48 }
 0x50b   : > { %v4805_v54 = vpop.eup %4804  ;;  %v3692_v13 = vmul.f32 1.442695, %v3657_v9 }
 0x50c   : > { %v4807_v2 = vpop.eup %4806  ;;  %v3752_v21 = vadd.f32 1.0, %v4805_v54  ;;  %vm3163_vm5 = vcmp.ge.f32.partialorder %v3093_v25, 0.0  ;;  %v3227_v63 = vmul.f32 0.2, %v3093_v25  ;;  %v6686_v54 = vpop.f32.mrf.mxu0 }
 0x50d   : > { %3815 = vst [vmem:[%s6657_s8 + $0x8] sm:$0xff] %v4807_v2  ;;  %4808 = vpow2.f32 %v3692_v13  ;;  %v3503_v2 = vadd.f32 %v6636_v36, %v6616_v51 }
 0x50e   : > { %4810 = vrcp.f32 %v3752_v21  ;;  %v3584_v53 = vpop.f32.mrf.mxu1  ;;  %v3291_v41 = vsel %vm3163_vm5, %v3093_v25, %v3227_v63  ;;  %v3006_v49 = vpop.f32.mrf.mxu2  ;;  %v2925_v21 = vadd.f32 %v6480_v32, %v2836_v6  ;;  %v3506_v32 = vadd.f32 %v6636_v36, %v6648_v57 }
 0x50f   : > { %v3585_v18 = vadd.f32 %v3584_v53, %v3496_v17  ;;  %v3333_v42 = vpack.c.bf16 %v3291_v41, %v3289_v28  ;;  %v3007_v0 = vadd.f32 %v3006_v49, %v6444_v40 }
 0x511   : > { %v3095_v34 = vpop.f32.mrf.mxu3  ;;  %v3658_v19 = vsub.f32 0.0, %v3585_v18  ;;  %3623 = vmatmul.bf16.gmra.mxu1 %v3333_v42 }
 0x512   : > { %v3096_v8 = vadd.f32 %v3095_v34, %v3007_v0 }
 0x513   : > { %v4809_v44 = vpop.eup %4808  ;;  %v3694_v16 = vmul.f32 1.442695, %v3658_v19 }
 0x514   : > { %v4811_v15 = vpop.eup %4810  ;;  %v3753_v43 = vadd.f32 1.0, %v4809_v44  ;;  %v3229_v10 = vmul.f32 0.2, %v3096_v8  ;;  %vm3165_vm6 = vcmp.ge.f32.partialorder %v3096_v8, 0.0  ;;  %v6695_v0 = vpop.f32.mrf.mxu0 }
 0x515   : > { %3816 = vst [vmem:[%s6657_s8 + $0x10] sm:$0xff] %v4811_v15  ;;  %4812 = vpow2.f32 %v3694_v16 }
 0x516   : > { %4814 = vrcp.f32 %v3753_v43  ;;  %v3586_v45 = vpop.f32.mrf.mxu1  ;;  %v3008_v29 = vpop.f32.mrf.mxu2  ;;  %v3293_v14 = vsel %vm3165_vm6, %v3096_v8, %v3229_v10  ;;  %v3508_v10 = vadd.f32 %v6636_v36, %v6664_v61 }
 0x517   : > { %v3587_v50 = vadd.f32 %v3586_v45, %v3498_v12  ;;  %v3009_v35 = vadd.f32 %v3008_v29, %v2920_v38 }
 0x519   : > { %v3097_v30 = vpop.f32.mrf.mxu3  ;;  %v3659_v40 = vsub.f32 0.0, %v3587_v50  ;;  %v2841_v50 = vadd.f32 %v6498_v56, %v6236_v48 }
 0x51a   : > { %v3098_v26 = vadd.f32 %v3097_v30, %v3009_v35 }
 0x51b   : > { %v4813_v3 = vpop.eup %4812  ;;  %v3696_v23 = vmul.f32 1.442695, %v3659_v40 }
 0x51c   : > { %v4815_v11 = vpop.eup %4814  ;;  %v3754_v24 = vadd.f32 1.0, %v4813_v3  ;;  %vm3167_vm7 = vcmp.ge.f32.partialorder %v3098_v26, 0.0  ;;  %v3231_v5 = vmul.f32 0.2, %v3098_v26  ;;  %v6704_v56 = vpop.f32.mrf.mxu0 }
 0x51d   : > { %3817 = vst [vmem:[%s6657_s8 + $0x18] sm:$0xff] %v4815_v11  ;;  %4816 = vpow2.f32 %v3696_v23 }
 0x51e   : > { %4818 = vrcp.f32 %v3754_v24  ;;  %v3589_v20 = vpop.f32.mrf.mxu1  ;;  %v3295_v31 = vsel %vm3167_vm7, %v3098_v26, %v3231_v5  ;;  %v3011_v47 = vpop.f32.mrf.mxu2  ;;  %v7046_v26 = vld [vmem:[#allocation37_spill] sm:$0xff] }
 0x51f   : > { %v3590_v60 = vadd.f32 %v3589_v20, %v3501_v37  ;;  %v3335_v46 = vpack.c.bf16 %v3295_v31, %v3293_v14  ;;  %v3012_v9 = vadd.f32 %v3011_v47, %v6464_v1  ;;  %v2930_v3 = vadd.f32 %v7046_v26, %v2841_v50 }
 0x521   : > { %v3100_v55 = vpop.f32.mrf.mxu3  ;;  %v3660_v59 = vsub.f32 0.0, %v3590_v60  ;;  %3628 = vmatmul.bf16.gmra.mxu1 %v3335_v46 }
 0x522   : > { %v3101_v63 = vadd.f32 %v3100_v55, %v3012_v9 }
 0x523   : > { %v4817_v58 = vpop.eup %4816  ;;  %v3698_v4 = vmul.f32 1.442695, %v3660_v59  ;;  %v3511_v59 = vadd.f32 %v6636_v36, %v6669_v52 }
 0x524   : > { %v4819_v25 = vpop.eup %4818  ;;  %v3755_v13 = vadd.f32 1.0, %v4817_v58  ;;  %v3233_v18 = vmul.f32 0.2, %v3101_v63  ;;  %vm3169_vm8 = vcmp.ge.f32.partialorder %v3101_v63, 0.0 }
 0x525   : > { %3818 = vst [vmem:[%s6657_s8 + $0x20] sm:$0xff] %v4819_v25  ;;  %4820 = vpow2.f32 %v3698_v4 }
 0x526   : > { %4822 = vrcp.f32 %v3755_v13  ;;  %v3591_v17 = vpop.f32.mrf.mxu1  ;;  %v3013_v53 = vpop.f32.mrf.mxu2  ;;  %v3297_v16 = vsel %vm3169_vm8, %v3101_v63, %v3233_v18  ;;  %v7047_v63 = vld [vmem:[#allocation19_spill] sm:$0xff] }
 0x527   : > { %v3592_v39 = vadd.f32 %v3591_v17, %v3503_v2  ;;  %v3014_v1 = vadd.f32 %v3013_v53, %v2925_v21  ;;  %v2846_v17 = vadd.f32 %v7047_v63, %v6236_v48  ;;  %v7048_v53 = vld [vmem:[#allocation24_spill] sm:$0xff] }
 0x529   : > { %v3102_v28 = vpop.f32.mrf.mxu3  ;;  %v3661_v41 = vsub.f32 0.0, %v3592_v39  ;;  %v6711_v39 = vpop.f32.mrf.mxu0 }
 0x52a   : > { %v3103_v49 = vadd.f32 %v3102_v28, %v3014_v1 }
 0x52b   : > { %v4821_v42 = vpop.eup %4820  ;;  %v3700_v34 = vmul.f32 1.442695, %v3661_v41 }
 0x52c   : > { %v4823_v19 = vpop.eup %4822  ;;  %v3756_v51 = vadd.f32 1.0, %v4821_v42  ;;  %vm3171_vm9 = vcmp.ge.f32.partialorder %v3103_v49, 0.0  ;;  %v3235_v33 = vmul.f32 0.2, %v3103_v49  ;;  %v7049_v42 = vld [vmem:[#allocation23_spill] sm:$0xff] }
 0x52d   : > { %3819 = vst [vmem:[%s6657_s8 + $0x28] sm:$0xff] %v4823_v19  ;;  %4824 = vpow2.f32 %v3700_v34  ;;  %v2935_v34 = vadd.f32 %v7049_v42, %v2846_v17 }
 0x52e   : > { %4826 = vrcp.f32 %v3756_v51  ;;  %v3594_v44 = vpop.f32.mrf.mxu1  ;;  %v3299_v15 = vsel %vm3171_vm9, %v3103_v49, %v3235_v33  ;;  %v3016_v12 = vpop.f32.mrf.mxu2  ;;  %v3513_v49 = vadd.f32 %v6636_v36, %v6678_v62 }
 0x52f   : > { %v3595_v43 = vadd.f32 %v3594_v44, %v3506_v32  ;;  %v3337_v38 = vpack.c.bf16 %v3299_v15, %v3297_v16  ;;  %v3017_v57 = vadd.f32 %v3016_v12, %v6484_v7 }
 0x531   : > { %v3105_v8 = vpop.f32.mrf.mxu3  ;;  %v3662_v45 = vsub.f32 0.0, %v3595_v43  ;;  %3633 = vmatmul.bf16.gmra.mxu1 %v3337_v38  ;;  %v6718_v62 = vpop.f32.mrf.mxu0 }
 0x532   : > { %v3106_v23 = vadd.f32 %v3105_v8, %v3017_v57 }
 0x533   : > { %v4825_v29 = vpop.eup %4824  ;;  %v3702_v35 = vmul.f32 1.442695, %v3662_v45 }
 0x534   : > { %v4827_v30 = vpop.eup %4826  ;;  %v3757_v40 = vadd.f32 1.0, %v4825_v29  ;;  %v3237_v14 = vmul.f32 0.2, %v3106_v23  ;;  %vm3173_vm10 = vcmp.ge.f32.partialorder %v3106_v23, 0.0  ;;  %v3516_v29 = vadd.f32 %v6636_v36, %v6686_v54 }
 0x535   : > { %3820 = vst [vmem:[%s6657_s8 + $0x30] sm:$0xff] %v4827_v30  ;;  %4828 = vpow2.f32 %v3702_v35 }
 0x536   : > { %4830 = vrcp.f32 %v3757_v40  ;;  %v3596_v11 = vpop.f32.mrf.mxu1  ;;  %v3018_v5 = vpop.f32.mrf.mxu2  ;;  %v3301_v9 = vsel %vm3173_vm10, %v3106_v23, %v3237_v14 }
 0x537   : > { %v3597_v24 = vadd.f32 %v3596_v11, %v3508_v10  ;;  %v3019_v7 = vadd.f32 %v3018_v5, %v2930_v3  ;;  %v7050_v5 = vld [vmem:[#allocation39_spill] sm:$0xff] }
 0x539   : > { %v3107_v37 = vpop.f32.mrf.mxu3  ;;  %v3663_v20 = vsub.f32 0.0, %v3597_v24  ;;  %v2851_v24 = vadd.f32 %v6559_v22, %v6236_v48 }
 0x53a   : > { %v3108_v31 = vadd.f32 %v3107_v37, %v3019_v7 }
 0x53b   : > { %v4829_v60 = vpop.eup %4828  ;;  %v3704_v61 = vmul.f32 1.442695, %v3663_v20 }
 0x53c   : > { %v4831_v47 = vpop.eup %4830  ;;  %v3758_v46 = vadd.f32 1.0, %v4829_v60  ;;  %vm3175_vm11 = vcmp.ge.f32.partialorder %v3108_v31, 0.0  ;;  %v3239_v55 = vmul.f32 0.2, %v3108_v31  ;;  %v2940_v60 = vadd.f32 %v6631_v27, %v2851_v24 }
 0x53d   : > { %3821 = vst [vmem:[%s6657_s8 + $0x38] sm:$0xff] %v4831_v47  ;;  %4832 = vpow2.f32 %v3704_v61  ;;  %v3527_v61 = vpop.f32.mrf.mxu0  ;;  %v3521_v27 = vadd.f32 %v6636_v36, %v6704_v56  ;;  %v3523_v56 = vadd.f32 %v6636_v36, %v6711_v39 }
 0x53e   : > { %4834 = vrcp.f32 %v3758_v46  ;;  %v3599_v6 = vpop.f32.mrf.mxu1  ;;  %v3303_v58 = vsel %vm3175_vm11, %v3108_v31, %v3239_v55  ;;  %v3021_v25 = vpop.f32.mrf.mxu2  ;;  %v3518_v31 = vadd.f32 %v6636_v36, %v6695_v0 }
 0x53f   : > { %v3600_v4 = vadd.f32 %v3599_v6, %v3511_v59  ;;  %v3339_v13 = vpack.c.bf16 %v3303_v58, %v3301_v9  ;;  %v3022_v52 = vadd.f32 %v3021_v25, %v7048_v53 }
 0x541   : > { %v3110_v2 = vpop.f32.mrf.mxu3  ;;  %v3664_v21 = vsub.f32 0.0, %v3600_v4  ;;  %3638 = vmatmul.bf16.gmra.mxu1 %v3339_v13 }
 0x542   : > { %v3111_v19 = vadd.f32 %v3110_v2, %v3022_v52 }
 0x543   : > { %v4833_v1 = vpop.eup %4832  ;;  %v3706_v28 = vmul.f32 1.442695, %v3664_v21 }
 0x544   : > { %v4835_v41 = vpop.eup %4834  ;;  %v3759_v18 = vadd.f32 1.0, %v4833_v1  ;;  %v3241_v43 = vmul.f32 0.2, %v3111_v19  ;;  %vm3177_vm12 = vcmp.ge.f32.partialorder %v3111_v19, 0.0 }
 0x545   : > { %3822 = vst [vmem:[%s6657_s8 + $0x40] sm:$0xff] %v4835_v41  ;;  %4836 = vpow2.f32 %v3706_v28  ;;  %v3530_v1 = vpop.f32.mrf.mxu0 }
 0x546   : > { %4838 = vrcp.f32 %v3759_v18  ;;  %v3601_v51 = vpop.f32.mrf.mxu1  ;;  %v3023_v32 = vpop.f32.mrf.mxu2  ;;  %v3305_v30 = vsel %vm3177_vm12, %v3111_v19, %v3241_v43  ;;  %v3526_v43 = vadd.f32 %v6636_v36, %v6718_v62 }
 0x547   : > { %v3602_v33 = vadd.f32 %v3601_v51, %v3513_v49  ;;  %v3024_v44 = vadd.f32 %v3023_v32, %v2935_v34 }
 0x549   : > { %v3112_v16 = vpop.f32.mrf.mxu3  ;;  %v3665_v15 = vsub.f32 0.0, %v3602_v33 }
 0x54a   : > { %v3113_v12 = vadd.f32 %v3112_v16, %v3024_v44 }
 0x54b   : > { %v4837_v38 = vpop.eup %4836  ;;  %v3708_v8 = vmul.f32 1.442695, %v3665_v15 }
 0x54c   : > { %v4839_v45 = vpop.eup %4838  ;;  %v3760_v50 = vadd.f32 1.0, %v4837_v38  ;;  %vm3179_vm13 = vcmp.ge.f32.partialorder %v3113_v12, 0.0  ;;  %v3243_v57 = vmul.f32 0.2, %v3113_v12 }
 0x54d   : > { %3823 = vst [vmem:[%s6657_s8 + $0x48] sm:$0xff] %v4839_v45  ;;  %4840 = vpow2.f32 %v3708_v8  ;;  %v3532_v33 = vpop.f32.mrf.mxu0 }
 0x54e   : > { %4842 = vrcp.f32 %v3760_v50  ;;  %v3604_v35 = vpop.f32.mrf.mxu1  ;;  %v3307_v40 = vsel %vm3179_vm13, %v3113_v12, %v3243_v57  ;;  %v3026_v26 = vpop.f32.mrf.mxu2 }
 0x54f   : > { %v3605_v10 = vadd.f32 %v3604_v35, %v3516_v29  ;;  %v3341_v3 = vpack.c.bf16 %v3307_v40, %v3305_v30  ;;  %v3027_v7 = vadd.f32 %v3026_v26, %v7050_v5  ;;  %v3528_v35 = vadd.f32 %v6636_v36, %v3527_v61 }
 0x551   : > { %v3115_v23 = vpop.f32.mrf.mxu3  ;;  %v3666_v11 = vsub.f32 0.0, %v3605_v10  ;;  %3643 = vmatmul.bf16.gmra.mxu1 %v3341_v3 }
 0x552   : > { %v3116_v47 = vadd.f32 %v3115_v23, %v3027_v7 }
 0x553   : > { %v4841_v37 = vpop.eup %4840  ;;  %v3710_v54 = vmul.f32 1.442695, %v3666_v11  ;;  %v3531_v11 = vadd.f32 %v6636_v36, %v3530_v1 }
 0x554   : > { %v4843_v20 = vpop.eup %4842  ;;  %v3761_v14 = vadd.f32 1.0, %v4841_v37  ;;  %v3245_v9 = vmul.f32 0.2, %v3116_v47  ;;  %vm3181_vm14 = vcmp.ge.f32.partialorder %v3116_v47, 0.0 }
 0x555   : > { %3824 = vst [vmem:[%s6657_s8 + $0x50] sm:$0xff] %v4843_v20  ;;  %4844 = vpow2.f32 %v3710_v54  ;;  %v3535_v57 = vpop.f32.mrf.mxu0 }
 0x556   : > { %4846 = vrcp.f32 %v3761_v14  ;;  %v3606_v46 = vpop.f32.mrf.mxu1  ;;  %v3028_v48 = vpop.f32.mrf.mxu2  ;;  %v3309_v63 = vsel %vm3181_vm14, %v3116_v47, %v3245_v9  ;;  %v3536_v9 = vadd.f32 %v6636_v36, %v3535_v57 }
 0x557   : > { %v3607_v55 = vadd.f32 %v3606_v46, %v3518_v31  ;;  %v3029_v22 = vadd.f32 %v3028_v48, %v2940_v60  ;;  %v3533_v60 = vadd.f32 %v6636_v36, %v3532_v33 }
 0x559   : > { %v3667_v59 = vsub.f32 0.0, %v3607_v55  ;;  %v3117_v6 = vpop.f32.mrf.mxu3 }
 0x55a   : > { %v3118_v58 = vadd.f32 %v3117_v6, %v3029_v22 }
 0x55b   : > { %v4845_v4 = vpop.eup %4844  ;;  %v3712_v25 = vmul.f32 1.442695, %v3667_v59 }
 0x55c   : > { %v4847_v0 = vpop.eup %4846  ;;  %v3762_v13 = vadd.f32 1.0, %v4845_v4  ;;  %vm3183_vm15 = vcmp.ge.f32.partialorder %v3118_v58, 0.0  ;;  %v3247_v2 = vmul.f32 0.2, %v3118_v58 }
 0x55d   : > { %3825 = vst [vmem:[%s6657_s8 + $0x58] sm:$0xff] %v4847_v0  ;;  %4848 = vpow2.f32 %v3712_v25  ;;  %v3537_v24 = vpop.f32.mrf.mxu0 }
 0x55e   : > { %4850 = vrcp.f32 %v3762_v13  ;;  %v3609_v21 = vpop.f32.mrf.mxu1  ;;  %v3311_v17 = vsel %vm3183_vm15, %v3118_v58, %v3247_v2 }
 0x55f   : > { %v3610_v53 = vadd.f32 %v3609_v21, %v3521_v27  ;;  %v3343_v52 = vpack.c.bf16 %v3311_v17, %v3309_v63  ;;  %v3538_v63 = vadd.f32 %v6636_v36, %v3537_v24 }
 0x561   : > { %v3668_v28 = vsub.f32 0.0, %v3610_v53  ;;  %3648 = vmatmul.bf16.gmra.mxu1 %v3343_v52 }
 0x563   : > { %v4849_v41 = vpop.eup %4848  ;;  %v3714_v18 = vmul.f32 1.442695, %v3668_v28 }
 0x564   : > { %v4851_v49 = vpop.eup %4850  ;;  %v3763_v42 = vadd.f32 1.0, %v4849_v41 }
 0x565   : > { %3826 = vst [vmem:[%s6657_s8 + $0x60] sm:$0xff] %v4851_v49  ;;  %4852 = vpow2.f32 %v3714_v18  ;;  %v3540_v46 = vpop.f32.mrf.mxu0 }
 0x566   : > { %4854 = vrcp.f32 %v3763_v42  ;;  %v3611_v34 = vpop.f32.mrf.mxu1  ;;  %v3541_v42 = vadd.f32 %v6636_v36, %v3540_v46 }
 0x567   : > { %v3612_v19 = vadd.f32 %v3611_v34, %v3523_v56 }
 0x569   : > { %v3669_v51 = vsub.f32 0.0, %v3612_v19 }
 0x56b   : > { %v4853_v32 = vpop.eup %4852  ;;  %v3716_v44 = vmul.f32 1.442695, %v3669_v51 }
 0x56c   : > { %v4855_v16 = vpop.eup %4854  ;;  %v3764_v15 = vadd.f32 1.0, %v4853_v32 }
 0x56d   : > { %3827 = vst [vmem:[%s6657_s8 + $0x68] sm:$0xff] %v4855_v16  ;;  %4856 = vpow2.f32 %v3716_v44  ;;  %v3542_v0 = vpop.f32.mrf.mxu0 }
 0x56e   : > { %4858 = vrcp.f32 %v3764_v15  ;;  %v3614_v12 = vpop.f32.mrf.mxu1  ;;  %v3543_v16 = vadd.f32 %v6636_v36, %v3542_v0 }
 0x56f   : > { %v3615_v39 = vadd.f32 %v3614_v12, %v3526_v43 }
 0x571   : > { %v3670_v38 = vsub.f32 0.0, %v3615_v39 }
 0x573   : > { %v4857_v8 = vpop.eup %4856  ;;  %v3718_v45 = vmul.f32 1.442695, %v3670_v38 }
 0x574   : > { %v4859_v50 = vpop.eup %4858  ;;  %v3765_v29 = vadd.f32 1.0, %v4857_v8 }
 0x575   : > { %3828 = vst [vmem:[%s6657_s8 + $0x70] sm:$0xff] %v4859_v50  ;;  %4860 = vpow2.f32 %v3718_v45  ;;  %v3545_v18 = vpop.f32.mrf.mxu0 }
 0x576   : > { %4862 = vrcp.f32 %v3765_v29  ;;  %v3616_v30 = vpop.f32.mrf.mxu1  ;;  %v3546_v57 = vadd.f32 %v6636_v36, %v3545_v18 }
 0x577   : > { %v3617_v40 = vadd.f32 %v3616_v30, %v3528_v35 }
 0x579   : > { %v3671_v62 = vsub.f32 0.0, %v3617_v40 }
 0x57b   : > { %v4861_v10 = vpop.eup %4860  ;;  %v3720_v26 = vmul.f32 1.442695, %v3671_v62 }
 0x57c   : > { %v4863_v3 = vpop.eup %4862  ;;  %v3766_v23 = vadd.f32 1.0, %v4861_v10 }
 0x57d   : > { %3829 = vst [vmem:[%s6657_s8 + $0x78] sm:$0xff] %v4863_v3  ;;  %4864 = vpow2.f32 %v3720_v26  ;;  %v3547_v15 = vpop.f32.mrf.mxu0 }
 0x57e   : > { %4866 = vrcp.f32 %v3766_v23  ;;  %v3619_v5 = vpop.f32.mrf.mxu1  ;;  %v3548_v23 = vadd.f32 %v6636_v36, %v3547_v15 }
 0x57f   : > { %v3620_v7 = vadd.f32 %v3619_v5, %v3531_v11 }
 0x581   : > { %v3672_v37 = vsub.f32 0.0, %v3620_v7 }
 0x583   : > { %v4865_v54 = vpop.eup %4864  ;;  %v3722_v20 = vmul.f32 1.442695, %v3672_v37 }
 0x584   : > { %v4867_v14 = vpop.eup %4866  ;;  %v3767_v31 = vadd.f32 1.0, %v4865_v54 }
 0x585   : > { %3830 = vst [vmem:[%s6657_s8 + $0x80] sm:$0xff] %v4867_v14  ;;  %4868 = vpow2.f32 %v3722_v20  ;;  %v3550_v30 = vpop.f32.mrf.mxu0 }
 0x586   : > { %4870 = vrcp.f32 %v3767_v31  ;;  %v3621_v61 = vpop.f32.mrf.mxu1  ;;  %v3551_v31 = vadd.f32 %v6636_v36, %v3550_v30 }
 0x587   : > { %v3622_v47 = vadd.f32 %v3621_v61, %v3533_v60 }
 0x589   : > { %v3673_v55 = vsub.f32 0.0, %v3622_v47 }
 0x58b   : > { %v4869_v48 = vpop.eup %4868  ;;  %v3724_v22 = vmul.f32 1.442695, %v3673_v55 }
 0x58c   : > { %v4871_v59 = vpop.eup %4870  ;;  %v3768_v6 = vadd.f32 1.0, %v4869_v48 }
 0x58d   : > { %3831 = vst [vmem:[%s6657_s8 + $0x88] sm:$0xff] %v4871_v59  ;;  %4872 = vpow2.f32 %v3724_v22  ;;  %v3552_v7 = vpop.f32.mrf.mxu0 }
 0x58e   : > { %4874 = vrcp.f32 %v3768_v6  ;;  %v3624_v58 = vpop.f32.mrf.mxu1  ;;  %v3553_v6 = vadd.f32 %v6636_v36, %v3552_v7 }
 0x58f   : > { %v3625_v4 = vadd.f32 %v3624_v58, %v3536_v9 }
 0x591   : > { %v3674_v25 = vsub.f32 0.0, %v3625_v4 }
 0x593   : > { %v4873_v13 = vpop.eup %4872  ;;  %v3726_v2 = vmul.f32 1.442695, %v3674_v25 }
 0x594   : > { %v4875_v27 = vpop.eup %4874  ;;  %v3769_v21 = vadd.f32 1.0, %v4873_v13 }
 0x595   : > { %3832 = vst [vmem:[%s6657_s8 + $0x90] sm:$0xff] %v4875_v27  ;;  %4876 = vpow2.f32 %v3726_v2  ;;  %v3555_v22 = vpop.f32.mrf.mxu0 }
 0x596   : > { %4878 = vrcp.f32 %v3769_v21  ;;  %v3626_v17 = vpop.f32.mrf.mxu1  ;;  %v3556_v27 = vadd.f32 %v6636_v36, %v3555_v22 }
 0x597   : > { %v3627_v53 = vadd.f32 %v3626_v17, %v3538_v63 }
 0x599   : > { %v3675_v52 = vsub.f32 0.0, %v3627_v53 }
 0x59b   : > { %v4877_v1 = vpop.eup %4876  ;;  %v3728_v28 = vmul.f32 1.442695, %v3675_v52 }
 0x59c   : > { %v4879_v41 = vpop.eup %4878  ;;  %v3770_v49 = vadd.f32 1.0, %v4877_v1 }
 0x59d   : > { %3833 = vst [vmem:[%s6657_s8 + $0x98] sm:$0xff] %v4879_v41  ;;  %4880 = vpow2.f32 %v3728_v28  ;;  %v3557_v21 = vpop.f32.mrf.mxu0 }
 0x59e   : > { %4882 = vrcp.f32 %v3770_v49  ;;  %v3629_v56 = vpop.f32.mrf.mxu1  ;;  %v3558_v18 = vadd.f32 %v6636_v36, %v3557_v21 }
 0x59f   : > { %v3630_v34 = vadd.f32 %v3629_v56, %v3541_v42 }
 0x5a1   : > { %v3676_v19 = vsub.f32 0.0, %v3630_v34 }
 0x5a3   : > { %v4881_v51 = vpop.eup %4880  ;;  %v3730_v33 = vmul.f32 1.442695, %v3676_v19 }
 0x5a4   : > { %v4883_v32 = vpop.eup %4882  ;;  %v3771_v44 = vadd.f32 1.0, %v4881_v51 }
 0x5a5   : > { %3834 = vst [vmem:[%s6657_s8 + $0xa0] sm:$0xff] %v4883_v32  ;;  %4884 = vpow2.f32 %v3730_v33  ;;  %v3560_v56 = vpop.f32.mrf.mxu0 }
 0x5a6   : > { %4886 = vrcp.f32 %v3771_v44  ;;  %v3631_v43 = vpop.f32.mrf.mxu1  ;;  %v3561_v44 = vadd.f32 %v6636_v36, %v3560_v56 }
 0x5a7   : > { %v3632_v12 = vadd.f32 %v3631_v43, %v3543_v16 }
 0x5a9   : > { %v3677_v39 = vsub.f32 0.0, %v3632_v12 }
 0x5ab   : > { %v4885_v38 = vpop.eup %4884  ;;  %v3732_v8 = vmul.f32 1.442695, %v3677_v39 }
 0x5ac   : > { %v4887_v45 = vpop.eup %4886  ;;  %v3772_v50 = vadd.f32 1.0, %v4885_v38 }
 0x5ad   : > { %3835 = vst [vmem:[%s6657_s8 + $0xa8] sm:$0xff] %v4887_v45  ;;  %4888 = vpow2.f32 %v3732_v8  ;;  %v3562_v12 = vpop.f32.mrf.mxu0 }
 0x5ae   : > { %4890 = vrcp.f32 %v3772_v50  ;;  %v3634_v29 = vpop.f32.mrf.mxu1  ;;  %v3563_v50 = vadd.f32 %v6636_v36, %v3562_v12 }
 0x5af   : > { %v3635_v35 = vadd.f32 %v3634_v29, %v3546_v57 }
 0x5b1   : > { %v3678_v40 = vsub.f32 0.0, %v3635_v35 }
 0x5b3   : > { %v4889_v62 = vpop.eup %4888  ;;  %v3734_v10 = vmul.f32 1.442695, %v3678_v40 }
 0x5b4   : > { %v4891_v26 = vpop.eup %4890  ;;  %v3773_v3 = vadd.f32 1.0, %v4889_v62 }
 0x5b5   : > { %3836 = vst [vmem:[%s6657_s8 + $0xb0] sm:$0xff] %v4891_v26  ;;  %4892 = vpow2.f32 %v3734_v10 }
 0x5b6   : > { %4894 = vrcp.f32 %v3773_v3  ;;  %v3636_v11 = vpop.f32.mrf.mxu1 }
 0x5b7   : > { %v3637_v24 = vadd.f32 %v3636_v11, %v3548_v23 }
 0x5b9   : > { %v3679_v5 = vsub.f32 0.0, %v3637_v24 }
 0x5bb   : > { %v4893_v37 = vpop.eup %4892  ;;  %v3736_v54 = vmul.f32 1.442695, %v3679_v5 }
 0x5bc   : > { %v4895_v20 = vpop.eup %4894  ;;  %v3774_v14 = vadd.f32 1.0, %v4893_v37 }
 0x5bd   : > { %3837 = vst [vmem:[%s6657_s8 + $0xb8] sm:$0xff] %v4895_v20  ;;  %4896 = vpow2.f32 %v3736_v54 }
 0x5be   : > { %4898 = vrcp.f32 %v3774_v14  ;;  %v3639_v60 = vpop.f32.mrf.mxu1 }
 0x5bf   : > { %v3640_v61 = vadd.f32 %v3639_v60, %v3551_v31 }
 0x5c1   : > { %v3680_v47 = vsub.f32 0.0, %v3640_v61 }
 0x5c3   : > { %v4897_v46 = vpop.eup %4896  ;;  %v3738_v55 = vmul.f32 1.442695, %v3680_v47 }
 0x5c4   : > { %v4899_v48 = vpop.eup %4898  ;;  %v3775_v59 = vadd.f32 1.0, %v4897_v46 }
 0x5c5   : > { %3838 = vst [vmem:[%s6657_s8 + $0xc0] sm:$0xff] %v4899_v48  ;;  %4900 = vpow2.f32 %v3738_v55 }
 0x5c6   : > { %4902 = vrcp.f32 %v3775_v59  ;;  %v3641_v9 = vpop.f32.mrf.mxu1 }
 0x5c7   : > { %v3642_v58 = vadd.f32 %v3641_v9, %v3553_v6 }
 0x5c9   : > { %v3681_v4 = vsub.f32 0.0, %v3642_v58 }
 0x5cb   : > { %v4901_v25 = vpop.eup %4900  ;;  %v3740_v0 = vmul.f32 1.442695, %v3681_v4 }
 0x5cc   : > { %v4903_v13 = vpop.eup %4902  ;;  %v3776_v2 = vadd.f32 1.0, %v4901_v25 }
 0x5cd   : > { %3839 = vst [vmem:[%s6657_s8 + $0xc8] sm:$0xff] %v4903_v13  ;;  %4904 = vpow2.f32 %v3740_v0 }
 0x5ce   : > { %4906 = vrcp.f32 %v3776_v2  ;;  %v3644_v63 = vpop.f32.mrf.mxu1 }
 0x5cf   : > { %v3645_v17 = vadd.f32 %v3644_v63, %v3556_v27 }
 0x5d1   : > { %v3682_v53 = vsub.f32 0.0, %v3645_v17 }
 0x5d3   : > { %v4905_v52 = vpop.eup %4904  ;;  %v3742_v1 = vmul.f32 1.442695, %v3682_v53 }
 0x5d4   : > { %v4907_v28 = vpop.eup %4906  ;;  %v3777_v41 = vadd.f32 1.0, %v4905_v52 }
 0x5d5   : > { %3840 = vst [vmem:[%s6657_s8 + $0xd0] sm:$0xff] %v4907_v28  ;;  %4908 = vpow2.f32 %v3742_v1 }
 0x5d6   : > { %4910 = vrcp.f32 %v3777_v41  ;;  %v3646_v49 = vpop.f32.mrf.mxu1 }
 0x5d7   : > { %v3647_v42 = vadd.f32 %v3646_v49, %v3558_v18 }
 0x5d9   : > { %v3683_v34 = vsub.f32 0.0, %v3647_v42 }
 0x5db   : > { %v4909_v19 = vpop.eup %4908  ;;  %v3744_v51 = vmul.f32 1.442695, %v3683_v34 }
 0x5dc   : > { %v4911_v33 = vpop.eup %4910  ;;  %v3778_v32 = vadd.f32 1.0, %v4909_v19 }
 0x5dd   : > { %3841 = vst [vmem:[%s6657_s8 + $0xd8] sm:$0xff] %v4911_v33  ;;  %4912 = vpow2.f32 %v3744_v51 }
 0x5de   : > { %4914 = vrcp.f32 %v3778_v32  ;;  %v3649_v16 = vpop.f32.mrf.mxu1 }
 0x5df   : > { %v3650_v15 = vadd.f32 %v3649_v16, %v3561_v44 }
 0x5e1   : > { %v3684_v43 = vsub.f32 0.0, %v3650_v15 }
 0x5e3   : > { %v4913_v39 = vpop.eup %4912  ;;  %v3746_v38 = vmul.f32 1.442695, %v3684_v43 }
 0x5e4   : > { %v4915_v8 = vpop.eup %4914  ;;  %v3779_v45 = vadd.f32 1.0, %v4913_v39 }
 0x5e5   : > { %3842 = vst [vmem:[%s6657_s8 + $0xe0] sm:$0xff] %v4915_v8  ;;  %4916 = vpow2.f32 %v3746_v38 }
 0x5e6   : > { %4918 = vrcp.f32 %v3779_v45  ;;  %v3651_v57 = vpop.f32.mrf.mxu1 }
 0x5e7   : > { %v3652_v29 = vadd.f32 %v3651_v57, %v3563_v50 }
 0x5e9   : > { %v3685_v35 = vsub.f32 0.0, %v3652_v29 }
 0x5eb   : > { %v4917_v30 = vpop.eup %4916  ;;  %v3748_v40 = vmul.f32 1.442695, %v3685_v35 }
 0x5ec   : > { %v4919_v62 = vpop.eup %4918  ;;  %v3780_v10 = vadd.f32 1.0, %v4917_v30 }
 0x5ed   : > { %3843 = vst [vmem:[%s6657_s8 + $0xe8] sm:$0xff] %v4919_v62  ;;  %4920 = vpow2.f32 %v3748_v40 }
 0x5ee   : > { %4922 = vrcp.f32 %v3780_v10 }
 0x5f3   : > { %v4921_v26 = vpop.eup %4920 }
 0x5f4   : > { %v4923_v3 = vpop.eup %4922  ;;  %v3781_v23 = vadd.f32 1.0, %v4921_v26 }
 0x5f5   : > { %3844 = vst [vmem:[%s6657_s8 + $0xf0] sm:$0xff] %v4923_v3 }
 0x5f6   : > { %4924 = vrcp.f32 %v3781_v23 }
 0x5fc   : > { %v4925_v36 = vpop.eup %4924 }
 0x5fd   : > { %3845 = vst [vmem:[%s6657_s8 + $0xf8] sm:$0xff] %v4925_v36 }
 0x5fe PF: > { %p19_p4 = scmp.ge.s32.totalorder %s5242_s23, 4   ;;  %s7051_s24 = smov %s5112_s25 }
 0x5ff   : > { %s7052_s25 = smov %s5116_s26  ;;  %s7053_s26 = smov %s5251_s9 }
 0x600   : > { %s7054_s27 = smov %s5242_s23  ;;  %21 = sbr.rel (!%p19_p4) target bundleno = 5 (0x5), region = 104 }
 0x605   :  { %3868 = vsyncpa [#allocation3], 1 }
 0x606   :  { %3870 = vsyncpa [#allocation3 + $0x1], 1 }
 0x607   :  { %3871 = vsyncpa [#allocation5], 1 }
 0x608   :  { %3872 = vsyncpa [#allocation8], 1 }

</bundles_post_ra>
